<compile_context>
chip_gen: v6e
topology: v6e:2x2x1
jax: 0.10.0
libtpu: 0.0.40
codegen_flags: <defaults>
</compile_context>

<pallas_src>
import numpy as np
import jax
import jax.numpy as jnp
from jax import lax
from jax.experimental import pallas as pl
from jax.experimental.pallas import tpu as pltpu


# ----------------------------- model dimensions (small) -----------------------------
T_TOK   = 8      # number of tokens (incl. leading 0, like tokens.insert(0, 0))
E_TXT   = 32     # text embedding dim
H_TEN   = 64     # text-encoder channels  (t_en)      [real: 512]
E_BERT  = 32     # bert embedding dim
D_BERT  = 48     # bert hidden            (bert_dur)  [real: 768]
D_HID   = 64     # predictor hidden       (d_en, d)   [real: 512]
STYLE   = 128    # style dim (kept at 128 so the [:, :128]/[:, 128:] splits are exact)
NOISE   = 256    # sampler noise dim (torch.randn((1, 256)))
H_LSTM  = 32     # predictor LSTM hidden
N_DUR   = 8      # duration_proj output bins          [real: 50]
UPSAMP  = 128    # decoder samples per frame (128 -> lane-dense decoder output) [real: 300]
TRUNC   = 50     # out[..., :-50]

MAX_FRAMES = 128   # static frame bucket; round(dur) <= N_DUR per token so T_TOK*N_DUR bounds it

assert D_HID + H_TEN == 128            # fused (d || t_en) tile is exactly 128 lanes
assert MAX_FRAMES >= T_TOK * N_DUR     # static bucket can never overflow
assert MAX_FRAMES % 8 == 0 and UPSAMP % 128 == 0


def _vmem():
    return pl.BlockSpec(memory_space=pltpu.MemorySpace.VMEM)


def _smem():
    return pl.BlockSpec(memory_space=pltpu.MemorySpace.SMEM)


# ----------------------------- fused end-to-end kernel -----------------------------
def _fused_kernel(scal, emb, embb, nr,
                  w_te, b_te, w_bert, b_bert,
                  w_samp_nr, w_samp_b, b_samp,
                  w_bd, w_ps, b_fold,
                  wx, wh, b_l, w_dur, b_dur,
                  w_comb, w_s_dec, w_ref_dec, b_comb,
                  wave_out, nf_out, x_scr):
    f32 = jnp.float32
    alpha = scal[0]
    beta = scal[1]
    escale = scal[2]

    # --- token phase (all activations stay in VMEM / vregs) ---------------------------------
    # text encoder surrogate:  t_en = relu(emb @ W + b)                        (T, H_TEN)
    t_en = jnp.maximum(
        jnp.dot(emb[...], w_te[...], preferred_element_type=f32) + b_te[...], 0.0)

    # PL-BERT surrogate                                                        (T, D_BERT)
    bert = jnp.tanh(jnp.dot(embb[...], w_bert[...], preferred_element_type=f32) + b_bert[...])

    # diffusion sampler surrogate on [noise | ref_s | pooled bert]:
    #   the noise/ref_s halves are merged into ONE K=512 matmul (weights stacked host-side),
    #   the data-dependent bert-pool path stays separate.
    refs = nr[:, NOISE:]                                       # (1, 2*STYLE) = ref_s
    pool = jnp.mean(bert, axis=0, keepdims=True) * escale      # (1, D_BERT)
    s_pred = jnp.tanh(
        jnp.dot(nr[...], w_samp_nr[...], preferred_element_type=f32)
        + jnp.dot(pool, w_samp_b[...], preferred_element_type=f32)
        + b_samp[...])                                         # (1, 2*STYLE)

    # style mixing
    ref = alpha * s_pred[:, :STYLE] + (1.0 - alpha) * refs[:, :STYLE]
    s = beta * s_pred[:, STYLE:] + (1.0 - beta) * refs[:, STYLE:]

    # predictor.text_encoder surrogate with bert_encoder folded in (w_bd = w_be @ w_pte_d):
    #   d = relu(bert @ w_bd + s @ w_ps + b_fold)              (T, D_HID)
    d = jnp.maximum(
        jnp.dot(bert, w_bd[...], preferred_element_type=f32)
        + jnp.dot(s, w_ps[...], preferred_element_type=f32)
        + b_fold[...], 0.0)

    # predictor LSTM (forward direction); input projection hoisted out of the recurrence,
    # per-step hidden states written straight into a VMEM scratch (no 8-way sublane concat).
    xg = jnp.dot(d, wx[...], preferred_element_type=f32) + b_l[...]     # (T, 4*H_LSTM)
    wh_v = wh[...]
    h = jnp.zeros((1, H_LSTM), f32)
    c = jnp.zeros((1, H_LSTM), f32)
    for t in range(T_TOK):
        gates = xg[t:t + 1, :] + jnp.dot(h, wh_v, preferred_element_type=f32)
        i_g = jax.nn.sigmoid(gates[:, 0 * H_LSTM:1 * H_LSTM])
        f_g = jax.nn.sigmoid(gates[:, 1 * H_LSTM:2 * H_LSTM])
        g_g = jnp.tanh(gates[:, 2 * H_LSTM:3 * H_LSTM])
        o_g = jax.nn.sigmoid(gates[:, 3 * H_LSTM:4 * H_LSTM])
        c = f_g * c + i_g * g_g
        h = o_g * jnp.tanh(c)
        x_scr[pl.ds(t, 1), :] = h
    x = x_scr[...]                                                      # (T, H_LSTM)

    # duration head: sigmoid(duration_proj(x)).sum(-1); round/clamp in-kernel.
    logits = jnp.dot(x, w_dur[...], preferred_element_type=f32) + b_dur[...]
    dur = jnp.sum(jax.nn.sigmoid(logits), axis=-1, keepdims=True)       # (T, 1)
    pd = jnp.maximum(jnp.round(dur), 1.0)                               # (T, 1) integer-valued f32

    # --- in-kernel cumulative durations (masked sublane reductions; no cumsum primitive) ---
    u = lax.broadcasted_iota(jnp.int32, (T_TOK, T_TOK), 0)   # source token index
    v = lax.broadcasted_iota(jnp.int32, (T_TOK, T_TOK), 1)   # destination token index
    cum_row = jnp.sum(jnp.where(u <= v, pd, 0.0), axis=0, keepdims=True)    # (1, T) inclusive cumsum
    cprev_row = jnp.sum(jnp.where(u < v, pd, 0.0), axis=0, keepdims=True)   # (1, T) exclusive cumsum
    nf = jnp.sum(pd, axis=0, keepdims=True)                                 # (1, 1) total frames

    # --- frame phase: whole static MAX_FRAMES bucket at once --------------------------------
    # Alignment matrix (frames on sublanes, tokens on lanes), hifigan one-frame right shift
    # folded in via source frame f' = max(f - 1, 0):  aln[f, t] = 1  iff  cprev[t] <= f' < cum[t].
    fcol = lax.broadcasted_iota(jnp.int32, (MAX_FRAMES, 1), 0)
    fshift = jnp.maximum(fcol - 1, 0).astype(f32)                           # (F, 1)
    aln = ((fshift >= cprev_row) & (fshift < cum_row)).astype(f32)          # (F, T)

    # Fused alignment matmul on the 128-lane (d || t_en) tile: en_asr = aln @ [d | t_en]
    dt = jnp.concatenate([d, t_en], axis=1)                                 # (T, 128)
    en_asr = jnp.dot(aln, dt, preferred_element_type=f32)                   # (F, 128)

    # Decoder with the linear F0/N head folded in (exact, no nonlinearity in the surrogate):
    #   dec = en_asr @ W_comb + s @ W_s + ref @ W_ref + b'
    # The style contribution is frame-invariant -> computed once as a (1, UPSAMP) bias.
    style_bias = (jnp.dot(s, w_s_dec[...], preferred_element_type=f32)
                  + jnp.dot(ref, w_ref_dec[...], preferred_element_type=f32)
                  + b_comb[...])                                            # (1, UPSAMP)
    dec = jnp.dot(en_asr, w_comb[...], preferred_element_type=f32) + style_bias
    frames = jnp.tanh(dec)                                                  # (F, UPSAMP)

    # Mask frames beyond the data-dependent n_frames of the static bucket; lane-dense store.
    valid = fcol.astype(f32) < nf                                           # (F, 1)
    wave_out[...] = jnp.where(valid, frames, 0.0)
    nf_out[...] = nf


def styletts2_fused(scal, emb, emb_b, nr, p):
    vm = _vmem()
    n_weights = 19
    return pl.pallas_call(
        _fused_kernel,
        out_shape=(jax.ShapeDtypeStruct((MAX_FRAMES, UPSAMP), jnp.float32),
                   jax.ShapeDtypeStruct((1, 1), jnp.float32)),
        in_specs=[_smem()] + [vm] * (3 + n_weights),
        out_specs=(vm, vm),
        scratch_shapes=[pltpu.VMEM((T_TOK, H_LSTM), jnp.float32)],
        cost_estimate=pl.CostEstimate(flops=5_000_000,
                                      transcendentals=20_000,
                                      bytes_accessed=900_000),
    )(scal, emb, emb_b, nr,
      p["w_te"], p["b_te"], p["w_bert"], p["b_bert"],
      p["w_samp_nr"], p["w_samp_b"], p["b_samp"],
      p["w_bd"], p["w_ps"], p["b_fold"],
      p["wx"], p["wh"], p["b_lstm"], p["w_dur"], p["b_dur"],
      p["w_comb"], p["w_s_dec"], p["w_dec_ref"], p["b_comb"])


# ----------------------------- parameters (deterministic, synthetic) -----------------------------
def init_params(key):
    def nrm(k, shape, scale=0.1):
        return (scale * jax.random.normal(k, shape)).astype(jnp.float32)

    keys = iter(jax.random.split(key, 32))
    p = {
        "emb_text": nrm(next(keys), (64, E_TXT), 1.0),
        "w_te": nrm(next(keys), (E_TXT, H_TEN)), "b_te": nrm(next(keys), (1, H_TEN)),
        "emb_bert": nrm(next(keys), (64, E_BERT), 1.0),
        "w_bert": nrm(next(keys), (E_BERT, D_BERT)), "b_bert": nrm(next(keys), (1, D_BERT)),
        "w_be": nrm(next(keys), (D_BERT, D_HID)), "b_be": nrm(next(keys), (1, D_HID)),
        # sampler weight split over its concatenated input [noise | bert_pool | ref_s]
        "w_samp_n": nrm(next(keys), (NOISE, 2 * STYLE)),
        "w_samp_b": nrm(next(keys), (D_BERT, 2 * STYLE)),
        "w_samp_r": nrm(next(keys), (2 * STYLE, 2 * STYLE)),
        "b_samp": nrm(next(keys), (1, 2 * STYLE)),
        # predictor text-encoder weight split over [d_en | s]
        "w_pte_d": nrm(next(keys), (D_HID, D_HID)),
        "w_pte_s": nrm(next(keys), (STYLE, D_HID)),
        "b_pte": nrm(next(keys), (1, D_HID)),
        "wx": nrm(next(keys), (D_HID, 4 * H_LSTM)), "wh": nrm(next(keys), (H_LSTM, 4 * H_LSTM)),
        "b_lstm": nrm(next(keys), (1, 4 * H_LSTM)),
        "w_dur": nrm(next(keys), (H_LSTM, N_DUR), 1.0), "b_dur": nrm(next(keys), (1, N_DUR), 1.0),
        # F0/N heads merged into one 2-column weight, split over [en | s]
        "w_f0n_en": nrm(next(keys), (D_HID, 2)), "w_f0n_s": nrm(next(keys), (STYLE, 2)),
        "b_f0n": nrm(next(keys), (1, 2)),
        # decoder weight split over [asr | F0,N | ref]
        "w_dec_asr": nrm(next(keys), (H_TEN, UPSAMP)),
        "w_dec_f0n": nrm(next(keys), (2, UPSAMP)),
        "w_dec_ref": nrm(next(keys), (STYLE, UPSAMP)),
        "b_dec": nrm(next(keys), (1, UPSAMP)),
    }
    return p


def fold_params(p):
    """Host-side algebraic folds (exact, all folded ops are linear in the surrogates)."""
    q = {
        "emb_text": p["emb_text"], "emb_bert": p["emb_bert"],
        "w_te": p["w_te"], "b_te": p["b_te"],
        "w_bert": p["w_bert"], "b_bert": p["b_bert"],
        # merged sampler weight for the concatenated [noise | ref_s] input
        "w_samp_nr": jnp.concatenate([p["w_samp_n"], p["w_samp_r"]], axis=0),
        "w_samp_b": p["w_samp_b"], "b_samp": p["b_samp"],
        # bert_encoder folded into the predictor text-encoder: d = relu(bert @ w_bd + s @ w_ps + b_fold)
        "w_bd": p["w_be"] @ p["w_pte_d"],
        "w_ps": p["w_pte_s"],
        "b_fold": p["b_be"] @ p["w_pte_d"] + p["b_pte"],
        "wx": p["wx"], "wh": p["wh"], "b_lstm": p["b_lstm"],
        "w_dur": p["w_dur"], "b_dur": p["b_dur"],
        # linear F0/N head folded into the decoder:
        #   dec = [en | asr] @ w_comb + s @ w_s_dec + ref @ w_dec_ref + b_comb
        "w_comb": jnp.concatenate([p["w_f0n_en"] @ p["w_dec_f0n"], p["w_dec_asr"]], axis=0),
        "w_s_dec": p["w_f0n_s"] @ p["w_dec_f0n"],
        "w_dec_ref": p["w_dec_ref"],
        "b_comb": p["b_f0n"] @ p["w_dec_f0n"] + p["b_dec"],
    }
    return q


# ----------------------------- forward (device-side, single kernel launch) -----------------------------
def styletts2_forward(tokens, ref_s, noise, scal, params):
    """tokens: (T,) int32, ref_s: (1, 256), noise: (1, 256), scal: (alpha, beta, emb_scale).

    Returns (padded waveform of static length MAX_FRAMES*UPSAMP, n_samples)."""
    # embedding lookups + sampler-input concat (tiny XLA glue around the single kernel)
    emb = jnp.take(params["emb_text"], tokens, axis=0)                 # (T, E_TXT)
    emb_b = jnp.take(params["emb_bert"], tokens, axis=0)               # (T, E_BERT)
    nr = jnp.concatenate([noise, ref_s], axis=1)                       # (1, NOISE + 2*STYLE)

    wave_pad, nf = styletts2_fused(scal, emb, emb_b, nr, params)       # (MAX_FRAMES, UPSAMP), (1,1)

    n_samples = nf[0, 0].astype(jnp.int32) * UPSAMP
    return wave_pad.reshape(-1), n_samples


# ----------------------------- main -----------------------------
if __name__ == "__main__":
    key = jax.random.PRNGKey(0)
    k_p, k_ref, k_noise = jax.random.split(key, 3)

    params = fold_params(init_params(k_p))

    # tokens (leading 0, like tokens.insert(0, 0)); ref_s = [style | prosody] reference (1, 256)
    tokens = jnp.asarray([0, 5, 12, 7, 3, 19, 2, 9], dtype=jnp.int32)
    ref_s = (0.5 * jax.random.normal(k_ref, (1, 2 * STYLE))).astype(jnp.float32)
    noise = jax.random.normal(k_noise, (1, NOISE)).astype(jnp.float32)
    scal = jnp.asarray([0.3, 0.0, 1.0], dtype=jnp.float32)   # alpha, beta, embedding_scale

    fwd = jax.jit(styletts2_forward)
    wave_pad, n_samples = fwd(tokens, ref_s, noise, scal, params)
    wave_pad, n_samples = jax.block_until_ready((wave_pad, n_samples))

    # final truncation out[..., :-50] (only host interaction, after all compute finished)
    n_valid = int(n_samples) - TRUNC
    wave = np.asarray(wave_pad)[:n_valid]

    assert wave.ndim == 1 and wave.shape[0] >= 1 and np.all(np.isfinite(wave))
    print("KERNEL_OK")
</pallas_src>

<mosaic_0001>
module attributes {stable_mosaic.version = 11 : i64} {
  func.func @_fused_kernel(%arg0: memref<3xf32, #tpu.memory_space<smem>>, %arg1: memref<8x32xf32, #tpu.memory_space<vmem>>, %arg2: memref<8x32xf32, #tpu.memory_space<vmem>>, %arg3: memref<1x512xf32, #tpu.memory_space<vmem>>, %arg4: memref<32x64xf32, #tpu.memory_space<vmem>>, %arg5: memref<1x64xf32, #tpu.memory_space<vmem>>, %arg6: memref<32x48xf32, #tpu.memory_space<vmem>>, %arg7: memref<1x48xf32, #tpu.memory_space<vmem>>, %arg8: memref<512x256xf32, #tpu.memory_space<vmem>>, %arg9: memref<48x256xf32, #tpu.memory_space<vmem>>, %arg10: memref<1x256xf32, #tpu.memory_space<vmem>>, %arg11: memref<48x64xf32, #tpu.memory_space<vmem>>, %arg12: memref<128x64xf32, #tpu.memory_space<vmem>>, %arg13: memref<1x64xf32, #tpu.memory_space<vmem>>, %arg14: memref<64x128xf32, #tpu.memory_space<vmem>>, %arg15: memref<32x128xf32, #tpu.memory_space<vmem>>, %arg16: memref<1x128xf32, #tpu.memory_space<vmem>>, %arg17: memref<32x8xf32, #tpu.memory_space<vmem>>, %arg18: memref<1x8xf32, #tpu.memory_space<vmem>>, %arg19: memref<128x128xf32, #tpu.memory_space<vmem>>, %arg20: memref<128x128xf32, #tpu.memory_space<vmem>>, %arg21: memref<128x128xf32, #tpu.memory_space<vmem>>, %arg22: memref<1x128xf32, #tpu.memory_space<vmem>>, %arg23: memref<128x128xf32, #tpu.memory_space<vmem>>, %arg24: memref<1x1xf32, #tpu.memory_space<vmem>>, %arg25: memref<8x32xf32, #tpu.memory_space<vmem>>) attributes {dimension_semantics = [], scalar_prefetch = 0 : i64, scratch_operands = 1 : i64, tpu.core_type = #tpu.core_type<tc>} {
    %c0 = arith.constant 0 : index
    %0 = memref.load %arg0[%c0] : memref<3xf32, #tpu.memory_space<smem>>
    %c1 = arith.constant 1 : index
    %1 = memref.load %arg0[%c1] : memref<3xf32, #tpu.memory_space<smem>>
    %c2 = arith.constant 2 : index
    %2 = memref.load %arg0[%c2] : memref<3xf32, #tpu.memory_space<smem>>
    %c0_0 = arith.constant 0 : index
    %c0_1 = arith.constant 0 : index
    %3 = vector.load %arg1[%c0_0, %c0_1] : memref<8x32xf32, #tpu.memory_space<vmem>>, vector<8x32xf32>
    %c0_2 = arith.constant 0 : index
    %c0_3 = arith.constant 0 : index
    %4 = vector.load %arg4[%c0_2, %c0_3] : memref<32x64xf32, #tpu.memory_space<vmem>>, vector<32x64xf32>
    %cst = arith.constant dense<0.000000e+00> : vector<8x64xf32>
    %5 = tpu.matmul %3, %4, %cst {dimension_numbers = #tpu.dot_dimension_numbers<[1], [0], [0], [1], [0, 0, 1, 1], [], []>} : vector<8x32xf32>, vector<32x64xf32>, vector<8x64xf32> -> vector<8x64xf32>
    %c0_4 = arith.constant 0 : index
    %c0_5 = arith.constant 0 : index
    %6 = vector.load %arg5[%c0_4, %c0_5] : memref<1x64xf32, #tpu.memory_space<vmem>>, vector<1x64xf32>
    %7 = vector.broadcast %6 : vector<1x64xf32> to vector<8x64xf32>
    %8 = arith.addf %5, %7 : vector<8x64xf32>
    %cst_6 = arith.constant 0.000000e+00 : f32
    %9 = vector.broadcast %cst_6 : f32 to vector<8x64xf32>
    %10 = arith.maximumf %8, %9 : vector<8x64xf32>
    %c0_7 = arith.constant 0 : index
    %c0_8 = arith.constant 0 : index
    %11 = vector.load %arg2[%c0_7, %c0_8] : memref<8x32xf32, #tpu.memory_space<vmem>>, vector<8x32xf32>
    %c0_9 = arith.constant 0 : index
    %c0_10 = arith.constant 0 : index
    %12 = vector.load %arg6[%c0_9, %c0_10] : memref<32x48xf32, #tpu.memory_space<vmem>>, vector<32x48xf32>
    %cst_11 = arith.constant dense<0.000000e+00> : vector<8x48xf32>
    %13 = tpu.matmul %11, %12, %cst_11 {dimension_numbers = #tpu.dot_dimension_numbers<[1], [0], [0], [1], [0, 0, 1, 1], [], []>} : vector<8x32xf32>, vector<32x48xf32>, vector<8x48xf32> -> vector<8x48xf32>
    %c0_12 = arith.constant 0 : index
    %c0_13 = arith.constant 0 : index
    %14 = vector.load %arg7[%c0_12, %c0_13] : memref<1x48xf32, #tpu.memory_space<vmem>>, vector<1x48xf32>
    %15 = vector.broadcast %14 : vector<1x48xf32> to vector<8x48xf32>
    %16 = arith.addf %13, %15 : vector<8x48xf32>
    %17 = math.tanh %16 : vector<8x48xf32>
    %c0_14 = arith.constant 0 : index
    %c256 = arith.constant 256 : index
    %18 = vector.load %arg3[%c0_14, %c256] : memref<1x512xf32, #tpu.memory_space<vmem>>, vector<1x256xf32>
    %cst_15 = arith.constant dense<0.000000e+00> : vector<48xf32>
    %19 = vector.multi_reduction <add>, %17, %cst_15 [0] : vector<8x48xf32> to vector<48xf32>
    %20 = vector.shape_cast %19 : vector<48xf32> to vector<1x48xf32>
    %cst_16 = arith.constant 8.000000e+00 : f32
    %21 = vector.broadcast %cst_16 : f32 to vector<1x48xf32>
    %22 = arith.divf %20, %21 : vector<1x48xf32>
    %23 = vector.broadcast %2 : f32 to vector<1x48xf32>
    %24 = arith.mulf %22, %23 : vector<1x48xf32>
    %c0_17 = arith.constant 0 : index
    %c0_18 = arith.constant 0 : index
    %25 = vector.load %arg3[%c0_17, %c0_18] : memref<1x512xf32, #tpu.memory_space<vmem>>, vector<1x512xf32>
    %c0_19 = arith.constant 0 : index
    %c0_20 = arith.constant 0 : index
    %26 = vector.load %arg8[%c0_19, %c0_20] : memref<512x256xf32, #tpu.memory_space<vmem>>, vector<512x256xf32>
    %cst_21 = arith.constant dense<0.000000e+00> : vector<1x256xf32>
    %27 = tpu.matmul %25, %26, %cst_21 {dimension_numbers = #tpu.dot_dimension_numbers<[1], [0], [0], [1], [0, 0, 1, 1], [], []>} : vector<1x512xf32>, vector<512x256xf32>, vector<1x256xf32> -> vector<1x256xf32>
    %c0_22 = arith.constant 0 : index
    %c0_23 = arith.constant 0 : index
    %28 = vector.load %arg9[%c0_22, %c0_23] : memref<48x256xf32, #tpu.memory_space<vmem>>, vector<48x256xf32>
    %cst_24 = arith.constant dense<0.000000e+00> : vector<1x256xf32>
    %29 = tpu.matmul %24, %28, %cst_24 {dimension_numbers = #tpu.dot_dimension_numbers<[1], [0], [0], [1], [0, 0, 1, 1], [], []>} : vector<1x48xf32>, vector<48x256xf32>, vector<1x256xf32> -> vector<1x256xf32>
    %30 = arith.addf %27, %29 : vector<1x256xf32>
    %c0_25 = arith.constant 0 : index
    %c0_26 = arith.constant 0 : index
    %31 = vector.load %arg10[%c0_25, %c0_26] : memref<1x256xf32, #tpu.memory_space<vmem>>, vector<1x256xf32>
    %32 = arith.addf %30, %31 : vector<1x256xf32>
    %33 = math.tanh %32 : vector<1x256xf32>
    %34 = vector.extract_strided_slice %33 {offsets = [0, 0], sizes = [1, 128], strides = [1, 1]} : vector<1x256xf32> to vector<1x128xf32>
    %35 = vector.broadcast %0 : f32 to vector<1x128xf32>
    %36 = arith.mulf %35, %34 : vector<1x128xf32>
    %cst_27 = arith.constant 1.000000e+00 : f32
    %37 = arith.subf %cst_27, %0 : f32
    %38 = vector.extract_strided_slice %18 {offsets = [0, 0], sizes = [1, 128], strides = [1, 1]} : vector<1x256xf32> to vector<1x128xf32>
    %39 = vector.broadcast %37 : f32 to vector<1x128xf32>
    %40 = arith.mulf %39, %38 : vector<1x128xf32>
    %41 = arith.addf %36, %40 : vector<1x128xf32>
    %42 = vector.extract_strided_slice %33 {offsets = [0, 128], sizes = [1, 128], strides = [1, 1]} : vector<1x256xf32> to vector<1x128xf32>
    %43 = vector.broadcast %1 : f32 to vector<1x128xf32>
    %44 = arith.mulf %43, %42 : vector<1x128xf32>
    %cst_28 = arith.constant 1.000000e+00 : f32
    %45 = arith.subf %cst_28, %1 : f32
    %46 = vector.extract_strided_slice %18 {offsets = [0, 128], sizes = [1, 128], strides = [1, 1]} : vector<1x256xf32> to vector<1x128xf32>
    %47 = vector.broadcast %45 : f32 to vector<1x128xf32>
    %48 = arith.mulf %47, %46 : vector<1x128xf32>
    %49 = arith.addf %44, %48 : vector<1x128xf32>
    %c0_29 = arith.constant 0 : index
    %c0_30 = arith.constant 0 : index
    %50 = vector.load %arg11[%c0_29, %c0_30] : memref<48x64xf32, #tpu.memory_space<vmem>>, vector<48x64xf32>
    %cst_31 = arith.constant dense<0.000000e+00> : vector<8x64xf32>
    %51 = tpu.matmul %17, %50, %cst_31 {dimension_numbers = #tpu.dot_dimension_numbers<[1], [0], [0], [1], [0, 0, 1, 1], [], []>} : vector<8x48xf32>, vector<48x64xf32>, vector<8x64xf32> -> vector<8x64xf32>
    %c0_32 = arith.constant 0 : index
    %c0_33 = arith.constant 0 : index
    %52 = vector.load %arg12[%c0_32, %c0_33] : memref<128x64xf32, #tpu.memory_space<vmem>>, vector<128x64xf32>
    %cst_34 = arith.constant dense<0.000000e+00> : vector<1x64xf32>
    %53 = tpu.matmul %49, %52, %cst_34 {dimension_numbers = #tpu.dot_dimension_numbers<[1], [0], [0], [1], [0, 0, 1, 1], [], []>} : vector<1x128xf32>, vector<128x64xf32>, vector<1x64xf32> -> vector<1x64xf32>
    %54 = vector.broadcast %53 : vector<1x64xf32> to vector<8x64xf32>
    %55 = arith.addf %51, %54 : vector<8x64xf32>
    %c0_35 = arith.constant 0 : index
    %c0_36 = arith.constant 0 : index
    %56 = vector.load %arg13[%c0_35, %c0_36] : memref<1x64xf32, #tpu.memory_space<vmem>>, vector<1x64xf32>
    %57 = vector.broadcast %56 : vector<1x64xf32> to vector<8x64xf32>
    %58 = arith.addf %55, %57 : vector<8x64xf32>
    %cst_37 = arith.constant 0.000000e+00 : f32
    %59 = vector.broadcast %cst_37 : f32 to vector<8x64xf32>
    %60 = arith.maximumf %58, %59 : vector<8x64xf32>
    %c0_38 = arith.constant 0 : index
    %c0_39 = arith.constant 0 : index
    %61 = vector.load %arg14[%c0_38, %c0_39] : memref<64x128xf32, #tpu.memory_space<vmem>>, vector<64x128xf32>
    %cst_40 = arith.constant dense<0.000000e+00> : vector<8x128xf32>
    %62 = tpu.matmul %60, %61, %cst_40 {dimension_numbers = #tpu.dot_dimension_numbers<[1], [0], [0], [1], [0, 0, 1, 1], [], []>} : vector<8x64xf32>, vector<64x128xf32>, vector<8x128xf32> -> vector<8x128xf32>
    %c0_41 = arith.constant 0 : index
    %c0_42 = arith.constant 0 : index
    %63 = vector.load %arg16[%c0_41, %c0_42] : memref<1x128xf32, #tpu.memory_space<vmem>>, vector<1x128xf32>
    %64 = vector.broadcast %63 : vector<1x128xf32> to vector<8x128xf32>
    %65 = arith.addf %62, %64 : vector<8x128xf32>
    %c0_43 = arith.constant 0 : index
    %c0_44 = arith.constant 0 : index
    %66 = vector.load %arg15[%c0_43, %c0_44] : memref<32x128xf32, #tpu.memory_space<vmem>>, vector<32x128xf32>
    %cst_45 = arith.constant 0.000000e+00 : f32
    %67 = vector.broadcast %cst_45 : f32 to vector<1x32xf32>
    %cst_46 = arith.constant 0.000000e+00 : f32
    %68 = vector.broadcast %cst_46 : f32 to vector<1x32xf32>
    %69 = vector.extract_strided_slice %65 {offsets = [0, 0], sizes = [1, 128], strides = [1, 1]} : vector<8x128xf32> to vector<1x128xf32>
    %cst_47 = arith.constant dense<0.000000e+00> : vector<1x128xf32>
    %70 = tpu.matmul %67, %66, %cst_47 {dimension_numbers = #tpu.dot_dimension_numbers<[1], [0], [0], [1], [0, 0, 1, 1], [], []>} : vector<1x32xf32>, vector<32x128xf32>, vector<1x128xf32> -> vector<1x128xf32>
    %71 = arith.addf %69, %70 : vector<1x128xf32>
    %72 = vector.extract_strided_slice %71 {offsets = [0, 0], sizes = [1, 32], strides = [1, 1]} : vector<1x128xf32> to vector<1x32xf32>
    %73 = arith.negf %72 : vector<1x32xf32>
    %74 = math.exp %73 : vector<1x32xf32>
    %cst_48 = arith.constant 1.000000e+00 : f32
    %75 = vector.broadcast %cst_48 : f32 to vector<1x32xf32>
    %76 = arith.addf %75, %74 : vector<1x32xf32>
    %77 = arith.divf %75, %76 : vector<1x32xf32>
    %78 = vector.extract_strided_slice %71 {offsets = [0, 32], sizes = [1, 32], strides = [1, 1]} : vector<1x128xf32> to vector<1x32xf32>
    %79 = arith.negf %78 : vector<1x32xf32>
    %80 = math.exp %79 : vector<1x32xf32>
    %cst_49 = arith.constant 1.000000e+00 : f32
    %81 = vector.broadcast %cst_49 : f32 to vector<1x32xf32>
    %82 = arith.addf %81, %80 : vector<1x32xf32>
    %83 = arith.divf %81, %82 : vector<1x32xf32>
    %84 = vector.extract_strided_slice %71 {offsets = [0, 64], sizes = [1, 32], strides = [1, 1]} : vector<1x128xf32> to vector<1x32xf32>
    %85 = math.tanh %84 : vector<1x32xf32>
    %86 = vector.extract_strided_slice %71 {offsets = [0, 96], sizes = [1, 32], strides = [1, 1]} : vector<1x128xf32> to vector<1x32xf32>
    %87 = arith.negf %86 : vector<1x32xf32>
    %88 = math.exp %87 : vector<1x32xf32>
    %cst_50 = arith.constant 1.000000e+00 : f32
    %89 = vector.broadcast %cst_50 : f32 to vector<1x32xf32>
    %90 = arith.addf %89, %88 : vector<1x32xf32>
    %91 = arith.divf %89, %90 : vector<1x32xf32>
    %92 = arith.mulf %83, %68 : vector<1x32xf32>
    %93 = arith.mulf %77, %85 : vector<1x32xf32>
    %94 = arith.addf %92, %93 : vector<1x32xf32>
    %95 = math.tanh %94 : vector<1x32xf32>
    %96 = arith.mulf %91, %95 : vector<1x32xf32>
    %c0_51 = arith.constant 0 : index
    %c0_52 = arith.constant 0 : index
    %97 = vector.load %arg25[%c0_51, %c0_52] : memref<8x32xf32, #tpu.memory_space<vmem>>, vector<1x32xf32>
    tpu.vector_store %arg25[%c0_51, %c0_52], %96 {strides = array<i32>} : memref<8x32xf32, #tpu.memory_space<vmem>>, vector<1x32xf32>,
    %98 = vector.extract_strided_slice %65 {offsets = [1, 0], sizes = [1, 128], strides = [1, 1]} : vector<8x128xf32> to vector<1x128xf32>
    %cst_53 = arith.constant dense<0.000000e+00> : vector<1x128xf32>
    %99 = tpu.matmul %96, %66, %cst_53 {dimension_numbers = #tpu.dot_dimension_numbers<[1], [0], [0], [1], [0, 0, 1, 1], [], []>} : vector<1x32xf32>, vector<32x128xf32>, vector<1x128xf32> -> vector<1x128xf32>
    %100 = arith.addf %98, %99 : vector<1x128xf32>
    %101 = vector.extract_strided_slice %100 {offsets = [0, 0], sizes = [1, 32], strides = [1, 1]} : vector<1x128xf32> to vector<1x32xf32>
    %102 = arith.negf %101 : vector<1x32xf32>
    %103 = math.exp %102 : vector<1x32xf32>
    %cst_54 = arith.constant 1.000000e+00 : f32
    %104 = vector.broadcast %cst_54 : f32 to vector<1x32xf32>
    %105 = arith.addf %104, %103 : vector<1x32xf32>
    %106 = arith.divf %104, %105 : vector<1x32xf32>
    %107 = vector.extract_strided_slice %100 {offsets = [0, 32], sizes = [1, 32], strides = [1, 1]} : vector<1x128xf32> to vector<1x32xf32>
    %108 = arith.negf %107 : vector<1x32xf32>
    %109 = math.exp %108 : vector<1x32xf32>
    %cst_55 = arith.constant 1.000000e+00 : f32
    %110 = vector.broadcast %cst_55 : f32 to vector<1x32xf32>
    %111 = arith.addf %110, %109 : vector<1x32xf32>
    %112 = arith.divf %110, %111 : vector<1x32xf32>
    %113 = vector.extract_strided_slice %100 {offsets = [0, 64], sizes = [1, 32], strides = [1, 1]} : vector<1x128xf32> to vector<1x32xf32>
    %114 = math.tanh %113 : vector<1x32xf32>
    %115 = vector.extract_strided_slice %100 {offsets = [0, 96], sizes = [1, 32], strides = [1, 1]} : vector<1x128xf32> to vector<1x32xf32>
    %116 = arith.negf %115 : vector<1x32xf32>
    %117 = math.exp %116 : vector<1x32xf32>
    %cst_56 = arith.constant 1.000000e+00 : f32
    %118 = vector.broadcast %cst_56 : f32 to vector<1x32xf32>
    %119 = arith.addf %118, %117 : vector<1x32xf32>
    %120 = arith.divf %118, %119 : vector<1x32xf32>
    %121 = arith.mulf %112, %94 : vector<1x32xf32>
    %122 = arith.mulf %106, %114 : vector<1x32xf32>
    %123 = arith.addf %121, %122 : vector<1x32xf32>
    %124 = math.tanh %123 : vector<1x32xf32>
    %125 = arith.mulf %120, %124 : vector<1x32xf32>
    %c1_57 = arith.constant 1 : index
    %c0_58 = arith.constant 0 : index
    %126 = vector.load %arg25[%c1_57, %c0_58] : memref<8x32xf32, #tpu.memory_space<vmem>>, vector<1x32xf32>
    tpu.vector_store %arg25[%c1_57, %c0_58], %125 {strides = array<i32>} : memref<8x32xf32, #tpu.memory_space<vmem>>, vector<1x32xf32>,
    %127 = vector.extract_strided_slice %65 {offsets = [2, 0], sizes = [1, 128], strides = [1, 1]} : vector<8x128xf32> to vector<1x128xf32>
    %cst_59 = arith.constant dense<0.000000e+00> : vector<1x128xf32>
    %128 = tpu.matmul %125, %66, %cst_59 {dimension_numbers = #tpu.dot_dimension_numbers<[1], [0], [0], [1], [0, 0, 1, 1], [], []>} : vector<1x32xf32>, vector<32x128xf32>, vector<1x128xf32> -> vector<1x128xf32>
    %129 = arith.addf %127, %128 : vector<1x128xf32>
    %130 = vector.extract_strided_slice %129 {offsets = [0, 0], sizes = [1, 32], strides = [1, 1]} : vector<1x128xf32> to vector<1x32xf32>
    %131 = arith.negf %130 : vector<1x32xf32>
    %132 = math.exp %131 : vector<1x32xf32>
    %cst_60 = arith.constant 1.000000e+00 : f32
    %133 = vector.broadcast %cst_60 : f32 to vector<1x32xf32>
    %134 = arith.addf %133, %132 : vector<1x32xf32>
    %135 = arith.divf %133, %134 : vector<1x32xf32>
    %136 = vector.extract_strided_slice %129 {offsets = [0, 32], sizes = [1, 32], strides = [1, 1]} : vector<1x128xf32> to vector<1x32xf32>
    %137 = arith.negf %136 : vector<1x32xf32>
    %138 = math.exp %137 : vector<1x32xf32>
    %cst_61 = arith.constant 1.000000e+00 : f32
    %139 = vector.broadcast %cst_61 : f32 to vector<1x32xf32>
    %140 = arith.addf %139, %138 : vector<1x32xf32>
    %141 = arith.divf %139, %140 : vector<1x32xf32>
    %142 = vector.extract_strided_slice %129 {offsets = [0, 64], sizes = [1, 32], strides = [1, 1]} : vector<1x128xf32> to vector<1x32xf32>
    %143 = math.tanh %142 : vector<1x32xf32>
    %144 = vector.extract_strided_slice %129 {offsets = [0, 96], sizes = [1, 32], strides = [1, 1]} : vector<1x128xf32> to vector<1x32xf32>
    %145 = arith.negf %144 : vector<1x32xf32>
    %146 = math.exp %145 : vector<1x32xf32>
    %cst_62 = arith.constant 1.000000e+00 : f32
    %147 = vector.broadcast %cst_62 : f32 to vector<1x32xf32>
    %148 = arith.addf %147, %146 : vector<1x32xf32>
    %149 = arith.divf %147, %148 : vector<1x32xf32>
    %150 = arith.mulf %141, %123 : vector<1x32xf32>
    %151 = arith.mulf %135, %143 : vector<1x32xf32>
    %152 = arith.addf %150, %151 : vector<1x32xf32>
    %153 = math.tanh %152 : vector<1x32xf32>
    %154 = arith.mulf %149, %153 : vector<1x32xf32>
    %c2_63 = arith.constant 2 : index
    %c0_64 = arith.constant 0 : index
    %155 = vector.load %arg25[%c2_63, %c0_64] : memref<8x32xf32, #tpu.memory_space<vmem>>, vector<1x32xf32>
    tpu.vector_store %arg25[%c2_63, %c0_64], %154 {strides = array<i32>} : memref<8x32xf32, #tpu.memory_space<vmem>>, vector<1x32xf32>,
    %156 = vector.extract_strided_slice %65 {offsets = [3, 0], sizes = [1, 128], strides = [1, 1]} : vector<8x128xf32> to vector<1x128xf32>
    %cst_65 = arith.constant dense<0.000000e+00> : vector<1x128xf32>
    %157 = tpu.matmul %154, %66, %cst_65 {dimension_numbers = #tpu.dot_dimension_numbers<[1], [0], [0], [1], [0, 0, 1, 1], [], []>} : vector<1x32xf32>, vector<32x128xf32>, vector<1x128xf32> -> vector<1x128xf32>
    %158 = arith.addf %156, %157 : vector<1x128xf32>
    %159 = vector.extract_strided_slice %158 {offsets = [0, 0], sizes = [1, 32], strides = [1, 1]} : vector<1x128xf32> to vector<1x32xf32>
    %160 = arith.negf %159 : vector<1x32xf32>
    %161 = math.exp %160 : vector<1x32xf32>
    %cst_66 = arith.constant 1.000000e+00 : f32
    %162 = vector.broadcast %cst_66 : f32 to vector<1x32xf32>
    %163 = arith.addf %162, %161 : vector<1x32xf32>
    %164 = arith.divf %162, %163 : vector<1x32xf32>
    %165 = vector.extract_strided_slice %158 {offsets = [0, 32], sizes = [1, 32], strides = [1, 1]} : vector<1x128xf32> to vector<1x32xf32>
    %166 = arith.negf %165 : vector<1x32xf32>
    %167 = math.exp %166 : vector<1x32xf32>
    %cst_67 = arith.constant 1.000000e+00 : f32
    %168 = vector.broadcast %cst_67 : f32 to vector<1x32xf32>
    %169 = arith.addf %168, %167 : vector<1x32xf32>
    %170 = arith.divf %168, %169 : vector<1x32xf32>
    %171 = vector.extract_strided_slice %158 {offsets = [0, 64], sizes = [1, 32], strides = [1, 1]} : vector<1x128xf32> to vector<1x32xf32>
    %172 = math.tanh %171 : vector<1x32xf32>
    %173 = vector.extract_strided_slice %158 {offsets = [0, 96], sizes = [1, 32], strides = [1, 1]} : vector<1x128xf32> to vector<1x32xf32>
    %174 = arith.negf %173 : vector<1x32xf32>
    %175 = math.exp %174 : vector<1x32xf32>
    %cst_68 = arith.constant 1.000000e+00 : f32
    %176 = vector.broadcast %cst_68 : f32 to vector<1x32xf32>
    %177 = arith.addf %176, %175 : vector<1x32xf32>
    %178 = arith.divf %176, %177 : vector<1x32xf32>
    %179 = arith.mulf %170, %152 : vector<1x32xf32>
    %180 = arith.mulf %164, %172 : vector<1x32xf32>
    %181 = arith.addf %179, %180 : vector<1x32xf32>
    %182 = math.tanh %181 : vector<1x32xf32>
    %183 = arith.mulf %178, %182 : vector<1x32xf32>
    %c3 = arith.constant 3 : index
    %c0_69 = arith.constant 0 : index
    %184 = vector.load %arg25[%c3, %c0_69] : memref<8x32xf32, #tpu.memory_space<vmem>>, vector<1x32xf32>
    tpu.vector_store %arg25[%c3, %c0_69], %183 {strides = array<i32>} : memref<8x32xf32, #tpu.memory_space<vmem>>, vector<1x32xf32>,
    %185 = vector.extract_strided_slice %65 {offsets = [4, 0], sizes = [1, 128], strides = [1, 1]} : vector<8x128xf32> to vector<1x128xf32>
    %cst_70 = arith.constant dense<0.000000e+00> : vector<1x128xf32>
    %186 = tpu.matmul %183, %66, %cst_70 {dimension_numbers = #tpu.dot_dimension_numbers<[1], [0], [0], [1], [0, 0, 1, 1], [], []>} : vector<1x32xf32>, vector<32x128xf32>, vector<1x128xf32> -> vector<1x128xf32>
    %187 = arith.addf %185, %186 : vector<1x128xf32>
    %188 = vector.extract_strided_slice %187 {offsets = [0, 0], sizes = [1, 32], strides = [1, 1]} : vector<1x128xf32> to vector<1x32xf32>
    %189 = arith.negf %188 : vector<1x32xf32>
    %190 = math.exp %189 : vector<1x32xf32>
    %cst_71 = arith.constant 1.000000e+00 : f32
    %191 = vector.broadcast %cst_71 : f32 to vector<1x32xf32>
    %192 = arith.addf %191, %190 : vector<1x32xf32>
    %193 = arith.divf %191, %192 : vector<1x32xf32>
    %194 = vector.extract_strided_slice %187 {offsets = [0, 32], sizes = [1, 32], strides = [1, 1]} : vector<1x128xf32> to vector<1x32xf32>
    %195 = arith.negf %194 : vector<1x32xf32>
    %196 = math.exp %195 : vector<1x32xf32>
    %cst_72 = arith.constant 1.000000e+00 : f32
    %197 = vector.broadcast %cst_72 : f32 to vector<1x32xf32>
    %198 = arith.addf %197, %196 : vector<1x32xf32>
    %199 = arith.divf %197, %198 : vector<1x32xf32>
    %200 = vector.extract_strided_slice %187 {offsets = [0, 64], sizes = [1, 32], strides = [1, 1]} : vector<1x128xf32> to vector<1x32xf32>
    %201 = math.tanh %200 : vector<1x32xf32>
    %202 = vector.extract_strided_slice %187 {offsets = [0, 96], sizes = [1, 32], strides = [1, 1]} : vector<1x128xf32> to vector<1x32xf32>
    %203 = arith.negf %202 : vector<1x32xf32>
    %204 = math.exp %203 : vector<1x32xf32>
    %cst_73 = arith.constant 1.000000e+00 : f32
    %205 = vector.broadcast %cst_73 : f32 to vector<1x32xf32>
    %206 = arith.addf %205, %204 : vector<1x32xf32>
    %207 = arith.divf %205, %206 : vector<1x32xf32>
    %208 = arith.mulf %199, %181 : vector<1x32xf32>
    %209 = arith.mulf %193, %201 : vector<1x32xf32>
    %210 = arith.addf %208, %209 : vector<1x32xf32>
    %211 = math.tanh %210 : vector<1x32xf32>
    %212 = arith.mulf %207, %211 : vector<1x32xf32>
    %c4 = arith.constant 4 : index
    %c0_74 = arith.constant 0 : index
    %213 = vector.load %arg25[%c4, %c0_74] : memref<8x32xf32, #tpu.memory_space<vmem>>, vector<1x32xf32>
    tpu.vector_store %arg25[%c4, %c0_74], %212 {strides = array<i32>} : memref<8x32xf32, #tpu.memory_space<vmem>>, vector<1x32xf32>,
    %214 = vector.extract_strided_slice %65 {offsets = [5, 0], sizes = [1, 128], strides = [1, 1]} : vector<8x128xf32> to vector<1x128xf32>
    %cst_75 = arith.constant dense<0.000000e+00> : vector<1x128xf32>
    %215 = tpu.matmul %212, %66, %cst_75 {dimension_numbers = #tpu.dot_dimension_numbers<[1], [0], [0], [1], [0, 0, 1, 1], [], []>} : vector<1x32xf32>, vector<32x128xf32>, vector<1x128xf32> -> vector<1x128xf32>
    %216 = arith.addf %214, %215 : vector<1x128xf32>
    %217 = vector.extract_strided_slice %216 {offsets = [0, 0], sizes = [1, 32], strides = [1, 1]} : vector<1x128xf32> to vector<1x32xf32>
    %218 = arith.negf %217 : vector<1x32xf32>
    %219 = math.exp %218 : vector<1x32xf32>
    %cst_76 = arith.constant 1.000000e+00 : f32
    %220 = vector.broadcast %cst_76 : f32 to vector<1x32xf32>
    %221 = arith.addf %220, %219 : vector<1x32xf32>
    %222 = arith.divf %220, %221 : vector<1x32xf32>
    %223 = vector.extract_strided_slice %216 {offsets = [0, 32], sizes = [1, 32], strides = [1, 1]} : vector<1x128xf32> to vector<1x32xf32>
    %224 = arith.negf %223 : vector<1x32xf32>
    %225 = math.exp %224 : vector<1x32xf32>
    %cst_77 = arith.constant 1.000000e+00 : f32
    %226 = vector.broadcast %cst_77 : f32 to vector<1x32xf32>
    %227 = arith.addf %226, %225 : vector<1x32xf32>
    %228 = arith.divf %226, %227 : vector<1x32xf32>
    %229 = vector.extract_strided_slice %216 {offsets = [0, 64], sizes = [1, 32], strides = [1, 1]} : vector<1x128xf32> to vector<1x32xf32>
    %230 = math.tanh %229 : vector<1x32xf32>
    %231 = vector.extract_strided_slice %216 {offsets = [0, 96], sizes = [1, 32], strides = [1, 1]} : vector<1x128xf32> to vector<1x32xf32>
    %232 = arith.negf %231 : vector<1x32xf32>
    %233 = math.exp %232 : vector<1x32xf32>
    %cst_78 = arith.constant 1.000000e+00 : f32
    %234 = vector.broadcast %cst_78 : f32 to vector<1x32xf32>
    %235 = arith.addf %234, %233 : vector<1x32xf32>
    %236 = arith.divf %234, %235 : vector<1x32xf32>
    %237 = arith.mulf %228, %210 : vector<1x32xf32>
    %238 = arith.mulf %222, %230 : vector<1x32xf32>
    %239 = arith.addf %237, %238 : vector<1x32xf32>
    %240 = math.tanh %239 : vector<1x32xf32>
    %241 = arith.mulf %236, %240 : vector<1x32xf32>
    %c5 = arith.constant 5 : index
    %c0_79 = arith.constant 0 : index
    %242 = vector.load %arg25[%c5, %c0_79] : memref<8x32xf32, #tpu.memory_space<vmem>>, vector<1x32xf32>
    tpu.vector_store %arg25[%c5, %c0_79], %241 {strides = array<i32>} : memref<8x32xf32, #tpu.memory_space<vmem>>, vector<1x32xf32>,
    %243 = vector.extract_strided_slice %65 {offsets = [6, 0], sizes = [1, 128], strides = [1, 1]} : vector<8x128xf32> to vector<1x128xf32>
    %cst_80 = arith.constant dense<0.000000e+00> : vector<1x128xf32>
    %244 = tpu.matmul %241, %66, %cst_80 {dimension_numbers = #tpu.dot_dimension_numbers<[1], [0], [0], [1], [0, 0, 1, 1], [], []>} : vector<1x32xf32>, vector<32x128xf32>, vector<1x128xf32> -> vector<1x128xf32>
    %245 = arith.addf %243, %244 : vector<1x128xf32>
    %246 = vector.extract_strided_slice %245 {offsets = [0, 0], sizes = [1, 32], strides = [1, 1]} : vector<1x128xf32> to vector<1x32xf32>
    %247 = arith.negf %246 : vector<1x32xf32>
    %248 = math.exp %247 : vector<1x32xf32>
    %cst_81 = arith.constant 1.000000e+00 : f32
    %249 = vector.broadcast %cst_81 : f32 to vector<1x32xf32>
    %250 = arith.addf %249, %248 : vector<1x32xf32>
    %251 = arith.divf %249, %250 : vector<1x32xf32>
    %252 = vector.extract_strided_slice %245 {offsets = [0, 32], sizes = [1, 32], strides = [1, 1]} : vector<1x128xf32> to vector<1x32xf32>
    %253 = arith.negf %252 : vector<1x32xf32>
    %254 = math.exp %253 : vector<1x32xf32>
    %cst_82 = arith.constant 1.000000e+00 : f32
    %255 = vector.broadcast %cst_82 : f32 to vector<1x32xf32>
    %256 = arith.addf %255, %254 : vector<1x32xf32>
    %257 = arith.divf %255, %256 : vector<1x32xf32>
    %258 = vector.extract_strided_slice %245 {offsets = [0, 64], sizes = [1, 32], strides = [1, 1]} : vector<1x128xf32> to vector<1x32xf32>
    %259 = math.tanh %258 : vector<1x32xf32>
    %260 = vector.extract_strided_slice %245 {offsets = [0, 96], sizes = [1, 32], strides = [1, 1]} : vector<1x128xf32> to vector<1x32xf32>
    %261 = arith.negf %260 : vector<1x32xf32>
    %262 = math.exp %261 : vector<1x32xf32>
    %cst_83 = arith.constant 1.000000e+00 : f32
    %263 = vector.broadcast %cst_83 : f32 to vector<1x32xf32>
    %264 = arith.addf %263, %262 : vector<1x32xf32>
    %265 = arith.divf %263, %264 : vector<1x32xf32>
    %266 = arith.mulf %257, %239 : vector<1x32xf32>
    %267 = arith.mulf %251, %259 : vector<1x32xf32>
    %268 = arith.addf %266, %267 : vector<1x32xf32>
    %269 = math.tanh %268 : vector<1x32xf32>
    %270 = arith.mulf %265, %269 : vector<1x32xf32>
    %c6 = arith.constant 6 : index
    %c0_84 = arith.constant 0 : index
    %271 = vector.load %arg25[%c6, %c0_84] : memref<8x32xf32, #tpu.memory_space<vmem>>, vector<1x32xf32>
    tpu.vector_store %arg25[%c6, %c0_84], %270 {strides = array<i32>} : memref<8x32xf32, #tpu.memory_space<vmem>>, vector<1x32xf32>,
    %272 = vector.extract_strided_slice %65 {offsets = [7, 0], sizes = [1, 128], strides = [1, 1]} : vector<8x128xf32> to vector<1x128xf32>
    %cst_85 = arith.constant dense<0.000000e+00> : vector<1x128xf32>
    %273 = tpu.matmul %270, %66, %cst_85 {dimension_numbers = #tpu.dot_dimension_numbers<[1], [0], [0], [1], [0, 0, 1, 1], [], []>} : vector<1x32xf32>, vector<32x128xf32>, vector<1x128xf32> -> vector<1x128xf32>
    %274 = arith.addf %272, %273 : vector<1x128xf32>
    %275 = vector.extract_strided_slice %274 {offsets = [0, 0], sizes = [1, 32], strides = [1, 1]} : vector<1x128xf32> to vector<1x32xf32>
    %276 = arith.negf %275 : vector<1x32xf32>
    %277 = math.exp %276 : vector<1x32xf32>
    %cst_86 = arith.constant 1.000000e+00 : f32
    %278 = vector.broadcast %cst_86 : f32 to vector<1x32xf32>
    %279 = arith.addf %278, %277 : vector<1x32xf32>
    %280 = arith.divf %278, %279 : vector<1x32xf32>
    %281 = vector.extract_strided_slice %274 {offsets = [0, 32], sizes = [1, 32], strides = [1, 1]} : vector<1x128xf32> to vector<1x32xf32>
    %282 = arith.negf %281 : vector<1x32xf32>
    %283 = math.exp %282 : vector<1x32xf32>
    %cst_87 = arith.constant 1.000000e+00 : f32
    %284 = vector.broadcast %cst_87 : f32 to vector<1x32xf32>
    %285 = arith.addf %284, %283 : vector<1x32xf32>
    %286 = arith.divf %284, %285 : vector<1x32xf32>
    %287 = vector.extract_strided_slice %274 {offsets = [0, 64], sizes = [1, 32], strides = [1, 1]} : vector<1x128xf32> to vector<1x32xf32>
    %288 = math.tanh %287 : vector<1x32xf32>
    %289 = vector.extract_strided_slice %274 {offsets = [0, 96], sizes = [1, 32], strides = [1, 1]} : vector<1x128xf32> to vector<1x32xf32>
    %290 = arith.negf %289 : vector<1x32xf32>
    %291 = math.exp %290 : vector<1x32xf32>
    %cst_88 = arith.constant 1.000000e+00 : f32
    %292 = vector.broadcast %cst_88 : f32 to vector<1x32xf32>
    %293 = arith.addf %292, %291 : vector<1x32xf32>
    %294 = arith.divf %292, %293 : vector<1x32xf32>
    %295 = arith.mulf %286, %268 : vector<1x32xf32>
    %296 = arith.mulf %280, %288 : vector<1x32xf32>
    %297 = arith.addf %295, %296 : vector<1x32xf32>
    %298 = math.tanh %297 : vector<1x32xf32>
    %299 = arith.mulf %294, %298 : vector<1x32xf32>
    %c7 = arith.constant 7 : index
    %c0_89 = arith.constant 0 : index
    %300 = vector.load %arg25[%c7, %c0_89] : memref<8x32xf32, #tpu.memory_space<vmem>>, vector<1x32xf32>
    tpu.vector_store %arg25[%c7, %c0_89], %299 {strides = array<i32>} : memref<8x32xf32, #tpu.memory_space<vmem>>, vector<1x32xf32>,
    %c0_90 = arith.constant 0 : index
    %c0_91 = arith.constant 0 : index
    %301 = vector.load %arg25[%c0_90, %c0_91] : memref<8x32xf32, #tpu.memory_space<vmem>>, vector<8x32xf32>
    %c0_92 = arith.constant 0 : index
    %c0_93 = arith.constant 0 : index
    %302 = vector.load %arg17[%c0_92, %c0_93] : memref<32x8xf32, #tpu.memory_space<vmem>>, vector<32x8xf32>
    %cst_94 = arith.constant dense<0.000000e+00> : vector<8x8xf32>
    %303 = tpu.matmul %301, %302, %cst_94 {dimension_numbers = #tpu.dot_dimension_numbers<[1], [0], [0], [1], [0, 0, 1, 1], [], []>} : vector<8x32xf32>, vector<32x8xf32>, vector<8x8xf32> -> vector<8x8xf32>
    %c0_95 = arith.constant 0 : index
    %c0_96 = arith.constant 0 : index
    %304 = vector.load %arg18[%c0_95, %c0_96] : memref<1x8xf32, #tpu.memory_space<vmem>>, vector<1x8xf32>
    %305 = vector.broadcast %304 : vector<1x8xf32> to vector<8x8xf32>
    %306 = arith.addf %303, %305 : vector<8x8xf32>
    %307 = arith.negf %306 : vector<8x8xf32>
    %308 = math.exp %307 : vector<8x8xf32>
    %cst_97 = arith.constant 1.000000e+00 : f32
    %309 = vector.broadcast %cst_97 : f32 to vector<8x8xf32>
    %310 = arith.addf %309, %308 : vector<8x8xf32>
    %311 = arith.divf %309, %310 : vector<8x8xf32>
    %cst_98 = arith.constant dense<0.000000e+00> : vector<8xf32>
    %312 = vector.multi_reduction <add>, %311, %cst_98 [1] : vector<8x8xf32> to vector<8xf32>
    %313 = vector.shape_cast %312 : vector<8xf32> to vector<8x1xf32>
    %314 = math.roundeven %313 : vector<8x1xf32>
    %cst_99 = arith.constant 1.000000e+00 : f32
    %315 = vector.broadcast %cst_99 : f32 to vector<8x1xf32>
    %316 = arith.maximumf %314, %315 : vector<8x1xf32>
    %317 = tpu.iota {dimensions = array<i32: 0>} : vector<8x8xi32>
    %318 = tpu.iota {dimensions = array<i32: 1>} : vector<8x8xi32>
    %319 = arith.cmpi sle, %317, %318 : vector<8x8xi32>
    %cst_100 = arith.constant 0.000000e+00 : f32
    %320 = vector.shape_cast %316 : vector<8x1xf32> to vector<8x1xf32>
    %321 = vector.broadcast %320 : vector<8x1xf32> to vector<8x8xf32>
    %322 = vector.broadcast %cst_100 : f32 to vector<8x8xf32>
    %323 = arith.select %319, %321, %322 : vector<8x8xi1>, vector<8x8xf32>
    %cst_101 = arith.constant dense<0.000000e+00> : vector<8xf32>
    %324 = vector.multi_reduction <add>, %323, %cst_101 [0] : vector<8x8xf32> to vector<8xf32>
    %325 = vector.shape_cast %324 : vector<8xf32> to vector<1x8xf32>
    %326 = arith.cmpi slt, %317, %318 : vector<8x8xi32>
    %cst_102 = arith.constant 0.000000e+00 : f32
    %327 = vector.shape_cast %316 : vector<8x1xf32> to vector<8x1xf32>
    %328 = vector.broadcast %327 : vector<8x1xf32> to vector<8x8xf32>
    %329 = vector.broadcast %cst_102 : f32 to vector<8x8xf32>
    %330 = arith.select %326, %328, %329 : vector<8x8xi1>, vector<8x8xf32>
    %cst_103 = arith.constant dense<0.000000e+00> : vector<8xf32>
    %331 = vector.multi_reduction <add>, %330, %cst_103 [0] : vector<8x8xf32> to vector<8xf32>
    %332 = vector.shape_cast %331 : vector<8xf32> to vector<1x8xf32>
    %cst_104 = arith.constant dense<0.000000e+00> : vector<1xf32>
    %333 = vector.multi_reduction <add>, %316, %cst_104 [0] : vector<8x1xf32> to vector<1xf32>
    %334 = vector.shape_cast %333 : vector<1xf32> to vector<1x1xf32>
    %335 = tpu.iota {dimensions = array<i32: 0>} : vector<128x1xi32>
    %c1_i32 = arith.constant 1 : i32
    %336 = vector.broadcast %c1_i32 : i32 to vector<128x1xi32>
    %337 = arith.subi %335, %336 : vector<128x1xi32>
    %c0_i32 = arith.constant 0 : i32
    %338 = vector.broadcast %c0_i32 : i32 to vector<128x1xi32>
    %339 = arith.maxsi %337, %338 : vector<128x1xi32>
    %340 = arith.sitofp %339 : vector<128x1xi32> to vector<128x1xf32>
    %341 = vector.broadcast %340 : vector<128x1xf32> to vector<128x8xf32>
    %342 = vector.broadcast %332 : vector<1x8xf32> to vector<128x8xf32>
    %343 = arith.cmpf oge, %341, %342 : vector<128x8xf32>
    %344 = vector.broadcast %340 : vector<128x1xf32> to vector<128x8xf32>
    %345 = vector.broadcast %325 : vector<1x8xf32> to vector<128x8xf32>
    %346 = arith.cmpf olt, %344, %345 : vector<128x8xf32>
    %347 = arith.andi %343, %346 : vector<128x8xi1>
    %348 = arith.extui %347 : vector<128x8xi1> to vector<128x8xi32>
    %349 = arith.sitofp %348 : vector<128x8xi32> to vector<128x8xf32>
    %350 = tpu.concatenate %60, %10 in 1 : vector<8x64xf32>, vector<8x64xf32> -> vector<8x128xf32>
    %cst_105 = arith.constant dense<0.000000e+00> : vector<128x128xf32>
    %351 = tpu.matmul %349, %350, %cst_105 {dimension_numbers = #tpu.dot_dimension_numbers<[1], [0], [0], [1], [0, 0, 1, 1], [], []>} : vector<128x8xf32>, vector<8x128xf32>, vector<128x128xf32> -> vector<128x128xf32>
    %c0_106 = arith.constant 0 : index
    %c0_107 = arith.constant 0 : index
    %352 = vector.load %arg20[%c0_106, %c0_107] : memref<128x128xf32, #tpu.memory_space<vmem>>, vector<128x128xf32>
    %cst_108 = arith.constant dense<0.000000e+00> : vector<1x128xf32>
    %353 = tpu.matmul %49, %352, %cst_108 {dimension_numbers = #tpu.dot_dimension_numbers<[1], [0], [0], [1], [0, 0, 1, 1], [], []>} : vector<1x128xf32>, vector<128x128xf32>, vector<1x128xf32> -> vector<1x128xf32>
    %c0_109 = arith.constant 0 : index
    %c0_110 = arith.constant 0 : index
    %354 = vector.load %arg21[%c0_109, %c0_110] : memref<128x128xf32, #tpu.memory_space<vmem>>, vector<128x128xf32>
    %cst_111 = arith.constant dense<0.000000e+00> : vector<1x128xf32>
    %355 = tpu.matmul %41, %354, %cst_111 {dimension_numbers = #tpu.dot_dimension_numbers<[1], [0], [0], [1], [0, 0, 1, 1], [], []>} : vector<1x128xf32>, vector<128x128xf32>, vector<1x128xf32> -> vector<1x128xf32>
    %356 = arith.addf %353, %355 : vector<1x128xf32>
    %c0_112 = arith.constant 0 : index
    %c0_113 = arith.constant 0 : index
    %357 = vector.load %arg22[%c0_112, %c0_113] : memref<1x128xf32, #tpu.memory_space<vmem>>, vector<1x128xf32>
    %358 = arith.addf %356, %357 : vector<1x128xf32>
    %c0_114 = arith.constant 0 : index
    %c0_115 = arith.constant 0 : index
    %359 = vector.load %arg19[%c0_114, %c0_115] : memref<128x128xf32, #tpu.memory_space<vmem>>, vector<128x128xf32>
    %cst_116 = arith.constant dense<0.000000e+00> : vector<128x128xf32>
    %360 = tpu.matmul %351, %359, %cst_116 {dimension_numbers = #tpu.dot_dimension_numbers<[1], [0], [0], [1], [0, 0, 1, 1], [], []>} : vector<128x128xf32>, vector<128x128xf32>, vector<128x128xf32> -> vector<128x128xf32>
    %361 = vector.broadcast %358 : vector<1x128xf32> to vector<128x128xf32>
    %362 = arith.addf %360, %361 : vector<128x128xf32>
    %363 = math.tanh %362 : vector<128x128xf32>
    %364 = arith.sitofp %335 : vector<128x1xi32> to vector<128x1xf32>
    %365 = vector.broadcast %334 : vector<1x1xf32> to vector<128x1xf32>
    %366 = arith.cmpf olt, %364, %365 : vector<128x1xf32>
    %cst_117 = arith.constant 0.000000e+00 : f32
    %367 = vector.shape_cast %366 : vector<128x1xi1> to vector<128x1xi1>
    %368 = vector.broadcast %367 : vector<128x1xi1> to vector<128x128xi1>
    %369 = vector.broadcast %cst_117 : f32 to vector<128x128xf32>
    %370 = arith.select %368, %363, %369 : vector<128x128xi1>, vector<128x128xf32>
    %c0_118 = arith.constant 0 : index
    %c0_119 = arith.constant 0 : index
    %371 = vector.load %arg23[%c0_118, %c0_119] : memref<128x128xf32, #tpu.memory_space<vmem>>, vector<128x128xf32>
    tpu.vector_store %arg23[%c0_118, %c0_119], %370 {strides = array<i32>} : memref<128x128xf32, #tpu.memory_space<vmem>>, vector<128x128xf32>,
    %c0_120 = arith.constant 0 : index
    %c0_121 = arith.constant 0 : index
    %372 = vector.load %arg24[%c0_120, %c0_121] : memref<1x1xf32, #tpu.memory_space<vmem>>, vector<1x1xf32>
    tpu.vector_store %arg24[%c0_120, %c0_121], %334 {strides = array<i32>} : memref<1x1xf32, #tpu.memory_space<vmem>>, vector<1x1xf32>,
    return
  }
}

</mosaic_0001>

<bundles_post_ra>
// kernel: styletts2_forward.1
= control target key start
LH: loop header
LB: loop body
LE: loop exit
PB: predicated region body
PF: predicated region fallthrough
CT: control target
= control target key end

     0   :  { %s5301_s0 = inlined_call_operand.hbm [shape: f32[3], index: 0, kind: input, shape index: {}]   ;;  %s5302_s1 = inlined_call_operand.vmem [shape: f32[8,32], index: 1, kind: input, shape index: {}]   ;;  %s5303_s2 = inlined_call_operand.vmem [shape: f32[8,32], index: 2, kind: input, shape index: {}]   ;;  %s5304_s3 = inlined_call_operand.vmem [shape: f32[1,512], index: 3, kind: input, shape index: {}]   ;;  %s5305_s4 = inlined_call_operand.hbm [shape: f32[32,64], index: 4, kind: input, shape index: {}]   ;;  %s5306_s5 = inlined_call_operand.hbm [shape: f32[1,64], index: 5, kind: input, shape index: {}]   ;;  %s5307_s6 = inlined_call_operand.hbm [shape: f32[32,48], index: 6, kind: input, shape index: {}]   ;;  %s5308_s7 = inlined_call_operand.hbm [shape: f32[1,48], index: 7, kind: input, shape index: {}]   ;;  %s5309_s8 = inlined_call_operand.hbm [shape: f32[512,256], index: 8, kind: input, shape index: {}]   ;;  %s5310_s9 = inlined_call_operand.vmem [shape: f32[48,256], index: 9, kind: input, shape index: {}]   ;;  %s5311_s10 = inlined_call_operand.hbm [shape: f32[1,256], index: 10, kind: input, shape index: {}]   ;;  %s5312_s11 = inlined_call_operand.hbm [shape: f32[48,64], index: 11, kind: input, shape index: {}]   ;;  %s5313_s12 = inlined_call_operand.vmem [shape: f32[128,64], index: 12, kind: input, shape index: {}]   ;;  %s5314_s13 = inlined_call_operand.hbm [shape: f32[1,64], index: 13, kind: input, shape index: {}]   ;;  %s5315_s14 = inlined_call_operand.vmem [shape: f32[64,128], index: 14, kind: input, shape index: {}]   ;;  %s5316_s15 = inlined_call_operand.hbm [shape: f32[32,128], index: 15, kind: input, shape index: {}]   ;;  %s5317_s16 = inlined_call_operand.hbm [shape: f32[1,128], index: 16, kind: input, shape index: {}]   ;;  %s5318_s17 = inlined_call_operand.vmem [shape: f32[32,8], index: 17, kind: input, shape index: {}]   ;;  %s5319_s18 = inlined_call_operand.hbm [shape: f32[1,8], index: 18, kind: input, shape index: {}]   ;;  %s5320_s19 = inlined_call_operand.vmem [shape: f32[128,128], index: 19, kind: input, shape index: {}]   ;;  %s5321_s20 = inlined_call_operand.vmem [shape: f32[128,128], index: 20, kind: input, shape index: {}]   ;;  %s5322_s21 = inlined_call_operand.vmem [shape: f32[128,128], index: 21, kind: input, shape index: {}]   ;;  %s5323_s22 = inlined_call_operand.hbm [shape: f32[1,128], index: 22, kind: input, shape index: {}]   ;;  %s5324_s23 = inlined_call_operand.hbm [shape: f32[128,128], index: 23, kind: output, shape index: {0}]   ;;  %s5325_s24 = inlined_call_operand.hbm [shape: f32[1,1], index: 24, kind: output, shape index: {1}]  }
   0x1   :  { %5329 = sst [smem:[#allocation38_spill]] %s5301_s0 }
   0x2   :  { %5330 = sst [smem:[#allocation39_spill]] %s5302_s1 }
   0x3   :  { %5331 = sst [smem:[#allocation40_spill]] %s5303_s2 }
   0x4   :  { %5332 = sst [smem:[#allocation41_spill]] %s5304_s3 }
   0x5   :  { %5333 = sst [smem:[#allocation42_spill]] %s5305_s4 }
   0x6   :  { %5334 = sst [smem:[#allocation43_spill]] %s5306_s5 }
   0x7   :  { %5335 = sst [smem:[#allocation44_spill]] %s5307_s6 }
   0x8   :  { %5336 = sst [smem:[#allocation45_spill]] %s5308_s7 }
   0x9   :  { %5337 = sst [smem:[#allocation46_spill]] %s5309_s8 }
   0xa   :  { %30 = vsyncpa [#allocation6], 0 }
   0xb   :  { %31 = vsyncpa [#allocation4], 0 }
   0xc   :  { %32 = vsyncpa [#allocation9], 0 }
   0xd   :  { %33 = vsyncpa [#allocation12], 0 }
   0xe   :  { %34 = vsyncpa [#allocation15], 0 }
   0xf   :  { %35 = vsyncpa [#allocation18], 0 }
  0x10   :  { %36 = vsyncpa [#allocation21], 0 }
  0x11   :  { %37 = vsyncpa [#allocation24], 0 }
  0x12   :  { %38 = vsyncpa [#allocation5], 0 }
  0x13   :  { %39 = vsyncpa [#allocation27], 0  ;;  %s4002_s5 = smov [#allocation8]   ;;  %s4003_s27 = smov [#allocation11]  }
  0x14   :  { %s72_s26 = sshll.u32 %s4002_s5, 4  ;;  %s94_s28 = sshll.u32 %s4003_s27, 4  ;;  %s73_s26 = int_to_ptr.vmem [resolvable:$true] %s72_s26  ;;  %s95_s28 = int_to_ptr.vmem [resolvable:$true] %s94_s28 }
  0x15   :  { %s3702_s6 = scalar_lea.vmem %s73_s26, 16  ;;  %s3706_s2 = scalar_lea.vmem %s73_s26, 32 }
  0x16   :  { %p3703_p0 = scmp.ne.s32.totalorder %s73_s26, %s3702_s6  ;;  %p3707_p1 = scmp.lt.s32.totalorder %s73_s26, %s73_s26 }
  0x17   :  { %p3708_p2 = scmp.lt.s32.totalorder %s3706_s2, %s3702_s6 }
  0x19   :  { %p3709_p3 = por %p3708_p2, %p3707_p1 }
  0x1b   :  { %p3710_p4 = pnand %p3709_p3, %p3703_p0 }
  0x1d   :  { %3713 = shalt.err (!%p3710_p4)
}
  0x1e   :  { %s5338_s7 = sld [smem:[#allocation43_spill]]  ;;  %s3722_s30 = scalar_lea.vmem %s95_s28, 16 }
  0x1f   :  { %p3723_p5 = scmp.ne.s32.totalorder %s95_s28, %s3722_s30  ;;  %s3726_s3 = scalar_lea.vmem %s95_s28, 32 }
  0x20   :  { %p3727_p6 = scmp.lt.s32.totalorder %s95_s28, %s95_s28  ;;  %p3728_p7 = scmp.lt.s32.totalorder %s3726_s3, %s3722_s30 }
  0x22   :  { %p3729_p8 = por %p3728_p7, %p3727_p6 }
  0x24   :  { %75 = dma.hbm_to_vmem [thread:$0]  %s5338_s7, 16, %s73_s26, [#allocation9]  }
  0x25   :  { %p3730_p9 = pnand %p3729_p8, %p3723_p5 }
  0x27   :  { %3733 = shalt.err (!%p3730_p9)
}
  0x28   :  { %s5339_s4 = sld [smem:[#allocation45_spill]]  ;;  %s4004_s1 = smov [#allocation14]  }
  0x29   :  { %s118_s5 = sshll.u32 %s4004_s1, 4  ;;  %s4005_s27 = smov [#allocation17]   ;;  %s119_s5 = int_to_ptr.vmem [resolvable:$true] %s118_s5 }
  0x2a   :  { %s142_s6 = sshll.u32 %s4005_s27, 4  ;;  %s3742_s2 = scalar_lea.vmem %s119_s5, 32  ;;  %s143_s6 = int_to_ptr.vmem [resolvable:$true] %s142_s6 }
  0x2b   :  { %p3743_p10 = scmp.ne.s32.totalorder %s119_s5, %s3742_s2  ;;  %p3747_p11 = scmp.lt.s32.totalorder %s119_s5, %s119_s5 }
  0x2c   :  { %p3748_p12 = scmp.lt.s32.totalorder %s3742_s2, %s3742_s2 }
  0x2e   :  { %97 = dma.hbm_to_vmem [thread:$0]  %s5339_s4, 16, %s95_s28, [#allocation12]  }
  0x2f   :  { %p3749_p13 = por %p3748_p12, %p3747_p11 }
  0x31   :  { %p3750_p0 = pnand %p3749_p13, %p3743_p10 }
  0x33   :  { %3753 = shalt.err (!%p3750_p0)
}
  0x34   :  { %121 = dma.hbm_to_vmem [thread:$0]  %s5311_s10, 32, %s119_s5, [#allocation15]  }
  0x35   :  { %s3762_s0 = scalar_lea.vmem %s143_s6, 16  ;;  %s3766_s28 = scalar_lea.vmem %s143_s6, 32 }
  0x36   :  { %p3763_p1 = scmp.ne.s32.totalorder %s143_s6, %s3762_s0  ;;  %p3767_p2 = scmp.lt.s32.totalorder %s143_s6, %s143_s6 }
  0x37   :  { %p3768_p3 = scmp.lt.s32.totalorder %s3766_s28, %s3762_s0 }
  0x39   :  { %p3769_p4 = por %p3768_p3, %p3767_p2 }
  0x3b   :  { %p3770_p5 = pnand %p3769_p4, %p3763_p1 }
  0x3d   :  { %3773 = shalt.err (!%p3770_p5)
}
  0x3e   :  { %145 = dma.hbm_to_vmem [thread:$0]  %s5314_s13, 16, %s143_s6, [#allocation18]  }
  0x3f   :  { %s4006_s3 = smov [#allocation20]   ;;  %s4007_s8 = smov [#allocation7]  }
  0x40   :  { %s166_s25 = sshll.u32 %s4006_s3, 4  ;;  %s59_s4 = sshll.u32 %s4007_s8, 4  ;;  %s167_s25 = int_to_ptr.vmem [resolvable:$true] %s166_s25  ;;  %s60_s4 = int_to_ptr.vmem [resolvable:$true] %s59_s4 }
  0x41   :  { %s3782_s1 = scalar_lea.vmem %s167_s25, 16  ;;  %s3786_s10 = scalar_lea.vmem %s167_s25, 32 }
  0x42   :  { %p3783_p6 = scmp.ne.s32.totalorder %s167_s25, %s3782_s1  ;;  %p3787_p7 = scmp.lt.s32.totalorder %s167_s25, %s167_s25 }
  0x43   :  { %p3788_p8 = scmp.lt.s32.totalorder %s3786_s10, %s3782_s1 }
  0x45   :  { %p3789_p9 = por %p3788_p8, %p3787_p7 }
  0x47   :  { %p3790_p10 = pnand %p3789_p9, %p3783_p6 }
  0x49   :  { %3793 = shalt.err (!%p3790_p10)
}
  0x4a   :  { %169 = dma.hbm_to_vmem [thread:$0]  %s5317_s16, 16, %s167_s25, [#allocation21]  }
  0x4b   :  { %s4008_s2 = smov [#allocation3]   ;;  %s5340_s6 = sld [smem:[#allocation38_spill]] }
  0x4c   :  { %s3810_s29 = scalar_lea.vmem %s60_s4, 512  ;;  %p3815_p12 = scmp.lt.s32.totalorder %s60_s4, %s60_s4 }
  0x4d   :  { %p3811_p11 = scmp.ne.s32.totalorder %s60_s4, %s3810_s29  ;;  %p3816_p13 = scmp.lt.s32.totalorder %s3810_s29, %s3810_s29 }
  0x4f   :  { %p3817_p0 = por %p3816_p13, %p3815_p12 }
  0x51   :  { %47 = dma.hbm_to_smem %s5340_s6, 16, %s4008_s2, [#allocation6]  }
  0x52   :  { %p3818_p1 = pnand %p3817_p0, %p3811_p11 }
  0x54   :  { %3821 = shalt.err (!%p3818_p1)
}
  0x55   :  { %s4009_s0 = smov 128   ;;  %s4010_s28 = smov 8  }
  0x56   :  { %s5341_s30 = sld [smem:[#allocation42_spill]]  ;;  %s4011_s3 = smov [#allocation10]  }
  0x57   :  { %s81_s25 = sshll.u32 %s4011_s3, 4  ;;  %s4012_s8 = smov [#allocation13]   ;;  %s82_s25 = int_to_ptr.vmem [resolvable:$true] %s81_s25 }
  0x58   :  { %s103_s1 = sshll.u32 %s4012_s8, 4  ;;  %s3830_s10 = scalar_lea.vmem %s82_s25, 512  ;;  %s104_s1 = int_to_ptr.vmem [resolvable:$true] %s103_s1 }
  0x59   :  { %p3831_p2 = scmp.ne.s32.totalorder %s82_s25, %s3830_s10  ;;  %p3835_p3 = scmp.lt.s32.totalorder %s82_s25, %s82_s25 }
  0x5a   :  { %p3836_p4 = scmp.lt.s32.totalorder %s3830_s10, %s3830_s10 }
  0x5c   :  { %65 = dma.hbm_to_vmem [thread:$0]  %s5341_s30, 512, %s60_s4, [#allocation4], %s4009_s0, %s4009_s0, %s4010_s28  }
  0x5d   :  { %p3837_p5 = por %p3836_p4, %p3835_p3 }
  0x5f   :  { %p3838_p6 = pnand %p3837_p5, %p3831_p2 }
  0x61   :  { %3841 = shalt.err (!%p3838_p6)
}
  0x62   :  { %s5342_s2 = sld [smem:[#allocation44_spill]]  ;;  %s3850_s4 = scalar_lea.vmem %s104_s1, 16384 }
  0x63   :  { %p3851_p7 = scmp.ne.s32.totalorder %s104_s1, %s3850_s4  ;;  %p3855_p8 = scmp.lt.s32.totalorder %s104_s1, %s104_s1 }
  0x64   :  { %p3856_p9 = scmp.lt.s32.totalorder %s3850_s4, %s3850_s4 }
  0x66   :  { %p3857_p10 = por %p3856_p9, %p3855_p8 }
  0x68   :  { %87 = dma.hbm_to_vmem [thread:$0]  %s5342_s2, 512, %s82_s25, [#allocation9], %s4009_s0, %s4009_s0, %s4010_s28  }
  0x69   :  { %p3858_p11 = pnand %p3857_p10, %p3851_p7 }
  0x6b   :  { %3861 = shalt.err (!%p3858_p11)
}
  0x6c   :  { %s4013_s26 = smov 256   ;;  %s4014_s13 = smov 16  }
  0x6d   :  { %s5343_s7 = sld [smem:[#allocation46_spill]]  ;;  %s4015_s16 = smov [#allocation16]  }
  0x6e   :  { %s127_s30 = sshll.u32 %s4015_s16, 4  ;;  %s4016_s3 = smov [#allocation19]   ;;  %s128_s30 = int_to_ptr.vmem [resolvable:$true] %s127_s30 }
  0x6f   :  { %s153_s8 = sshll.u32 %s4016_s3, 4  ;;  %s3870_s25 = scalar_lea.vmem %s128_s30, 768  ;;  %s154_s8 = int_to_ptr.vmem [resolvable:$true] %s153_s8 }
  0x70   :  { %p3871_p12 = scmp.ne.s32.totalorder %s128_s30, %s3870_s25  ;;  %p3875_p13 = scmp.lt.s32.totalorder %s128_s30, %s128_s30 }
  0x71   :  { %p3876_p0 = scmp.lt.s32.totalorder %s3870_s25, %s3870_s25 }
  0x73   :  { %109 = dma.hbm_to_vmem [thread:$0]  %s5343_s7, 16384, %s104_s1, [#allocation12], %s4013_s26, %s4013_s26, %s4014_s13  }
  0x74   :  { %p3877_p1 = por %p3876_p0, %p3875_p13 }
  0x76   :  { %p3878_p2 = pnand %p3877_p1, %p3871_p12 }
  0x78   :  { %3881 = shalt.err (!%p3878_p2)
}
  0x79   :  { %133 = dma.hbm_to_vmem [thread:$0]  %s5312_s11, 768, %s128_s30, [#allocation15], %s4009_s0, %s4009_s0, %s4010_s28  }
  0x7a   :  { %s3890_s1 = scalar_lea.vmem %s154_s8, 512  ;;  %p3895_p4 = scmp.lt.s32.totalorder %s154_s8, %s154_s8 }
  0x7b   :  { %p3891_p3 = scmp.ne.s32.totalorder %s154_s8, %s3890_s1  ;;  %p3896_p5 = scmp.lt.s32.totalorder %s3890_s1, %s3890_s1 }
  0x7d   :  { %p3897_p6 = por %p3896_p5, %p3895_p4 }
  0x7f   :  { %p3898_p7 = pnand %p3897_p6, %p3891_p3 }
  0x81   :  { %3901 = shalt.err (!%p3898_p7)
}
  0x82   :  { %159 = dma.hbm_to_vmem [thread:$0]  %s5316_s15, 512, %s154_s8, [#allocation18], %s4009_s0, %s4009_s0, %s4010_s28  }
  0x83   :  { %s4017_s4 = smov [#allocation22]   ;;  %s4018_s13 = smov [#allocation23]  }
  0x84   :  { %s178_s26 = sshll.u32 %s4017_s4, 4  ;;  %s194_s11 = sshll.u32 %s4018_s13, 4  ;;  %s179_s26 = int_to_ptr.vmem [resolvable:$true] %s178_s26  ;;  %s195_s11 = int_to_ptr.vmem [resolvable:$true] %s194_s11 }
  0x85   :  { %s3910_s6 = scalar_lea.vmem %s179_s26, 16  ;;  %s3914_s29 = scalar_lea.vmem %s179_s26, 32 }
  0x86   :  { %p3911_p8 = scmp.ne.s32.totalorder %s179_s26, %s3910_s6  ;;  %p3915_p9 = scmp.lt.s32.totalorder %s179_s26, %s179_s26 }
  0x87   :  { %p3916_p10 = scmp.lt.s32.totalorder %s3914_s29, %s3910_s6 }
  0x89   :  { %p3917_p11 = por %p3916_p10, %p3915_p9 }
  0x8b   :  { %p3918_p12 = pnand %p3917_p11, %p3911_p8 }
  0x8d   :  { %3921 = shalt.err (!%p3918_p12)
}
  0x8e   :  { %181 = dma.hbm_to_vmem [thread:$0]  %s5319_s18, 16, %s179_s26, [#allocation21]  }
  0x8f   :  { %s3930_s30 = scalar_lea.vmem %s195_s11, 16  ;;  %s3934_s15 = scalar_lea.vmem %s195_s11, 32 }
  0x90   :  { %p3931_p13 = scmp.ne.s32.totalorder %s195_s11, %s3930_s30  ;;  %p3935_p0 = scmp.lt.s32.totalorder %s195_s11, %s195_s11 }
  0x91   :  { %p3936_p1 = scmp.lt.s32.totalorder %s3934_s15, %s3930_s30 }
  0x93   :  { %p3937_p2 = por %p3936_p1, %p3935_p0 }
  0x95   :  { %p3938_p3 = pnand %p3937_p2, %p3931_p13 }
  0x97   :  { %3941 = shalt.err (!%p3938_p3)
}
  0x98   :  { %197 = dma.hbm_to_vmem [thread:$0]  %s5323_s22, 16, %s195_s11, [#allocation24]  }
  0x99   :  { %3982 = dma.done.wait [#allocation6], 16  }
  0x9a   :  { %3983 = vsyncadd [#allocation6], 4294967280 }
  0x9b   :  { %3984 = dma.done.wait [#allocation4], 512  }
  0x9c   :  { %3985 = vsyncadd [#allocation4], 4294966784 }
  0x9d   :  { %3986 = dma.done.wait [#allocation9], 528  }
  0x9e   :  { %3987 = vsyncadd [#allocation9], 4294966768 }
  0x9f   :  { %3988 = dma.done.wait [#allocation12], 16400  }
  0xa0   :  { %3989 = vsyncadd [#allocation12], 4294950896 }
  0xa1   :  { %3990 = dma.done.wait [#allocation15], 800  }
  0xa2   :  { %3991 = vsyncadd [#allocation15], 4294966496 }
  0xa3   :  { %3992 = dma.done.wait [#allocation18], 528  }
  0xa4   :  { %3993 = vsyncadd [#allocation18], 4294966768 }
  0xa5   :  { %3994 = dma.done.wait [#allocation21], 32  }
  0xa6   :  { %3995 = vsyncadd [#allocation21], 4294967264 }
  0xa7   :  { %3996 = dma.done.wait [#allocation24], 16  }
  0xa8   :  { %3997 = vsyncadd [#allocation24], 4294967280 }
  0xa9   :  { %237 = sfence }
  0xaa   :  { %v332_v0 = vld [vmem:[#allocation10 + $0x18] sm:$0xff]  ;;  %v4019_v1 = vmov 0.0   ;;  %v331_v2 = vld [vmem:[#allocation10 + $0x10] sm:$0xff]  ;;  %vm5327_vm0 = vmmov 0   ;;  %v330_v3 = vld [vmem:[#allocation10 + $0x8] sm:$0xff]  ;;  %vm253_vm1 = vcmask 261120   ;;  %v643_v58 = vlaneseq }
  0xab   :  { %3226 = vmatprep.subr.mxu1 %v4019_v1  ;;  %3234 = vmatprep.mubr.msk.f32.mxu1 %vm5327_vm0, %v4019_v1  ;;  %v329_v4 = vld [vmem:[#allocation10] sm:$0xff]  ;;  %s5344_s25 = sld [smem:[#allocation40_spill]]  ;;  %v458_v7 = vld [vmem:[#allocation13 + $0xf0] sm:$0xff]  ;;  %v457_v8 = vld [vmem:[#allocation13 + $0xe8] sm:$0xff]  ;;  %vm415_vm2 = vcmask 392192   ;;  %vm1029_vm3 = vcmask 523264  }
  0xac   :  { %3227 = vmatpush3.msra.mxu1 %v332_v0  ;;  %3215 = vmatprep.subr.mxu0 %v4019_v1  ;;  %v459_v6 = vld [vmem:[#allocation13 + $0xf8] sm:$0xff]  ;;  %v456_v9 = vld [vmem:[#allocation13 + $0xe0] sm:$0xff]  ;;  %v454_v11 = vld [vmem:[#allocation13 + $0xd0] sm:$0xff]  ;;  %s5345_s1 = sld [smem:[#allocation39_spill]]  ;;  %vm1209_vm4 = vcmask 253952   ;;  %vm1318_vm5 = vcmask 254977  }
  0xad   :  { %3228 = vmatprep.subr.mxu1 %v4019_v1  ;;  %3223 = vmatprep.mubr.msk.f32.mxu0 %vm5327_vm0, %v4019_v1  ;;  %v455_v10 = vld [vmem:[#allocation13 + $0xd8] sm:$0xff]  ;;  %v453_v12 = vld [vmem:[#allocation13 + $0xc8] sm:$0xff]  ;;  %v452_v13 = vld [vmem:[#allocation13 + $0xc0] sm:$0xff]  ;;  %s5346_s4 = sld [smem:[#allocation41_spill]]  ;;  %vm1542_vm6 = vcmask 257027   ;;  %vm1766_vm7 = vcmask 259077  }
  0xae   :  { %3229 = vmatpush3.msra.mxu1 %v331_v2  ;;  %v451_v14 = vld [vmem:[#allocation13 + $0xb8] sm:$0xff]  ;;  %v450_v15 = vld [vmem:[#allocation13 + $0xb0] sm:$0xff]  ;;  %v449_v16 = vld [vmem:[#allocation13 + $0xa8] sm:$0xff]  ;;  %vm1430_vm8 = vcmask 256002   ;;  %vm1654_vm9 = vcmask 258052   ;;  %vm1878_vm10 = vcmask 260102  }
  0xaf   :  { %3230 = vmatprep.subr.mxu1 %v4019_v1  ;;  %v448_v17 = vld [vmem:[#allocation13 + $0xa0] sm:$0xff]  ;;  %v447_v18 = vld [vmem:[#allocation13 + $0x98] sm:$0xff]  ;;  %v446_v19 = vld [vmem:[#allocation13 + $0x90] sm:$0xff]  ;;  %vm1990_vm11 = vcmask 261127   ;;  %vm5328_vm12 = vcmask 64512  }
  0xb0   :  { %3231 = vmatpush3.msra.mxu1 %v330_v3  ;;  %v445_v20 = vld [vmem:[#allocation13 + $0x88] sm:$0xff]  ;;  %v444_v21 = vld [vmem:[#allocation13 + $0x80] sm:$0xff]  ;;  %v443_v22 = vld [vmem:[#allocation13 + $0x78] sm:$0xff] }
  0xb1   :  { %v328_v5 = vld [vmem:[%s5344_s25] sm:$0xff]  ;;  %3232 = vmatprep.subr.mxu1 %v4019_v1  ;;  %v441_v24 = vld [vmem:[#allocation13 + $0x68] sm:$0xff]  ;;  %v440_v25 = vld [vmem:[#allocation13 + $0x60] sm:$0xff] }
  0xb2   :  { %3233 = vmatpush3.msra.mxu1 %v329_v4  ;;  %v442_v23 = vld [vmem:[#allocation13 + $0x70] sm:$0xff]  ;;  %v439_v26 = vld [vmem:[#allocation13 + $0x58] sm:$0xff]  ;;  %v437_v28 = vld [vmem:[#allocation13 + $0x48] sm:$0xff]  ;;  %v4237_v4 = vshrl.u32 %v643_v58, 7 }
  0xb3   :  { %3235 = vmatmul.mubr.msk.f32.vlgmr.msra.gmra.mxu1 %vm253_vm1, %v328_v5  ;;  %663 = vmatprep.subr.mxu1 %v459_v6  ;;  %v438_v27 = vld [vmem:[#allocation13 + $0x50] sm:$0xff]  ;;  %v436_v29 = vld [vmem:[#allocation13 + $0x40] sm:$0xff]  ;;  %v435_v30 = vld [vmem:[#allocation13 + $0x38] sm:$0xff] }
  0xb4   :  { %664 = vmatpush1.msra.mxu1 %v458_v7  ;;  %v434_v31 = vld [vmem:[#allocation13 + $0x30] sm:$0xff]  ;;  %v433_v32 = vld [vmem:[#allocation13 + $0x28] sm:$0xff]  ;;  %v432_v33 = vld [vmem:[#allocation13 + $0x20] sm:$0xff] }
  0xb5   :  { %665 = vmatprep.subr.mxu1 %v457_v8  ;;  %v431_v34 = vld [vmem:[#allocation13 + $0x18] sm:$0xff]  ;;  %v430_v35 = vld [vmem:[#allocation13 + $0x10] sm:$0xff]  ;;  %v429_v36 = vld [vmem:[#allocation13 + $0x8] sm:$0xff] }
  0xb6   :  { %666 = vmatpush1.msra.mxu1 %v456_v9  ;;  %v428_v37 = vld [vmem:[#allocation13] sm:$0xff]  ;;  %v491_v38 = vld [vmem:[#allocation13 + $0x1f8] sm:$0xff]  ;;  %v490_v39 = vld [vmem:[#allocation13 + $0x1f0] sm:$0xff] }
  0xb7   :  { %667 = vmatprep.subr.mxu1 %v455_v10  ;;  %v489_v40 = vld [vmem:[#allocation13 + $0x1e8] sm:$0xff]  ;;  %v488_v41 = vld [vmem:[#allocation13 + $0x1e0] sm:$0xff]  ;;  %v487_v42 = vld [vmem:[#allocation13 + $0x1d8] sm:$0xff] }
  0xb8   :  { %668 = vmatpush1.msra.mxu1 %v454_v11  ;;  %v486_v43 = vld [vmem:[#allocation13 + $0x1d0] sm:$0xff]  ;;  %v485_v44 = vld [vmem:[#allocation13 + $0x1c8] sm:$0xff]  ;;  %v484_v45 = vld [vmem:[#allocation13 + $0x1c0] sm:$0xff] }
  0xb9   :  { %669 = vmatprep.subr.mxu1 %v453_v12  ;;  %v245_v46 = vld [vmem:[#allocation7 + $0x18] sm:$0xff]  ;;  %v244_v48 = vld [vmem:[#allocation7 + $0x10] sm:$0xff]  ;;  %v243_v50 = vld [vmem:[#allocation7 + $0x8] sm:$0xff] }
  0xba   :  { %670 = vmatpush1.msra.mxu1 %v452_v13  ;;  %v483_v47 = vld [vmem:[#allocation13 + $0x1b8] sm:$0xff]  ;;  %3216 = vmatpush3.msra.mxu0 %v245_v46  ;;  %v482_v49 = vld [vmem:[#allocation13 + $0x1b0] sm:$0xff]  ;;  %v481_v51 = vld [vmem:[#allocation13 + $0x1a8] sm:$0xff]  ;;  %v649_v13 = vsub.s32 1, %v4237_v4 }
  0xbb   :  { %671 = vmatprep.subr.mxu1 %v451_v14  ;;  %3217 = vmatprep.subr.mxu0 %v4019_v1  ;;  %v480_v52 = vld [vmem:[#allocation13 + $0x1a0] sm:$0xff]  ;;  %v479_v54 = vld [vmem:[#allocation13 + $0x198] sm:$0xff]  ;;  %v478_v56 = vld [vmem:[#allocation13 + $0x190] sm:$0xff] }
  0xbc   :  { %672 = vmatpush1.msra.mxu1 %v450_v15  ;;  %3218 = vmatpush3.msra.mxu0 %v244_v48  ;;  %v242_v53 = vld [vmem:[#allocation7] sm:$0xff]  ;;  %v241_v55 = vld [vmem:[%s5345_s1] sm:$0xff]  ;;  %v567_v57 = vld [vmem:[%s5310_s9 + $0x58] sm:$0xff]  ;;  %s2965_s1 = sld [smem:[#allocation3 + $0x1]] }
  0xbd   :  { %673 = vmatprep.subr.mxu1 %v449_v16  ;;  %3219 = vmatprep.subr.mxu0 %v4019_v1  ;;  %v477_v59 = vld [vmem:[#allocation13 + $0x188] sm:$0xff]  ;;  %v476_v61 = vld [vmem:[#allocation13 + $0x180] sm:$0xff]  ;;  %v475_v63 = vld [vmem:[#allocation13 + $0x178] sm:$0xff] }
  0xbe   :  { %674 = vmatpush1.msra.mxu1 %v448_v17  ;;  %3220 = vmatpush3.msra.mxu0 %v243_v50  ;;  %v566_v60 = vld [vmem:[%s5310_s9 + $0x50] sm:$0xff]  ;;  %v565_v62 = vld [vmem:[%s5310_s9 + $0x48] sm:$0xff]  ;;  %v564_v0 = vld [vmem:[%s5310_s9 + $0x40] sm:$0xff] }
  0xbf   :  { %675 = vmatprep.subr.mxu1 %v447_v18  ;;  %3221 = vmatprep.subr.mxu0 %v4019_v1  ;;  %v474_v2 = vld [vmem:[#allocation13 + $0x170] sm:$0xff]  ;;  %v473_v5 = vld [vmem:[#allocation13 + $0x168] sm:$0xff]  ;;  %v472_v7 = vld [vmem:[#allocation13 + $0x160] sm:$0xff] }
  0xc0   :  { %676 = vmatpush1.msra.mxu1 %v446_v19  ;;  %3222 = vmatpush3.msra.mxu0 %v242_v53  ;;  %v563_v3 = vld [vmem:[%s5310_s9 + $0x38] sm:$0xff]  ;;  %v562_v6 = vld [vmem:[%s5310_s9 + $0x30] sm:$0xff]  ;;  %v561_v8 = vld [vmem:[%s5310_s9 + $0x28] sm:$0xff] }
  0xc1   :  { %677 = vmatprep.subr.mxu1 %v445_v20  ;;  %3224 = vmatmul.mubr.msk.f32.vlgmr.msra.gmra.mxu0 %vm253_vm1, %v241_v55  ;;  %v471_v9 = vld [vmem:[#allocation13 + $0x158] sm:$0xff]  ;;  %v470_v11 = vld [vmem:[#allocation13 + $0x150] sm:$0xff]  ;;  %v469_v14 = vld [vmem:[#allocation13 + $0x148] sm:$0xff] }
  0xc2   :  { %678 = vmatpush1.msra.mxu1 %v444_v21  ;;  %591 = vmatprep.subr.mxu0 %v567_v57  ;;  %v560_v10 = vld [vmem:[%s5310_s9 + $0x20] sm:$0xff]  ;;  %v559_v12 = vld [vmem:[%s5310_s9 + $0x18] sm:$0xff]  ;;  %v558_v15 = vld [vmem:[%s5310_s9 + $0x10] sm:$0xff]  ;;  %s829_s13 = ssub.f32 1.0, %s2965_s1 }
  0xc3   :  { %679 = vmatprep.subr.mxu1 %v443_v22  ;;  %592 = vmatpush1.msra.mxu0 %v566_v60  ;;  %v4258_v16 = vld [vmem:[%s5346_s4] sm:$0xf]  ;;  %v468_v17 = vld [vmem:[#allocation13 + $0x140] sm:$0xff]  ;;  %v467_v19 = vld [vmem:[#allocation13 + $0x138] sm:$0xff] }
  0xc4   :  { %680 = vmatpush1.msra.mxu1 %v442_v23  ;;  %593 = vmatprep.subr.mxu0 %v565_v62  ;;  %v557_v18 = vld [vmem:[%s5310_s9 + $0x8] sm:$0xff]  ;;  %v556_v20 = vld [vmem:[%s5310_s9] sm:$0xff]  ;;  %v650_v22 = vrot.slane %v4258_v16, %v649_v13  ;;  %v465_v23 = vld [vmem:[#allocation13 + $0x128] sm:$0xff]  ;;  %s2966_s9 = sld [smem:[#allocation3 + $0x2]] }
  0xc5   :  { %681 = vmatprep.subr.mxu1 %v441_v24  ;;  %594 = vmatpush1.msra.mxu0 %v564_v0  ;;  %v466_v21 = vld [vmem:[#allocation13 + $0x130] sm:$0xff]  ;;  %v464_v24 = vld [vmem:[#allocation13 + $0x120] sm:$0xff]  ;;  %v521_v50 = vld [vmem:[#allocation13 + $0x2e8] sm:$0xff] }
  0xc6   :  { %682 = vmatpush1.msra.mxu1 %v440_v25  ;;  %595 = vmatprep.subr.mxu0 %v563_v3  ;;  %v523_v25 = vld [vmem:[#allocation13 + $0x2f8] sm:$0xff]  ;;  %v518_v53 = vld [vmem:[#allocation13 + $0x2d0] sm:$0xff]  ;;  %v516_v55 = vld [vmem:[#allocation13 + $0x2c0] sm:$0xff] }
  0xc7   :  { %683 = vmatprep.subr.mxu1 %v439_v26  ;;  %596 = vmatpush1.msra.mxu0 %v562_v6  ;;  %v463_v26 = vld [vmem:[#allocation13 + $0x118] sm:$0xff]  ;;  %v514_v57 = vld [vmem:[#allocation13 + $0x2b0] sm:$0xff]  ;;  %v512_v60 = vld [vmem:[#allocation13 + $0x2a0] sm:$0xff] }
  0xc8   :  { %684 = vmatpush1.msra.mxu1 %v438_v27  ;;  %597 = vmatprep.subr.mxu0 %v561_v8  ;;  %v462_v27 = vld [vmem:[#allocation13 + $0x110] sm:$0xff]  ;;  %v508_v0 = vld [vmem:[#allocation13 + $0x280] sm:$0xff] }
  0xc9   :  { %685 = vmatprep.subr.mxu1 %v437_v28  ;;  %598 = vmatpush1.msra.mxu0 %v560_v10  ;;  %v461_v28 = vld [vmem:[#allocation13 + $0x108] sm:$0xff]  ;;  %v510_v62 = vld [vmem:[#allocation13 + $0x290] sm:$0xff]  ;;  %v504_v6 = vld [vmem:[#allocation13 + $0x260] sm:$0xff] }
  0xca   :  { %686 = vmatpush1.msra.mxu1 %v436_v29  ;;  %599 = vmatprep.subr.mxu0 %v559_v12  ;;  %v460_v29 = vld [vmem:[#allocation13 + $0x100] sm:$0xff]  ;;  %v506_v3 = vld [vmem:[#allocation13 + $0x270] sm:$0xff] }
  0xcb   :  { %687 = vmatprep.subr.mxu1 %v435_v30  ;;  %600 = vmatpush1.msra.mxu0 %v558_v15  ;;  %v4271_v30 = vsub.s32 0, %v4237_v4  ;;  %v502_v8 = vld [vmem:[#allocation13 + $0x250] sm:$0xff]  ;;  %v500_v10 = vld [vmem:[#allocation13 + $0x240] sm:$0xff] }
  0xcc   :  { %688 = vmatpush1.msra.mxu1 %v434_v31  ;;  %601 = vmatprep.subr.mxu0 %v557_v18  ;;  %v498_v12 = vld [vmem:[#allocation13 + $0x230] sm:$0xff]  ;;  %v496_v15 = vld [vmem:[#allocation13 + $0x220] sm:$0xff] }
  0xcd   :  { %689 = vmatprep.subr.mxu1 %v433_v32  ;;  %602 = vmatpush1.msra.mxu0 %v556_v20  ;;  %v646_v31 = vrot.slane %v4258_v16, %v4271_v30  ;;  %v2969_v32 = vld [vmem:[#allocation11] ss:$0 sm:$0xff]  ;;  %v494_v18 = vld [vmem:[#allocation13 + $0x210] sm:$0xff]  ;;  %v492_v20 = vld [vmem:[#allocation13 + $0x200] sm:$0xff] }
  0xce   :  { %690 = vmatpush1.msra.mxu1 %v432_v33  ;;  %635 = vmatprep.mubr.f32.mxu0 %v4019_v1 }
  0xcf   :  { %691 = vmatprep.subr.mxu1 %v431_v34  ;;  %727 = vmatprep.mubr.f32.mxu1 %v650_v22  ;;  %v554_v22 = vld [vmem:[#allocation13 + $0x3f0] sm:$0xff] }
  0xd0   :  { %692 = vmatpush1.msra.mxu1 %v430_v35  ;;  %734 = vmatprep.subr.mxu0 %v523_v25  ;;  %v551_v25 = vld [vmem:[#allocation13 + $0x3d8] sm:$0xff] }
  0xd1   :  { %693 = vmatprep.subr.mxu1 %v429_v36 }
  0xd2   :  { %694 = vmatpush1.msra.mxu1 %v428_v37 }
  0xd3   :  { %695 = vmatprep.subr.mxu1 %v491_v38 }
  0xd4   :  { %696 = vmatpush2.msra.mxu1 %v490_v39 }
  0xd5   :  { %697 = vmatprep.subr.mxu1 %v489_v40 }
  0xd6   :  { %698 = vmatpush2.msra.mxu1 %v488_v41 }
  0xd7   :  { %699 = vmatprep.subr.mxu1 %v487_v42 }
  0xd8   :  { %700 = vmatpush2.msra.mxu1 %v486_v43  ;;  %v657_v43 = vsub.s32 3, %v4237_v4 }
  0xd9   :  { %701 = vmatprep.subr.mxu1 %v485_v44 }
  0xda   :  { %702 = vmatpush2.msra.mxu1 %v484_v45  ;;  %v425_v45 = vstv %s2966_s9 }
  0xdb   :  { %703 = vmatprep.subr.mxu1 %v483_v47  ;;  %v658_v47 = vrot.slane %v4258_v16, %v657_v43  ;;  %v537_v43 = vld [vmem:[#allocation13 + $0x368] sm:$0xff] }
  0xdc   :  { %704 = vmatpush2.msra.mxu1 %v482_v49  ;;  %v522_v49 = vld [vmem:[#allocation13 + $0x2f0] sm:$0xff] }
  0xdd   :  { %705 = vmatprep.subr.mxu1 %v481_v51  ;;  %v520_v51 = vld [vmem:[#allocation13 + $0x2e0] sm:$0xff] }
  0xde   :  { %706 = vmatpush2.msra.mxu1 %v480_v52  ;;  %v519_v52 = vld [vmem:[#allocation13 + $0x2d8] sm:$0xff] }
  0xdf   :  { %707 = vmatprep.subr.mxu1 %v479_v54  ;;  %v517_v54 = vld [vmem:[#allocation13 + $0x2c8] sm:$0xff] }
  0xe0   :  { %708 = vmatpush2.msra.mxu1 %v478_v56  ;;  %v515_v56 = vld [vmem:[#allocation13 + $0x2b8] sm:$0xff] }
  0xe1   :  { %709 = vmatprep.subr.mxu1 %v477_v59  ;;  %v513_v59 = vld [vmem:[#allocation13 + $0x2a8] sm:$0xff] }
  0xe2   :  { %710 = vmatpush2.msra.mxu1 %v476_v61  ;;  %v511_v61 = vld [vmem:[#allocation13 + $0x298] sm:$0xff] }
  0xe3   :  { %711 = vmatprep.subr.mxu1 %v475_v63  ;;  %v509_v63 = vld [vmem:[#allocation13 + $0x288] sm:$0xff] }
  0xe4   :  { %712 = vmatpush2.msra.mxu1 %v474_v2  ;;  %v507_v2 = vld [vmem:[#allocation13 + $0x278] sm:$0xff] }
  0xe5   :  { %713 = vmatprep.subr.mxu1 %v473_v5  ;;  %v505_v5 = vld [vmem:[#allocation13 + $0x268] sm:$0xff] }
  0xe6   :  { %714 = vmatpush2.msra.mxu1 %v472_v7  ;;  %v503_v7 = vld [vmem:[#allocation13 + $0x258] sm:$0xff] }
  0xe7   :  { %715 = vmatprep.subr.mxu1 %v471_v9  ;;  %v501_v9 = vld [vmem:[#allocation13 + $0x248] sm:$0xff] }
  0xe8   :  { %716 = vmatpush2.msra.mxu1 %v470_v11  ;;  %v499_v11 = vld [vmem:[#allocation13 + $0x238] sm:$0xff] }
  0xe9   :  { %717 = vmatprep.subr.mxu1 %v469_v14  ;;  %v497_v14 = vld [vmem:[#allocation13 + $0x228] sm:$0xff] }
  0xea   :  { %718 = vmatpush2.msra.mxu1 %v468_v17  ;;  %v495_v17 = vld [vmem:[#allocation13 + $0x218] sm:$0xff] }
  0xeb   :  { %719 = vmatprep.subr.mxu1 %v467_v19  ;;  %v493_v19 = vld [vmem:[#allocation13 + $0x208] sm:$0xff] }
  0xec   :  { %720 = vmatpush2.msra.mxu1 %v466_v21  ;;  %v555_v21 = vld [vmem:[#allocation13 + $0x3f8] sm:$0xff] }
  0xed   :  { %721 = vmatprep.subr.mxu1 %v465_v23  ;;  %v553_v23 = vld [vmem:[#allocation13 + $0x3e8] sm:$0xff] }
  0xee   :  { %722 = vmatpush2.msra.mxu1 %v464_v24  ;;  %v552_v24 = vld [vmem:[#allocation13 + $0x3e0] sm:$0xff] }
  0xef   :  { %723 = vmatprep.subr.mxu1 %v463_v26  ;;  %v550_v26 = vld [vmem:[#allocation13 + $0x3d0] sm:$0xff] }
  0xf0   :  { %724 = vmatpush2.msra.mxu1 %v462_v27  ;;  %v549_v27 = vld [vmem:[#allocation13 + $0x3c8] sm:$0xff] }
  0xf1   :  { %725 = vmatprep.subr.mxu1 %v461_v28  ;;  %v548_v28 = vld [vmem:[#allocation13 + $0x3c0] sm:$0xff] }
  0xf2   :  { %726 = vmatpush2.msra.mxu1 %v460_v29  ;;  %v547_v29 = vld [vmem:[#allocation13 + $0x3b8] sm:$0xff] }
  0xf3   :  { %728 = vmatmul.mubr.f32.vlgmr.msra.gmra.mxu1 %v646_v31  ;;  %3306 = vmatprep.subr.mxu1 %v4019_v1  ;;  %v546_v31 = vld [vmem:[#allocation13 + $0x3b0] sm:$0xff] }
  0xf4   :  { %3314 = vmatprep.mubr.msk.f32.mxu1 %vm5327_vm0, %v4019_v1 }
 0x173   :  { %v409_v33 = vpop.f32.mrf.mxu1 }
 0x174   :  { %v410_v34 = vadd.f32 %v2969_v32, %v409_v33  ;;  %v545_v32 = vld [vmem:[#allocation13 + $0x3a8] sm:$0xff]  ;;  %v544_v33 = vld [vmem:[#allocation13 + $0x3a0] sm:$0xff] }
 0x175   :  { %v3236_v35 = vpop.f32.mrf.mxu1 }
 0x176   :  { %3588 = vtanh.f32 %v410_v34  ;;  %v543_v34 = vld [vmem:[#allocation13 + $0x398] sm:$0xff]  ;;  %v542_v35 = vld [vmem:[#allocation13 + $0x390] sm:$0xff] }
 0x183   :  { %v4278_v36 = vpop.eup %3588 }
 0x184   :  { %v416_v37 = vsel %vm415_vm2, %v4278_v36, 0.0 }
 0x185   :  { %v417_v38 = vrot.slane %v416_v37, 4 }
 0x187   :  { %v418_v39 = vadd.f32 %v417_v38, %v416_v37  ;;  %v541_v37 = vld [vmem:[#allocation13 + $0x388] sm:$0xff]  ;;  %v540_v38 = vld [vmem:[#allocation13 + $0x380] sm:$0xff] }
 0x189   :  { %v419_v40 = vrot.slane %v418_v39, 2 }
 0x18b   :  { %v420_v41 = vadd.f32 %v419_v40, %v418_v39  ;;  %v4285_v39 = vpop.f32.mrf.mxu0  ;;  %v539_v40 = vld [vmem:[#allocation13 + $0x378] sm:$0xff] }
 0x18d   :  { %v421_v42 = vrot.slane %v420_v41, 1 }
 0x18f   :  { %v422_v44 = vadd.f32 %v421_v42, %v420_v41  ;;  %v538_v41 = vld [vmem:[#allocation13 + $0x370] sm:$0xff]  ;;  %v3225_v42 = vpop.f32.mrf.mxu0 }
 0x191   :  { %v424_v46 = vmul.f32 0.125, %v422_v44  ;;  %v536_v44 = vld [vmem:[#allocation13 + $0x360] sm:$0xff] }
 0x193   :  { %v426_v48 = vmul.f32 %v425_v45, %v424_v46  ;;  %v535_v45 = vld [vmem:[#allocation13 + $0x358] sm:$0xff]  ;;  %v534_v46 = vld [vmem:[#allocation13 + $0x350] sm:$0xff] }
 0x195   :  { %2971 = vmatmul.mubr.msk.f32.vlgmr.msra.gmra.mxu0 %vm415_vm2, %v426_v48  ;;  %v532_v48 = vld [vmem:[#allocation13 + $0x340] sm:$0xff] }
 0x196   :  { %735 = vmatpush1.msra.mxu0 %v522_v49  ;;  %798 = vmatprep.mubr.f32.mxu0 %v658_v47  ;;  %v533_v47 = vld [vmem:[#allocation13 + $0x348] sm:$0xff]  ;;  %v531_v49 = vld [vmem:[#allocation13 + $0x338] sm:$0xff] }
 0x197   :  { %736 = vmatprep.subr.mxu0 %v521_v50  ;;  %v530_v50 = vld [vmem:[#allocation13 + $0x330] sm:$0xff] }
 0x198   :  { %737 = vmatpush1.msra.mxu0 %v520_v51  ;;  %v529_v51 = vld [vmem:[#allocation13 + $0x328] sm:$0xff] }
 0x199   :  { %738 = vmatprep.subr.mxu0 %v519_v52  ;;  %v528_v52 = vld [vmem:[#allocation13 + $0x320] sm:$0xff] }
 0x19a   :  { %739 = vmatpush1.msra.mxu0 %v518_v53  ;;  %v653_v53 = vsub.s32 2, %v4237_v4 }
 0x19b   :  { %740 = vmatprep.subr.mxu0 %v517_v54  ;;  %v527_v54 = vld [vmem:[#allocation13 + $0x318] sm:$0xff] }
 0x19c   :  { %741 = vmatpush1.msra.mxu0 %v516_v55  ;;  %v526_v55 = vld [vmem:[#allocation13 + $0x310] sm:$0xff] }
 0x19d   :  { %742 = vmatprep.subr.mxu0 %v515_v56  ;;  %v525_v56 = vld [vmem:[#allocation13 + $0x308] sm:$0xff] }
 0x19e   :  { %743 = vmatpush1.msra.mxu0 %v514_v57  ;;  %v524_v57 = vld [vmem:[#allocation13 + $0x300] sm:$0xff] }
 0x19f   :  { %744 = vmatprep.subr.mxu0 %v513_v59  ;;  %v654_v59 = vrot.slane %v4258_v16, %v653_v53  ;;  %v855_v16 = vld [vmem:[%s5313_s12 + $0x68] sm:$0xff]  ;;  %v1020_v53 = vld [vmem:[%s5315_s14 + $0x30] sm:$0xff] }
 0x1a0   :  { %745 = vmatpush1.msra.mxu0 %v512_v60  ;;  %v857_v60 = vld [vmem:[%s5313_s12 + $0x78] sm:$0xff] }
 0x1a1   :  { %746 = vmatprep.subr.mxu0 %v511_v61  ;;  %v856_v61 = vld [vmem:[%s5313_s12 + $0x70] sm:$0xff] }
 0x1a2   :  { %747 = vmatpush1.msra.mxu0 %v510_v62  ;;  %v854_v62 = vld [vmem:[%s5313_s12 + $0x60] sm:$0xff] }
 0x1a3   :  { %748 = vmatprep.subr.mxu0 %v509_v63  ;;  %v853_v63 = vld [vmem:[%s5313_s12 + $0x58] sm:$0xff] }
 0x1a4   :  { %749 = vmatpush1.msra.mxu0 %v508_v0  ;;  %v852_v0 = vld [vmem:[%s5313_s12 + $0x50] sm:$0xff] }
 0x1a5   :  { %750 = vmatprep.subr.mxu0 %v507_v2  ;;  %v851_v2 = vld [vmem:[%s5313_s12 + $0x48] sm:$0xff] }
 0x1a6   :  { %751 = vmatpush1.msra.mxu0 %v506_v3  ;;  %v850_v3 = vld [vmem:[%s5313_s12 + $0x40] sm:$0xff] }
 0x1a7   :  { %752 = vmatprep.subr.mxu0 %v505_v5  ;;  %v849_v5 = vld [vmem:[%s5313_s12 + $0x38] sm:$0xff] }
 0x1a8   :  { %753 = vmatpush1.msra.mxu0 %v504_v6  ;;  %v848_v6 = vld [vmem:[%s5313_s12 + $0x30] sm:$0xff] }
 0x1a9   :  { %754 = vmatprep.subr.mxu0 %v503_v7  ;;  %v847_v7 = vld [vmem:[%s5313_s12 + $0x28] sm:$0xff] }
 0x1aa   :  { %755 = vmatpush1.msra.mxu0 %v502_v8  ;;  %v846_v8 = vld [vmem:[%s5313_s12 + $0x20] sm:$0xff] }
 0x1ab   :  { %756 = vmatprep.subr.mxu0 %v501_v9  ;;  %v845_v9 = vld [vmem:[%s5313_s12 + $0x18] sm:$0xff] }
 0x1ac   :  { %757 = vmatpush1.msra.mxu0 %v500_v10  ;;  %v844_v10 = vld [vmem:[%s5313_s12 + $0x10] sm:$0xff] }
 0x1ad   :  { %758 = vmatprep.subr.mxu0 %v499_v11  ;;  %v843_v11 = vld [vmem:[%s5313_s12 + $0x8] sm:$0xff] }
 0x1ae   :  { %759 = vmatpush1.msra.mxu0 %v498_v12  ;;  %v842_v12 = vld [vmem:[%s5313_s12] sm:$0xff]  ;;  %s238_s12 = sld [smem:[#allocation3]] }
 0x1af   :  { %760 = vmatprep.subr.mxu0 %v497_v14 }
 0x1b0   :  { %761 = vmatpush1.msra.mxu0 %v496_v15 }
 0x1b1   :  { %762 = vmatprep.subr.mxu0 %v495_v17  ;;  %v805_v17 = vld [vmem:[#allocation14] sm:$0x3] }
 0x1b2   :  { %763 = vmatpush1.msra.mxu0 %v494_v18 }
 0x1b3   :  { %764 = vmatprep.subr.mxu0 %v493_v19  ;;  %v729_v15 = vpop.f32.mrf.mxu1 }
 0x1b4   :  { %765 = vmatpush1.msra.mxu0 %v492_v20  ;;  %s823_s27 = ssub.f32 1.0, %s238_s12 }
 0x1b5   :  { %766 = vmatprep.subr.mxu0 %v555_v21  ;;  %v731_v19 = vpop.f32.mrf.mxu1  ;;  %v810_v21 = vrot.slane %v805_v17, %v4271_v30 }
 0x1b6   :  { %767 = vmatpush2.msra.mxu0 %v554_v22 }
 0x1b7   :  { %768 = vmatprep.subr.mxu0 %v553_v23 }
 0x1b8   :  { %769 = vmatpush2.msra.mxu0 %v552_v24 }
 0x1b9   :  { %770 = vmatprep.subr.mxu0 %v551_v25  ;;  %v814_v25 = vrot.slane %v805_v17, %v649_v13 }
 0x1ba   :  { %771 = vmatpush2.msra.mxu0 %v550_v26 }
 0x1bb   :  { %772 = vmatprep.subr.mxu0 %v549_v27 }
 0x1bc   :  { %773 = vmatpush2.msra.mxu0 %v548_v28 }
 0x1bd   :  { %774 = vmatprep.subr.mxu0 %v547_v29 }
 0x1be   :  { %775 = vmatpush2.msra.mxu0 %v546_v31  ;;  %v414_v31 = vld [vmem:[%s5346_s4 + $0x2] sm:$0x3] }
 0x1bf   :  { %776 = vmatprep.subr.mxu0 %v545_v32  ;;  %v824_v32 = vstv %s823_s27 }
 0x1c0   :  { %777 = vmatpush2.msra.mxu0 %v544_v33  ;;  %v832_v33 = vrot.slane %v414_v31, 1 }
 0x1c1   :  { %778 = vmatprep.subr.mxu0 %v543_v34  ;;  %v830_v34 = vstv %s829_s13 }
 0x1c2   :  { %779 = vmatpush2.msra.mxu0 %v542_v35  ;;  %v821_v35 = vstv %s238_s12  ;;  %s4022_s12 = smov 32  }
 0x1c3   :  { %780 = vmatprep.subr.mxu0 %v541_v37  ;;  %v825_v37 = vmul.f32 %v824_v32, %v414_v31 }
 0x1c4   :  { %781 = vmatpush2.msra.mxu0 %v540_v38  ;;  %v827_v38 = vstv %s2965_s1 }
 0x1c5   :  { %782 = vmatprep.subr.mxu0 %v539_v40  ;;  %v834_v40 = vmul.f32 %v832_v33, %v830_v34 }
 0x1c6   :  { %783 = vmatpush2.msra.mxu0 %v538_v41 }
 0x1c7   :  { %784 = vmatprep.subr.mxu0 %v537_v43 }
 0x1c8   :  { %785 = vmatpush2.msra.mxu0 %v536_v44 }
 0x1c9   :  { %786 = vmatprep.subr.mxu0 %v535_v45 }
 0x1ca   :  { %787 = vmatpush2.msra.mxu0 %v534_v46  ;;  %v841_v46 = vld [vmem:[#allocation16 + $0x28] sm:$0xff] }
 0x1cb   :  { %788 = vmatprep.subr.mxu0 %v533_v47  ;;  %v840_v47 = vld [vmem:[#allocation16 + $0x20] sm:$0xff] }
 0x1cc   :  { %789 = vmatpush2.msra.mxu0 %v532_v48  ;;  %v839_v48 = vld [vmem:[#allocation16 + $0x18] sm:$0xff] }
 0x1cd   :  { %790 = vmatprep.subr.mxu0 %v531_v49  ;;  %v838_v49 = vld [vmem:[#allocation16 + $0x10] sm:$0xff] }
 0x1ce   :  { %791 = vmatpush2.msra.mxu0 %v530_v50  ;;  %v837_v50 = vld [vmem:[#allocation16 + $0x8] sm:$0xff] }
 0x1cf   :  { %792 = vmatprep.subr.mxu0 %v529_v51  ;;  %v836_v51 = vld [vmem:[#allocation16] sm:$0xff] }
 0x1d0   :  { %793 = vmatpush2.msra.mxu0 %v528_v52  ;;  %v1021_v52 = vld [vmem:[%s5315_s14 + $0x38] sm:$0xff] }
 0x1d1   :  { %794 = vmatprep.subr.mxu0 %v527_v54  ;;  %v1018_v54 = vld [vmem:[%s5315_s14 + $0x20] sm:$0xff] }
 0x1d2   :  { %795 = vmatpush2.msra.mxu0 %v526_v55  ;;  %v1017_v55 = vld [vmem:[%s5315_s14 + $0x18] sm:$0xff] }
 0x1d3   :  { %796 = vmatprep.subr.mxu0 %v525_v56  ;;  %v4398_v56 = vld [vmem:[#allocation19 + $0x18] sm:$0xff] }
 0x1d4   :  { %797 = vmatpush2.msra.mxu0 %v524_v57  ;;  %3307 = vmatpush3.msra.mxu1 %v4398_v56  ;;  %v1016_v57 = vld [vmem:[%s5315_s14 + $0x10] sm:$0xff] }
 0x1d5   :  { %799 = vmatmul.mubr.f32.vlgmr.msra.gmra.mxu0 %v654_v59  ;;  %3237 = vmatprep.subr.mxu0 %v4019_v1  ;;  %v4406_v59 = vld [vmem:[#allocation19 + $0x10] sm:$0xff] }
 0x1d6   :  { %3269 = vmatprep.mubr.msk.f32.mxu0 %vm5327_vm0, %v4019_v1  ;;  %3238 = vmatpush3.msra.mxu0 %v857_v60  ;;  %v1015_v60 = vld [vmem:[%s5315_s14 + $0x8] sm:$0xff] }
 0x1d7   :  { %3239 = vmatprep.subr.mxu0 %v4019_v1  ;;  %3308 = vmatprep.subr.mxu1 %v4019_v1 }
 0x1d8   :  { %3240 = vmatpush3.msra.mxu0 %v856_v61  ;;  %3309 = vmatpush3.msra.mxu1 %v4406_v59  ;;  %v4414_v61 = vld [vmem:[#allocation19 + $0x8] sm:$0xff] }
 0x1d9   :  { %3241 = vmatprep.subr.mxu0 %v4019_v1  ;;  %3310 = vmatprep.subr.mxu1 %v4019_v1 }
 0x1da   :  { %3242 = vmatpush3.msra.mxu0 %v855_v16  ;;  %3311 = vmatpush3.msra.mxu1 %v4414_v61  ;;  %v1014_v16 = vld [vmem:[%s5315_s14] sm:$0xff] }
 0x1db   :  { %3243 = vmatprep.subr.mxu0 %v4019_v1  ;;  %3312 = vmatprep.subr.mxu1 %v4019_v1 }
 0x1dc   :  { %3244 = vmatpush3.msra.mxu0 %v854_v62  ;;  %v4422_v62 = vld [vmem:[#allocation19] sm:$0xff] }
 0x1dd   :  { %3245 = vmatprep.subr.mxu0 %v4019_v1  ;;  %3313 = vmatpush3.msra.mxu1 %v4422_v62 }
 0x1de   :  { %3246 = vmatpush3.msra.mxu0 %v853_v63  ;;  %3315 = vmatmul.mubr.f32.vlgmr.msra.gmra.mxu1 %v4019_v1 }
 0x1df   :  { %3247 = vmatprep.subr.mxu0 %v4019_v1  ;;  %3328 = vmatprep.subr.mxu1 %v4019_v1 }
 0x1e0   :  { %3248 = vmatpush3.msra.mxu0 %v852_v0  ;;  %3336 = vmatprep.mubr.msk.f32.mxu1 %vm5327_vm0, %v4019_v1 }
 0x1e1   :  { %3249 = vmatprep.subr.mxu0 %v4019_v1  ;;  %3329 = vmatpush3.msra.mxu1 %v4398_v56 }
 0x1e2   :  { %3250 = vmatpush3.msra.mxu0 %v851_v2  ;;  %3330 = vmatprep.subr.mxu1 %v4019_v1 }
 0x1e3   :  { %3251 = vmatprep.subr.mxu0 %v4019_v1  ;;  %3331 = vmatpush3.msra.mxu1 %v4406_v59 }
 0x1e4   :  { %3252 = vmatpush3.msra.mxu0 %v850_v3  ;;  %3332 = vmatprep.subr.mxu1 %v4019_v1 }
 0x1e5   :  { %3253 = vmatprep.subr.mxu0 %v4019_v1  ;;  %3333 = vmatpush3.msra.mxu1 %v4414_v61 }
 0x1e6   :  { %3254 = vmatpush3.msra.mxu0 %v849_v5  ;;  %3334 = vmatprep.subr.mxu1 %v4019_v1  ;;  %v2973_v5 = vld [vmem:[#allocation17] ss:$0 sm:$0xff] }
 0x1e7   :  { %3255 = vmatprep.subr.mxu0 %v4019_v1  ;;  %3335 = vmatpush3.msra.mxu1 %v4422_v62 }
 0x1e8   :  { %3256 = vmatpush3.msra.mxu0 %v848_v6  ;;  %3350 = vmatprep.subr.mxu1 %v4019_v1 }
 0x1e9   :  { %3257 = vmatprep.subr.mxu0 %v4019_v1 }
 0x1ea   :  { %3258 = vmatpush3.msra.mxu0 %v847_v7 }
 0x1eb   :  { %3259 = vmatprep.subr.mxu0 %v4019_v1 }
 0x1ec   :  { %3260 = vmatpush3.msra.mxu0 %v846_v8 }
 0x1ed   :  { %3261 = vmatprep.subr.mxu0 %v4019_v1 }
 0x1ee   :  { %3262 = vmatpush3.msra.mxu0 %v845_v9 }
 0x1ef   :  { %3263 = vmatprep.subr.mxu0 %v4019_v1 }
 0x1f0   :  { %3264 = vmatpush3.msra.mxu0 %v844_v10 }
 0x1f1   :  { %3265 = vmatprep.subr.mxu0 %v4019_v1 }
 0x1f2   :  { %3266 = vmatpush3.msra.mxu0 %v843_v11 }
 0x1f3   :  { %3267 = vmatprep.subr.mxu0 %v4019_v1 }
 0x1f4   :  { %3268 = vmatpush3.msra.mxu0 %v842_v12  ;;  %v2974_v12 = vld [vmem:[#allocation20] ss:$0 sm:$0xff] }
 0x1f5   :  { %3272 = vmatprep.subr.mxu0 %v4019_v1 }
 0x255   :  { %v637_v14 = vpop.f32.mrf.mxu0 }
 0x256   :  { %v730_v20 = vadd.f32 %v729_v15, %v637_v14 }
 0x257   :  { %v639_v18 = vpop.f32.mrf.mxu0 }
 0x258   :  { %v732_v23 = vadd.f32 %v731_v19, %v639_v18 }
 0x295   :  { %v800_v22 = vpop.f32.mrf.mxu0 }
 0x296   :  { %v801_v24 = vadd.f32 %v800_v22, %v730_v20 }
 0x297   :  { %v802_v26 = vpop.f32.mrf.mxu0 }
 0x298   :  { %v817_v27 = vadd.f32 %v810_v21, %v801_v24  ;;  %v803_v28 = vadd.f32 %v802_v26, %v732_v23 }
 0x29a   :  { %3590 = vtanh.f32 %v817_v27  ;;  %v818_v29 = vadd.f32 %v814_v25, %v803_v28 }
 0x29c   :  { %3592 = vtanh.f32 %v818_v29 }
 0x29e   :  { %v1176_v10 = vpop.f32.mrf.mxu1 }
 0x2a0   :  { %v3316_v11 = vpop.f32.mrf.mxu1 }
 0x2a7   :  { %v3591_v13 = vpop.eup %3590 }
 0x2a8   :  { %v822_v41 = vmul.f32 %v3591_v13, %v821_v35 }
 0x2a9   :  { %v3593_v42 = vpop.eup %3592 }
 0x2aa   :  { %v828_v43 = vmul.f32 %v3593_v42, %v827_v38  ;;  %v4362_v44 = vadd.f32 %v825_v37, %v822_v41 }
 0x2ac   :  { %v4364_v45 = vadd.f32 %v834_v40, %v828_v43 }
 0x2ae   :  { %3270 = vmatmul.mubr.f32.vlgmr.msra.gmra.mxu0 %v4364_v45 }
 0x2af   :  { %3273 = vmatpush3.msra.mxu0 %v841_v46  ;;  %3284 = vmatprep.mubr.msk.f32.mxu0 %vm5327_vm0, %v4019_v1 }
 0x2b0   :  { %3274 = vmatprep.subr.mxu0 %v4019_v1 }
 0x2b1   :  { %3275 = vmatpush3.msra.mxu0 %v840_v47 }
 0x2b2   :  { %3276 = vmatprep.subr.mxu0 %v4019_v1 }
 0x2b3   :  { %3277 = vmatpush3.msra.mxu0 %v839_v48 }
 0x2b4   :  { %3278 = vmatprep.subr.mxu0 %v4019_v1 }
 0x2b5   :  { %3279 = vmatpush3.msra.mxu0 %v838_v49 }
 0x2b6   :  { %3280 = vmatprep.subr.mxu0 %v4019_v1 }
 0x2b7   :  { %3281 = vmatpush3.msra.mxu0 %v837_v50 }
 0x2b8   :  { %3282 = vmatprep.subr.mxu0 %v4019_v1 }
 0x2b9   :  { %3283 = vmatpush3.msra.mxu0 %v836_v51 }
 0x2ba   :  { %3285 = vmatmul.mubr.msk.f32.vlgmr.msra.gmra.mxu0 %vm415_vm2, %v4278_v36  ;;  %3287 = vmatprep.subr.mxu0 %v4019_v1  ;;  %v1019_v36 = vld [vmem:[%s5315_s14 + $0x28] sm:$0xff]  ;;  %s4021_s14 = smov 64   ;;  %vm2925_vm2 = vcmask 0  }
 0x2bb   :  { %3303 = vmatprep.mubr.msk.f32.mxu0 %vm5327_vm0, %v4019_v1  ;;  %3288 = vmatpush3.msra.mxu0 %v1021_v52 }
 0x2bc   :  { %3289 = vmatprep.subr.mxu0 %v4019_v1 }
 0x2bd   :  { %3290 = vmatpush3.msra.mxu0 %v1020_v53 }
 0x2be   :  { %3291 = vmatprep.subr.mxu0 %v4019_v1 }
 0x2bf   :  { %3292 = vmatpush3.msra.mxu0 %v1019_v36 }
 0x2c0   :  { %3293 = vmatprep.subr.mxu0 %v4019_v1 }
 0x2c1   :  { %3294 = vmatpush3.msra.mxu0 %v1018_v54 }
 0x2c2   :  { %3295 = vmatprep.subr.mxu0 %v4019_v1 }
 0x2c3   :  { %3296 = vmatpush3.msra.mxu0 %v1017_v55 }
 0x2c4   :  { %3297 = vmatprep.subr.mxu0 %v4019_v1 }
 0x2c5   :  { %3298 = vmatpush3.msra.mxu0 %v1016_v57 }
 0x2c6   :  { %3299 = vmatprep.subr.mxu0 %v4019_v1 }
 0x2c7   :  { %3300 = vmatpush3.msra.mxu0 %v1015_v60 }
 0x2c8   :  { %3301 = vmatprep.subr.mxu0 %v4019_v1 }
 0x2c9   :  { %3302 = vmatpush3.msra.mxu0 %v1014_v16 }
 0x2ca   :  { %3317 = vmatprep.subr.mxu0 %v4019_v1 }
 0x36e   :  { %v924_v63 = vpop.f32.mrf.mxu0 }
 0x36f   :  { %v931_v2 = vrot.slane %v924_v63, %v4271_v30 }
 0x370   :  { %v3271_v0 = vpop.f32.mrf.mxu0 }
 0x37a   :  { %v1001_v3 = vpop.f32.mrf.mxu0 }
 0x37b   :  { %v1002_v6 = vadd.f32 %v1001_v3, %v931_v2 }
 0x37c   :  { %v3286_v7 = vpop.f32.mrf.mxu0 }
 0x37d   :  { %v4439_v8 = vadd.f32 %v2973_v5, %v1002_v6 }
 0x37f   :  { %v1013_v9 = vmax.f32 %v4439_v8, 0.0 }
 0x381   :  { %3304 = vmatmul.mubr.msk.f32.vlgmr.msra.gmra.mxu0 %vm1029_vm3, %v1013_v9 }
 0x382   :  { %3318 = vmatpush3.msra.mxu0 %v4398_v56  ;;  %3325 = vmatprep.mubr.msk.f32.mxu0 %vm5327_vm0, %v4019_v1 }
 0x383   :  { %3319 = vmatprep.subr.mxu0 %v4019_v1 }
 0x384   :  { %3320 = vmatpush3.msra.mxu0 %v4406_v59 }
 0x385   :  { %3321 = vmatprep.subr.mxu0 %v4019_v1 }
 0x386   :  { %3322 = vmatpush3.msra.mxu0 %v4414_v61 }
 0x387   :  { %3323 = vmatprep.subr.mxu0 %v4019_v1 }
 0x388   :  { %3324 = vmatpush3.msra.mxu0 %v4422_v62 }
 0x389   :  { %3339 = vmatprep.subr.mxu0 %v4019_v1 }
 0x441   :  { %v1099_v14 = vpop.f32.mrf.mxu0 }
 0x442   :  { %v4455_v15 = vadd.f32 %v2974_v12, %v1099_v14 }
 0x443   :  { %v3305_v17 = vpop.f32.mrf.mxu0 }
 0x444   :  { %v1180_v18 = vadd.f32 %v1176_v10, %v4455_v15 }
 0x446   :  { %3594 = vtanh.f32 %v1180_v18  ;;  %v2976_v20 = vmul.f32 -1.442695, %v1180_v18 }
 0x448   :  { %3596 = vpow2.f32 %v2976_v20 }
 0x453   :  { %v3595_v19 = vpop.eup %3594 }
 0x454   :  { %1190 = vrot.lane.b32.xlu0 %v3595_v19, %s4021_s14 }
 0x455   :  { %v3597_v21 = vpop.eup %3596 }
 0x456   :  { %v1184_v22 = vadd.f32 1.0, %v3597_v21 }
 0x458   :  { %3598 = vrcp.f32 %v1184_v22 }
 0x465   :  { %v3599_v23 = vpop.eup %3598 }
 0x466   :  { %v1188_v26 = vmul.f32 0.0, %v3599_v23 }
 0x4c6   :  { %v1191_v24 = vpop.permute.xlu0 %1190 }
 0x4c7   :  { %v1193_v25 = vmul.f32 %v3599_v23, %v1191_v24 }
 0x4c9   :  { %1195 = vrot.lane.b32.xlu0 %v1193_v25, %s4022_s12 }
 0x53b   :  { %v1196_v27 = vpop.permute.xlu0 %1195 }
 0x53c   :  { %v1198_v28 = vadd.f32 %v1196_v27, %v1188_v26 }
 0x53e   :  { %3600 = vtanh.f32 %v1198_v28  ;;  %v1295_v48 = vrot.slane %v1198_v28, 7 }
 0x54b   :  { %v3601_v29 = vpop.eup %3600 }
 0x54c   :  { %1201 = vrot.lane.b32.xlu1 %v3601_v29, %s4021_s14 }
 0x5be   :  { %v1202_v31 = vpop.permute.xlu1 %1201 }
 0x5bf   :  { %v1204_v32 = vmul.f32 %v3599_v23, %v1202_v31 }
 0x5c1   :  { %1206 = vrot.lane.b32.xlu1 %v1204_v32, %s4022_s12 }
 0x633   :  { %v1207_v33 = vpop.permute.xlu1 %1206 }
 0x634   :  { %1210 = vst.msk [vmem:[#allocation2] sm:$0x1] %vm1209_vm4, %v1207_v33  ;;  %3326 = vmatmul.mubr.msk.f32.vlgmr.msra.gmra.mxu0 %vm253_vm1, %v1207_v33 }
 0x635   :  { %3340 = vmatpush3.msra.mxu0 %v4398_v56  ;;  %3347 = vmatprep.mubr.msk.f32.mxu0 %vm5327_vm0, %v4019_v1 }
 0x636   :  { %3341 = vmatprep.subr.mxu0 %v4019_v1 }
 0x637   :  { %3342 = vmatpush3.msra.mxu0 %v4406_v59 }
 0x638   :  { %3343 = vmatprep.subr.mxu0 %v4019_v1 }
 0x639   :  { %3344 = vmatpush3.msra.mxu0 %v4414_v61 }
 0x63a   :  { %3345 = vmatprep.subr.mxu0 %v4019_v1 }
 0x63b   :  { %3346 = vmatpush3.msra.mxu0 %v4422_v62 }
 0x63c   :  { %3361 = vmatprep.subr.mxu0 %v4019_v1 }
 0x6f4   :  { %v1279_v34 = vpop.f32.mrf.mxu0 }
 0x6f5   :  { %v1284_v35 = vrot.slane %v1279_v34, 7 }
 0x6f6   :  { %v3327_v37 = vpop.f32.mrf.mxu0 }
 0x6f7   :  { %v1286_v13 = vadd.f32 %v1284_v35, %v4455_v15 }
 0x6f9   :  { %3602 = vtanh.f32 %v1286_v13  ;;  %v2978_v40 = vmul.f32 -1.442695, %v1286_v13 }
 0x6fb   :  { %3604 = vpow2.f32 %v2978_v40 }
 0x706   :  { %v3603_v38 = vpop.eup %3602 }
 0x707   :  { %1299 = vrot.lane.b32.xlu0 %v3603_v38, %s4021_s14 }
 0x708   :  { %v3605_v41 = vpop.eup %3604 }
 0x709   :  { %v1290_v42 = vadd.f32 1.0, %v3605_v41 }
 0x70b   :  { %3606 = vrcp.f32 %v1290_v42 }
 0x718   :  { %v3607_v43 = vpop.eup %3606 }
 0x719   :  { %v1297_v49 = vmul.f32 %v3607_v43, %v1295_v48 }
 0x779   :  { %v1300_v46 = vpop.permute.xlu0 %1299 }
 0x77a   :  { %v1302_v47 = vmul.f32 %v3607_v43, %v1300_v46 }
 0x77c   :  { %1304 = vrot.lane.b32.xlu1 %v1302_v47, %s4022_s12 }
 0x7ee   :  { %v1305_v50 = vpop.permute.xlu1 %1304 }
 0x7ef   :  { %v1307_v51 = vadd.f32 %v1305_v50, %v1297_v49 }
 0x7f1   :  { %3608 = vtanh.f32 %v1307_v51  ;;  %v1407_v11 = vrot.slane %v1307_v51, 7 }
 0x7fe   :  { %v3609_v52 = vpop.eup %3608 }
 0x7ff   :  { %1310 = vrot.lane.b32.xlu0 %v3609_v52, %s4021_s14 }
 0x871   :  { %v1311_v53 = vpop.permute.xlu0 %1310 }
 0x872   :  { %v4477_v36 = vmul.f32 %v3607_v43, %v1311_v53 }
 0x874   :  { %v1320_v54 = vrot.slane %v4477_v36, 1 }
 0x876   :  { %1321 = vrot.lane.b32.xlu1 %v1320_v54, %s4022_s12 }
 0x8e8   :  { %v1322_v55 = vpop.permute.xlu1 %1321 }
 0x8e9   :  { %3337 = vmatmul.mubr.msk.f32.vlgmr.msra.gmra.mxu1 %vm253_vm1, %v1322_v55 }
 0x8ea   :  { %3351 = vmatpush3.msra.mxu1 %v4398_v56  ;;  %3358 = vmatprep.mubr.msk.f32.mxu1 %vm5327_vm0, %v4019_v1 }
 0x8eb   :  { %3352 = vmatprep.subr.mxu1 %v4019_v1 }
 0x8ec   :  { %3353 = vmatpush3.msra.mxu1 %v4406_v59 }
 0x8ed   :  { %3354 = vmatprep.subr.mxu1 %v4019_v1 }
 0x8ee   :  { %3355 = vmatpush3.msra.mxu1 %v4414_v61 }
 0x8ef   :  { %3356 = vmatprep.subr.mxu1 %v4019_v1 }
 0x8f0   :  { %3357 = vmatpush3.msra.mxu1 %v4422_v62 }
 0x8f1   :  { %3372 = vmatprep.subr.mxu1 %v4019_v1 }
 0x9a9   :  { %v1391_v57 = vpop.f32.mrf.mxu1 }
 0x9aa   :  { %v1396_v60 = vrot.slane %v1391_v57, 6 }
 0x9ab   :  { %v3338_v16 = vpop.f32.mrf.mxu1 }
 0x9ac   :  { %v1398_v63 = vadd.f32 %v1396_v60, %v4455_v15 }
 0x9ae   :  { %3610 = vtanh.f32 %v1398_v63  ;;  %v2980_v2 = vmul.f32 -1.442695, %v1398_v63 }
 0x9b0   :  { %3612 = vpow2.f32 %v2980_v2 }
 0x9bb   :  { %v3611_v0 = vpop.eup %3610 }
 0x9bc   :  { %1411 = vrot.lane.b32.xlu0 %v3611_v0, %s4021_s14 }
 0x9bd   :  { %v3613_v3 = vpop.eup %3612 }
 0x9be   :  { %v1402_v5 = vadd.f32 1.0, %v3613_v3 }
 0x9c0   :  { %3614 = vrcp.f32 %v1402_v5 }
 0x9cd   :  { %v3615_v6 = vpop.eup %3614 }
 0x9ce   :  { %v1409_v12 = vmul.f32 %v3615_v6, %v1407_v11 }
 0xa2e   :  { %v1412_v7 = vpop.permute.xlu0 %1411 }
 0xa2f   :  { %v1414_v10 = vmul.f32 %v3615_v6, %v1412_v7 }
 0xa31   :  { %1416 = vrot.lane.b32.xlu1 %v1414_v10, %s4022_s12 }
 0xaa3   :  { %v1417_v14 = vpop.permute.xlu1 %1416 }
 0xaa4   :  { %v1419_v17 = vadd.f32 %v1417_v14, %v1409_v12 }
 0xaa6   :  { %3616 = vtanh.f32 %v1419_v17  ;;  %v1519_v35 = vrot.slane %v1419_v17, 7 }
 0xab3   :  { %v3617_v18 = vpop.eup %3616 }
 0xab4   :  { %1422 = vrot.lane.b32.xlu0 %v3617_v18, %s4021_s14 }
 0xb26   :  { %v1423_v19 = vpop.permute.xlu0 %1422 }
 0xb27   :  { %v4496_v20 = vmul.f32 %v3615_v6, %v1423_v19 }
 0xb29   :  { %v1432_v21 = vrot.slane %v4496_v20, 2 }
 0xb2b   :  { %1433 = vrot.lane.b32.xlu1 %v1432_v21, %s4022_s12 }
 0xb9d   :  { %v1434_v22 = vpop.permute.xlu1 %1433 }
 0xb9e   :  { %3348 = vmatmul.mubr.msk.f32.vlgmr.msra.gmra.mxu0 %vm253_vm1, %v1434_v22 }
 0xb9f   :  { %3362 = vmatpush3.msra.mxu0 %v4398_v56  ;;  %3369 = vmatprep.mubr.msk.f32.mxu0 %vm5327_vm0, %v4019_v1 }
 0xba0   :  { %3363 = vmatprep.subr.mxu0 %v4019_v1 }
 0xba1   :  { %3364 = vmatpush3.msra.mxu0 %v4406_v59 }
 0xba2   :  { %3365 = vmatprep.subr.mxu0 %v4019_v1 }
 0xba3   :  { %3366 = vmatpush3.msra.mxu0 %v4414_v61 }
 0xba4   :  { %3367 = vmatprep.subr.mxu0 %v4019_v1 }
 0xba5   :  { %3368 = vmatpush3.msra.mxu0 %v4422_v62 }
 0xba6   :  { %3383 = vmatprep.subr.mxu0 %v4019_v1 }
 0xc5e   :  { %v1503_v23 = vpop.f32.mrf.mxu0 }
 0xc5f   :  { %v1508_v24 = vrot.slane %v1503_v23, 5 }
 0xc60   :  { %v3349_v25 = vpop.f32.mrf.mxu0 }
 0xc61   :  { %v1510_v26 = vadd.f32 %v1508_v24, %v4455_v15 }
 0xc63   :  { %3618 = vtanh.f32 %v1510_v26  ;;  %v2982_v28 = vmul.f32 -1.442695, %v1510_v26 }
 0xc65   :  { %3620 = vpow2.f32 %v2982_v28 }
 0xc70   :  { %v3619_v27 = vpop.eup %3618 }
 0xc71   :  { %1523 = vrot.lane.b32.xlu0 %v3619_v27, %s4021_s14 }
 0xc72   :  { %v3621_v29 = vpop.eup %3620 }
 0xc73   :  { %v1514_v31 = vadd.f32 1.0, %v3621_v29 }
 0xc75   :  { %3622 = vrcp.f32 %v1514_v31 }
 0xc82   :  { %v3623_v32 = vpop.eup %3622 }
 0xc83   :  { %v1521_v37 = vmul.f32 %v3623_v32, %v1519_v35 }
 0xce3   :  { %v1524_v33 = vpop.permute.xlu0 %1523 }
 0xce4   :  { %v1526_v34 = vmul.f32 %v3623_v32, %v1524_v33 }
 0xce6   :  { %1528 = vrot.lane.b32.xlu1 %v1526_v34, %s4022_s12 }
 0xd58   :  { %v1529_v13 = vpop.permute.xlu1 %1528 }
 0xd59   :  { %v1531_v38 = vadd.f32 %v1529_v13, %v1521_v37 }
 0xd5b   :  { %3624 = vtanh.f32 %v1531_v38  ;;  %v1631_v16 = vrot.slane %v1531_v38, 7 }
 0xd68   :  { %v3625_v40 = vpop.eup %3624 }
 0xd69   :  { %1534 = vrot.lane.b32.xlu0 %v3625_v40, %s4021_s14 }
 0xddb   :  { %v1535_v41 = vpop.permute.xlu0 %1534 }
 0xddc   :  { %v4515_v42 = vmul.f32 %v3623_v32, %v1535_v41 }
 0xdde   :  { %v1544_v43 = vrot.slane %v4515_v42, 3 }
 0xde0   :  { %1545 = vrot.lane.b32.xlu1 %v1544_v43, %s4022_s12 }
 0xe52   :  { %v1546_v46 = vpop.permute.xlu1 %1545 }
 0xe53   :  { %3359 = vmatmul.mubr.msk.f32.vlgmr.msra.gmra.mxu1 %vm253_vm1, %v1546_v46 }
 0xe54   :  { %3373 = vmatpush3.msra.mxu1 %v4398_v56  ;;  %3380 = vmatprep.mubr.msk.f32.mxu1 %vm5327_vm0, %v4019_v1 }
 0xe55   :  { %3374 = vmatprep.subr.mxu1 %v4019_v1 }
 0xe56   :  { %3375 = vmatpush3.msra.mxu1 %v4406_v59 }
 0xe57   :  { %3376 = vmatprep.subr.mxu1 %v4019_v1 }
 0xe58   :  { %3377 = vmatpush3.msra.mxu1 %v4414_v61 }
 0xe59   :  { %3378 = vmatprep.subr.mxu1 %v4019_v1 }
 0xe5a   :  { %3379 = vmatpush3.msra.mxu1 %v4422_v62 }
 0xe5b   :  { %3394 = vmatprep.subr.mxu1 %v4019_v1 }
 0xf13   :  { %v1615_v47 = vpop.f32.mrf.mxu1 }
 0xf14   :  { %v1620_v48 = vrot.slane %v1615_v47, 4 }
 0xf15   :  { %v3360_v49 = vpop.f32.mrf.mxu1 }
 0xf16   :  { %v1622_v50 = vadd.f32 %v1620_v48, %v4455_v15 }
 0xf18   :  { %3626 = vtanh.f32 %v1622_v50  ;;  %v2984_v52 = vmul.f32 -1.442695, %v1622_v50 }
 0xf1a   :  { %3628 = vpow2.f32 %v2984_v52 }
 0xf25   :  { %v3627_v51 = vpop.eup %3626 }
 0xf26   :  { %1635 = vrot.lane.b32.xlu0 %v3627_v51, %s4021_s14 }
 0xf27   :  { %v3629_v53 = vpop.eup %3628 }
 0xf28   :  { %v1626_v54 = vadd.f32 1.0, %v3629_v53 }
 0xf2a   :  { %3630 = vrcp.f32 %v1626_v54 }
 0xf37   :  { %v3631_v55 = vpop.eup %3630 }
 0xf38   :  { %v1633_v63 = vmul.f32 %v3631_v55, %v1631_v16  ;;  %v2487_v16 = vld [vmem:[%s5321_s20 + $0x68] sm:$0xff] }
 0xf98   :  { %v1636_v57 = vpop.permute.xlu0 %1635 }
 0xf99   :  { %v1638_v60 = vmul.f32 %v3631_v55, %v1636_v57 }
 0xf9b   :  { %1640 = vrot.lane.b32.xlu1 %v1638_v60, %s4022_s12  ;;  %v2488_v60 = vld [vmem:[%s5321_s20 + $0x70] sm:$0xff] }
0x100d   :  { %v1641_v0 = vpop.permute.xlu1 %1640 }
0x100e   :  { %v1643_v2 = vadd.f32 %v1641_v0, %v1633_v63  ;;  %v2486_v63 = vld [vmem:[%s5321_s20 + $0x60] sm:$0xff]  ;;  %v2485_v0 = vld [vmem:[%s5321_s20 + $0x58] sm:$0xff] }
0x1010   :  { %3632 = vtanh.f32 %v1643_v2 }
0x101d   :  { %v3633_v3 = vpop.eup %3632 }
0x101e   :  { %1646 = vrot.lane.b32.xlu0 %v3633_v3, %s4021_s14  ;;  %v2483_v3 = vld [vmem:[%s5321_s20 + $0x48] sm:$0xff] }
0x1090   :  { %v1647_v5 = vpop.permute.xlu0 %1646 }
0x1091   :  { %v4534_v6 = vmul.f32 %v3631_v55, %v1647_v5  ;;  %v2489_v55 = vld [vmem:[%s5321_s20 + $0x78] sm:$0xff]  ;;  %v2482_v5 = vld [vmem:[%s5321_s20 + $0x40] sm:$0xff] }
0x1093   :  { %v1656_v7 = vrot.slane %v4534_v6, 4 }
0x1095   :  { %1657 = vrot.lane.b32.xlu1 %v1656_v7, %s4022_s12  ;;  %v2481_v7 = vld [vmem:[%s5321_s20 + $0x38] sm:$0xff] }
0x1107   :  { %v1658_v10 = vpop.permute.xlu1 %1657 }
0x1108   :  { %3370 = vmatmul.mubr.msk.f32.vlgmr.msra.gmra.mxu0 %vm253_vm1, %v1658_v10  ;;  %v2480_v10 = vld [vmem:[%s5321_s20 + $0x30] sm:$0xff] }
0x1109   :  { %3384 = vmatpush3.msra.mxu0 %v4398_v56  ;;  %3391 = vmatprep.mubr.msk.f32.mxu0 %vm5327_vm0, %v4019_v1 }
0x110a   :  { %3385 = vmatprep.subr.mxu0 %v4019_v1 }
0x110b   :  { %3386 = vmatpush3.msra.mxu0 %v4406_v59 }
0x110c   :  { %3387 = vmatprep.subr.mxu0 %v4019_v1 }
0x110d   :  { %3388 = vmatpush3.msra.mxu0 %v4414_v61 }
0x110e   :  { %3389 = vmatprep.subr.mxu0 %v4019_v1 }
0x110f   :  { %3390 = vmatpush3.msra.mxu0 %v4422_v62  ;;  %v1743_v62 = vrot.slane %v1643_v2, 7  ;;  %v2484_v2 = vld [vmem:[%s5321_s20 + $0x50] sm:$0xff] }
0x1110   :  { %3466 = vmatprep.subr.mxu0 %v4019_v1 }
0x11c8   :  { %v1727_v11 = vpop.f32.mrf.mxu0 }
0x11c9   :  { %v1732_v12 = vrot.slane %v1727_v11, 3  ;;  %v2479_v11 = vld [vmem:[%s5321_s20 + $0x28] sm:$0xff] }
0x11ca   :  { %v3371_v56 = vpop.f32.mrf.mxu0 }
0x11cb   :  { %v1734_v14 = vadd.f32 %v1732_v12, %v4455_v15  ;;  %v2478_v12 = vld [vmem:[%s5321_s20 + $0x20] sm:$0xff]  ;;  %v2477_v56 = vld [vmem:[%s5321_s20 + $0x18] sm:$0xff] }
0x11cd   :  { %3634 = vtanh.f32 %v1734_v14  ;;  %v2986_v59 = vmul.f32 -1.442695, %v1734_v14  ;;  %v2476_v14 = vld [vmem:[%s5321_s20 + $0x10] sm:$0xff] }
0x11cf   :  { %3636 = vpow2.f32 %v2986_v59  ;;  %v2474_v59 = vld [vmem:[%s5321_s20] sm:$0xff] }
0x11da   :  { %v3635_v17 = vpop.eup %3634 }
0x11db   :  { %1747 = vrot.lane.b32.xlu0 %v3635_v17, %s4021_s14  ;;  %v2475_v17 = vld [vmem:[%s5321_s20 + $0x8] sm:$0xff] }
0x11dc   :  { %v3637_v18 = vpop.eup %3636 }
0x11dd   :  { %v1738_v19 = vadd.f32 1.0, %v3637_v18 }
0x11df   :  { %3638 = vrcp.f32 %v1738_v19 }
0x11ec   :  { %v3639_v61 = vpop.eup %3638 }
0x11ed   :  { %v1745_v23 = vmul.f32 %v3639_v61, %v1743_v62 }
0x124d   :  { %v1748_v21 = vpop.permute.xlu0 %1747 }
0x124e   :  { %v1750_v22 = vmul.f32 %v3639_v61, %v1748_v21 }
0x1250   :  { %1752 = vrot.lane.b32.xlu1 %v1750_v22, %s4022_s12 }
0x12c2   :  { %v1753_v24 = vpop.permute.xlu1 %1752 }
0x12c3   :  { %v1755_v25 = vadd.f32 %v1753_v24, %v1745_v23 }
0x12c5   :  { %3640 = vtanh.f32 %v1755_v25  ;;  %v1855_v47 = vrot.slane %v1755_v25, 7 }
0x12d2   :  { %v3641_v26 = vpop.eup %3640 }
0x12d3   :  { %1758 = vrot.lane.b32.xlu0 %v3641_v26, %s4021_s14 }
0x1345   :  { %v1759_v27 = vpop.permute.xlu0 %1758 }
0x1346   :  { %v4553_v28 = vmul.f32 %v3639_v61, %v1759_v27 }
0x1348   :  { %v1768_v29 = vrot.slane %v4553_v28, 5 }
0x134a   :  { %1769 = vrot.lane.b32.xlu1 %v1768_v29, %s4022_s12 }
0x13bc   :  { %v1770_v31 = vpop.permute.xlu1 %1769 }
0x13bd   :  { %3381 = vmatmul.mubr.msk.f32.vlgmr.msra.gmra.mxu1 %vm253_vm1, %v1770_v31 }
0x13be   :  { %3402 = vmatprep.mubr.msk.f32.mxu1 %vm5327_vm0, %v4019_v1 }
0x147d   :  { %v1839_v32 = vpop.f32.mrf.mxu1 }
0x147e   :  { %v1844_v33 = vrot.slane %v1839_v32, 2 }
0x147f   :  { %v3382_v34 = vpop.f32.mrf.mxu1 }
0x1480   :  { %v1846_v35 = vadd.f32 %v1844_v33, %v4455_v15 }
0x1482   :  { %3642 = vtanh.f32 %v1846_v35  ;;  %v2988_v13 = vmul.f32 -1.442695, %v1846_v35 }
0x1484   :  { %3644 = vpow2.f32 %v2988_v13  ;;  %v1994_v13 = vld [vmem:[%s5318_s17 + $0x8] sm:$0xff] }
0x148f   :  { %v3643_v37 = vpop.eup %3642 }
0x1490   :  { %1859 = vrot.lane.b32.xlu0 %v3643_v37, %s4021_s14 }
0x1491   :  { %v3645_v38 = vpop.eup %3644 }
0x1492   :  { %v1850_v40 = vadd.f32 1.0, %v3645_v38 }
0x1494   :  { %3646 = vrcp.f32 %v1850_v40 }
0x14a1   :  { %v3647_v41 = vpop.eup %3646 }
0x14a2   :  { %v1857_v48 = vmul.f32 %v3647_v41, %v1855_v47 }
0x1502   :  { %v1860_v43 = vpop.permute.xlu0 %1859 }
0x1503   :  { %v1862_v46 = vmul.f32 %v3647_v41, %v1860_v43 }
0x1505   :  { %1864 = vrot.lane.b32.xlu1 %v1862_v46, %s4022_s12 }
0x1577   :  { %v1865_v49 = vpop.permute.xlu1 %1864 }
0x1578   :  { %v4563_v50 = vadd.f32 %v1865_v49, %v1857_v48 }
0x157a   :  { %3648 = vtanh.f32 %v4563_v50 }
0x1587   :  { %v3649_v51 = vpop.eup %3648 }
0x1588   :  { %1870 = vrot.lane.b32.xlu0 %v3649_v51, %s4021_s14 }
0x15fa   :  { %v1871_v52 = vpop.permute.xlu0 %1870 }
0x15fb   :  { %v4567_v53 = vmul.f32 %v3647_v41, %v1871_v52  ;;  %v2991_v52 = vld [vmem:[#allocation22] ss:$0 sm:$0xff] }
0x15fd   :  { %v1880_v54 = vrot.slane %v4567_v53, 6 }
0x15ff   :  { %1881 = vrot.lane.b32.xlu1 %v1880_v54, %s4022_s12 }
0x1671   :  { %v1882_v57 = vpop.permute.xlu1 %1881 }
0x1672   :  { %3392 = vmatmul.mubr.msk.f32.vlgmr.msra.gmra.mxu0 %vm253_vm1, %v1882_v57 }
0x1673   :  { %3467 = vmatpush3.msra.mxu0 %v2489_v55  ;;  %3498 = vmatprep.mubr.msk.f32.mxu0 %vm5327_vm0, %v4019_v1 }
0x1674   :  { %3468 = vmatprep.subr.mxu0 %v4019_v1 }
0x1675   :  { %3469 = vmatpush3.msra.mxu0 %v2488_v60 }
0x1676   :  { %3470 = vmatprep.subr.mxu0 %v4019_v1 }
0x1677   :  { %3471 = vmatpush3.msra.mxu0 %v2487_v16 }
0x1678   :  { %3472 = vmatprep.subr.mxu0 %v4019_v1 }
0x1679   :  { %3473 = vmatpush3.msra.mxu0 %v2486_v63 }
0x167a   :  { %3474 = vmatprep.subr.mxu0 %v4019_v1 }
0x167b   :  { %3475 = vmatpush3.msra.mxu0 %v2485_v0 }
0x167c   :  { %3476 = vmatprep.subr.mxu0 %v4019_v1 }
0x167d   :  { %3477 = vmatpush3.msra.mxu0 %v2484_v2 }
0x167e   :  { %3478 = vmatprep.subr.mxu0 %v4019_v1 }
0x167f   :  { %3479 = vmatpush3.msra.mxu0 %v2483_v3  ;;  %v4682_v3 = vadd.s32 8, %v4237_v4 }
0x1680   :  { %3480 = vmatprep.subr.mxu0 %v4019_v1 }
0x1681   :  { %3481 = vmatpush3.msra.mxu0 %v2482_v5 }
0x1682   :  { %3482 = vmatprep.subr.mxu0 %v4019_v1 }
0x1683   :  { %3483 = vmatpush3.msra.mxu0 %v2481_v7  ;;  %v4685_v7 = vadd.s32 16, %v4237_v4 }
0x1684   :  { %3484 = vmatprep.subr.mxu0 %v4019_v1 }
0x1685   :  { %3485 = vmatpush3.msra.mxu0 %v2480_v10  ;;  %v2092_v10 = vand.u32 127, %v643_v58 }
0x1686   :  { %3486 = vmatprep.subr.mxu0 %v4019_v1 }
0x1687   :  { %3487 = vmatpush3.msra.mxu0 %v2479_v11  ;;  %vm2093_vm14 = vcmp.le.s32.totalorder %v4237_v4, %v2092_v10  ;;  %vm2102_vm15 = vcmp.lt.s32.totalorder %v4237_v4, %v2092_v10 }
0x1688   :  { %3488 = vmatprep.subr.mxu0 %v4019_v1 }
0x1689   :  { %3489 = vmatpush3.msra.mxu0 %v2478_v12 }
0x168a   :  { %3490 = vmatprep.subr.mxu0 %v4019_v1 }
0x168b   :  { %3491 = vmatpush3.msra.mxu0 %v2477_v56  ;;  %v2994_v56 = vadd.s32 4294967295, %v4237_v4 }
0x168c   :  { %3492 = vmatprep.subr.mxu0 %v4019_v1 }
0x168d   :  { %3493 = vmatpush3.msra.mxu0 %v2476_v14 }
0x168e   :  { %3494 = vmatprep.subr.mxu0 %v4019_v1 }
0x168f   :  { %3495 = vmatpush3.msra.mxu0 %v2475_v17  ;;  %v4690_v17 = vadd.s32 4294967295, %v4682_v3 }
0x1690   :  { %3496 = vmatprep.subr.mxu0 %v4019_v1 }
0x1691   :  { %3497 = vmatpush3.msra.mxu0 %v2474_v59  ;;  %v4693_v59 = vadd.s32 24, %v4237_v4 }
0x1692   :  { %3499 = vmatmul.mubr.f32.vlgmr.msra.gmra.mxu0 %v4364_v45 }
0x1732   :  { %v1951_v18 = vpop.f32.mrf.mxu0 }
0x1733   :  { %v1956_v19 = vrot.slane %v1951_v18, 1  ;;  %v4696_v18 = vadd.s32 4294967295, %v4685_v7 }
0x1734   :  { %v3393_v61 = vpop.f32.mrf.mxu0 }
0x1735   :  { %v1958_v21 = vadd.f32 %v1956_v19, %v4455_v15  ;;  %v1967_v15 = vrot.slane %v4563_v50, 7  ;;  %v4701_v19 = vadd.s32 32, %v4237_v4 }
0x1737   :  { %3650 = vtanh.f32 %v1958_v21  ;;  %v2990_v24 = vmul.f32 -1.442695, %v1958_v21  ;;  %v3010_v21 = vcvt.s32.f32 %v2994_v56 }
0x1739   :  { %3652 = vpow2.f32 %v2990_v24  ;;  %v2831_v24 = vcvt.s32.f32 %v4685_v7 }
0x1744   :  { %v3651_v22 = vpop.eup %3650 }
0x1745   :  { %1971 = vrot.lane.b32.xlu0 %v3651_v22, %s4021_s14  ;;  %v2830_v22 = vcvt.s32.f32 %v4682_v3  ;;  %v2660_v3 = vld [vmem:[%s5320_s19 + $0x60] sm:$0xff] }
0x1746   :  { %v3653_v25 = vpop.eup %3652 }
0x1747   :  { %v1962_v26 = vadd.f32 1.0, %v3653_v25  ;;  %v4707_v25 = vadd.s32 4294967295, %v4693_v59 }
0x1749   :  { %3654 = vrcp.f32 %v1962_v26  ;;  %v2121_v26 = vadd.s32 40, %v4237_v4 }
0x1752   :  { %v4640_v62 = vpop.f32.mrf.mxu0 }
0x1754   :  { %v3500_v23 = vpop.f32.mrf.mxu0 }
0x1755   :  { %v2181_v23 = vcvt.s32.f32 %v4690_v17  ;;  %v2661_v17 = vld [vmem:[%s5320_s19 + $0x68] sm:$0xff] }
0x1756   :  { %v3655_v27 = vpop.eup %3654 }
0x1757   :  { %v1969_v31 = vmul.f32 %v3655_v27, %v1967_v15  ;;  %v2182_v15 = vcvt.s32.f32 %v4696_v18 }
0x17b7   :  { %v1972_v29 = vpop.permute.xlu0 %1971 }
0x17b8   :  { %v1974_v45 = vmul.f32 %v3655_v27, %v1972_v29 }
0x17ba   :  { %1976 = vrot.lane.b32.xlu1 %v1974_v45, %s4022_s12 }
0x17be   :  { %1315 = vrot.lane.b32.xlu1 %v4477_v36, %s4022_s12 }
0x17c2   :  { %1539 = vrot.lane.b32.xlu1 %v4515_v42, %s4022_s12  ;;  %v1996_v42 = vld [vmem:[%s5318_s17 + $0x18] sm:$0xff] }
0x17c3   :  { %3395 = vmatpush3.msra.mxu1 %v1996_v42  ;;  %v2123_v42 = vadd.s32 56, %v4237_v4 }
0x17c4   :  { %3396 = vmatprep.subr.mxu1 %v4019_v1 }
0x17c6   :  { %1763 = vrot.lane.b32.xlu1 %v4553_v28, %s4022_s12  ;;  %v1995_v28 = vld [vmem:[%s5318_s17 + $0x10] sm:$0xff] }
0x17c7   :  { %3397 = vmatpush3.msra.mxu1 %v1995_v28 }
0x17c8   :  { %3398 = vmatprep.subr.mxu1 %v4019_v1 }
0x17c9   :  { %3399 = vmatpush3.msra.mxu1 %v1994_v13  ;;  %v2183_v13 = vcvt.s32.f32 %v4707_v25 }
0x17ca   :  { %3400 = vmatprep.subr.mxu1 %v4019_v1 }
0x182c   :  { %v1977_v32 = vpop.permute.xlu1 %1976 }
0x182d   :  { %v1979_v33 = vadd.f32 %v1977_v32, %v1969_v31 }
0x182f   :  { %3656 = vtanh.f32 %v1979_v33  ;;  %v4714_v33 = vadd.s32 4294967295, %v4701_v19 }
0x1830   :  { %v1316_v34 = vpop.permute.xlu1 %1315 }
0x1831   :  { %1319 = vst.msk [vmem:[#allocation2] sm:$0x2] %vm1318_vm5, %v1316_v34  ;;  %v2122_v34 = vadd.s32 48, %v4237_v4 }
0x1834   :  { %v1540_v35 = vpop.permute.xlu1 %1539 }
0x1835   :  { %1543 = vst.msk [vmem:[#allocation2] sm:$0x8] %vm1542_vm6, %v1540_v35 }
0x1838   :  { %v1764_v36 = vpop.permute.xlu1 %1763 }
0x1839   :  { %1767 = vst.msk [vmem:[#allocation2] sm:$0x20] %vm1766_vm7, %v1764_v36 }
0x183c   :  { %v3657_v37 = vpop.eup %3656 }
0x183d   :  { %1982 = vrot.lane.b32.xlu0 %v3657_v37, %s4021_s14 }
0x1841   :  { %1427 = vrot.lane.b32.xlu0 %v4496_v20, %s4022_s12  ;;  %v1993_v20 = vld [vmem:[%s5318_s17] sm:$0xff] }
0x1842   :  { %3401 = vmatpush3.msra.mxu1 %v1993_v20  ;;  %v2832_v20 = vcvt.s32.f32 %v4693_v59  ;;  %v4753_v59 = vadd.s32 96, %v4237_v4 }
0x1845   :  { %1651 = vrot.lane.b32.xlu0 %v4534_v6, %s4022_s12  ;;  %v2967_v6 = vld [vmem:[#allocation8] ss:$0 sm:$0xff] }
0x1846   :  { %v324_v40 = vadd.f32 %v2967_v6, %v4285_v39  ;;  %v4721_v6 = vadd.s32 4294967295, %v2121_v26 }
0x1848   :  { %v327_v46 = vmax.f32 %v324_v40, 0.0 }
0x1849   :  { %1875 = vrot.lane.b32.xlu0 %v4567_v53, %s4022_s12 }
0x18af   :  { %v1983_v38 = vpop.permute.xlu0 %1982 }
0x18b0   :  { %v1985_v41 = vmul.f32 %v3655_v27, %v1983_v38 }
0x18b2   :  { %1987 = vrot.lane.b32.xlu1 %v1985_v41, %s4022_s12 }
0x18b3   :  { %v1428_v43 = vpop.permute.xlu0 %1427 }
0x18b4   :  { %1431 = vst.msk [vmem:[#allocation2] sm:$0x4] %vm1430_vm8, %v1428_v43  ;;  %v4724_v43 = vadd.s32 64, %v4237_v4 }
0x18b6   :  { %2277 = vrot.lane.b32.xlu1 %v327_v46, %s4021_s14  ;;  %v2184_v46 = vcvt.s32.f32 %v4714_v33  ;;  %v4833_v33 = vadd.s32 104, %v4237_v4 }
0x18b7   :  { %v1652_v47 = vpop.permute.xlu0 %1651 }
0x18b8   :  { %1655 = vst.msk [vmem:[#allocation2] sm:$0x10] %vm1654_vm9, %v1652_v47  ;;  %v2833_v47 = vcvt.s32.f32 %v4701_v19 }
0x18bb   :  { %v1876_v48 = vpop.permute.xlu0 %1875 }
0x18bc   :  { %1879 = vst.msk [vmem:[#allocation2] sm:$0x40] %vm1878_vm10, %v1876_v48  ;;  %v4728_v48 = vadd.s32 4294967295, %v2122_v34 }
0x1924   :  { %v1988_v49 = vpop.permute.xlu1 %1987 }
0x1925   :  { %1991 = vst.msk [vmem:[#allocation2] sm:$0x80] %vm1990_vm11, %v1988_v49  ;;  %v4731_v49 = vadd.s32 72, %v4237_v4 }
0x1928   :  { %v2278_v50 = vpop.permute.xlu1 %2277 }
0x1929   :  { %v2280_v39 = vsel %vm1029_vm3, %v1013_v9, %v2278_v50 }
0x192a   :  { %3405 = vmatprep.subr.mxu1 %v2280_v39 }
0x192c   :  { %v1992_v51 = vld [vmem:[#allocation2] sm:$0xff] }
0x192d   :  { %3403 = vmatmul.mubr.msk.f32.vlgmr.msra.gmra.mxu1 %vm253_vm1, %v1992_v51  ;;  %vm2148_vm1 = vcmp.gt.s32.totalorder %v2994_v56, 0  ;;  %v2126_v56 = vadd.s32 80, %v4237_v4 }
0x192e   :  { %3406 = vmatpush3.msra.mxu1 %v2280_v39  ;;  %v3011_v28 = vsel %vm2148_vm1, %v3010_v21, 0.0 }
0x192f   :  { %3431 = vmatprep.subr.mxu1 %v4019_v1 }
0x19ed   :  { %v2073_v53 = vpop.f32.mrf.mxu1 }
0x19ee   :  { %v2074_v54 = vadd.f32 %v2991_v52, %v2073_v53  ;;  %v4733_v52 = vadd.s32 4294967295, %v2123_v42  ;;  %v2185_v53 = vcvt.s32.f32 %v4721_v6  ;;  %v4858_v6 = vadd.s32 120, %v4237_v4 }
0x19ef   :  { %v3404_v55 = vpop.f32.mrf.mxu1 }
0x19f0   :  { %v2993_v57 = vmul.f32 -1.442695, %v2074_v54  ;;  %v2834_v54 = vcvt.s32.f32 %v2121_v26  ;;  %v2835_v55 = vcvt.s32.f32 %v2122_v34  ;;  %v5357_v26 = vmov 0 }
0x19f2   :  { %3658 = vpow2.f32 %v2993_v57  ;;  %v2836_v57 = vcvt.s32.f32 %v2123_v42 }
0x19ff   :  { %v3659_v60 = vpop.eup %3658 }
0x1a00   :  { %v2080_v16 = vadd.f32 1.0, %v3659_v60 }
0x1a02   :  { %3660 = vrcp.f32 %v2080_v16 }
0x1a0f   :  { %v3661_v8 = vpop.eup %3660 }
0x1a10   :  { %v2084_v9 = vsel %vm5328_vm12, %v3661_v8, 0.0 }
0x1a11   :  { %2085 = vadd.xlane.f32.xlu0 %v2084_v9  ;;  %v4737_v9 = vadd.s32 4294967295, %v4724_v43 }
0x1a9a   :  { %v2086_v63 = vpop.xlane.xlu0 %2085 }
0x1a9b   :  { %v3559_v0 = vcvt.f32.s32 %v2086_v63  ;;  %v3557_v5 = vand.u32 2147483647, %v2086_v63  ;;  %v3562_v12 = vand.u32 2147483648, %v2086_v63 }
0x1a9d   :  { %v3560_v2 = vcvt.s32.f32 %v3559_v0  ;;  %vm3558_vm13 = vcmp.lt.f32.partialorder %v3557_v5, 8388608.0  ;;  %v2837_v0 = vcvt.s32.f32 %v4724_v43  ;;  %v2841_v43 = vcvt.s32.f32 %v4753_v59 }
0x1a9f   :  { %v3561_v11 = vand.u32 2147483647, %v3560_v2  ;;  %v4742_v2 = vadd.s32 4294967295, %v4731_v49 }
0x1aa1   :  { %v3563_v14 = vor.u32 %v3562_v12, %v3561_v11  ;;  %v2187_v11 = vcvt.s32.f32 %v4733_v52  ;;  %v2838_v12 = vcvt.s32.f32 %v4731_v49  ;;  %v5384_v49 = vmov 0 }
0x1aa3   :  { %v3564_v58 = vsel %vm3558_vm13, %v3563_v14, %v2086_v63  ;;  %v2186_v63 = vcvt.s32.f32 %v4728_v48  ;;  %v4750_v14 = vadd.s32 88, %v4237_v4  ;;  %v2496_v48 = vld [vmem:[%s5322_s21 + $0x30] sm:$0xff] }
0x1aa4   :  { %v2088_v61 = vmax.f32 %v3564_v58, 1.0 }
0x1aa6   :  { %v2094_v27 = vsel %vm2093_vm14, %v2088_v61, 0.0  ;;  %v2103_v29 = vsel %vm2102_vm15, %v2088_v61, 0.0  ;;  %v2111_v45 = vrot.slane %v2088_v61, 4 }
0x1aa7   :  { %v2095_v31 = vsel %vm5328_vm12, %v2094_v27, 0.0  ;;  %v2104_v32 = vsel %vm5328_vm12, %v2103_v29, 0.0  ;;  %v2500_v27 = vld [vmem:[%s5322_s21 + $0x50] sm:$0xff]  ;;  %v5410_v29 = vmov 0 }
0x1aa8   :  { %v2096_v35 = vrot.slane %v2095_v31, 4  ;;  %v2105_v36 = vrot.slane %v2104_v32, 4  ;;  %v2112_v37 = vadd.f32 %v2111_v45, %v2088_v61 }
0x1aaa   :  { %v2097_v38 = vadd.f32 %v2096_v35, %v2095_v31  ;;  %v2106_v40 = vadd.f32 %v2105_v36, %v2104_v32  ;;  %v2113_v41 = vrot.slane %v2112_v37, 2  ;;  %v2188_v35 = vcvt.s32.f32 %v4737_v9  ;;  %v2494_v9 = vld [vmem:[%s5322_s21 + $0x20] sm:$0xff]  ;;  %v2654_v31 = vld [vmem:[%s5320_s19 + $0x30] sm:$0xff]  ;;  %v2653_v32 = vld [vmem:[%s5320_s19 + $0x28] sm:$0xff] }
0x1aab   :  { %v2839_v36 = vcvt.s32.f32 %v2126_v56 }
0x1aac   :  { %v2098_v50 = vrot.slane %v2097_v38, 2  ;;  %v2107_v39 = vrot.slane %v2106_v40, 2  ;;  %v2114_v51 = vadd.f32 %v2113_v41, %v2112_v37  ;;  %v4843_v37 = vadd.s32 112, %v4237_v4 }
0x1aad   :  { %v5378_v41 = vmov 0 }
0x1aae   :  { %v2099_v60 = vadd.f32 %v2098_v50, %v2097_v38  ;;  %v2108_v16 = vadd.f32 %v2107_v39, %v2106_v40  ;;  %v2115_v8 = vrot.slane %v2114_v51, 1  ;;  %v2842_v50 = vcvt.s32.f32 %v4833_v33  ;;  %v2497_v38 = vld [vmem:[%s5322_s21 + $0x38] sm:$0xff] }
0x1ab0   :  { %v2100_v5 = vrot.slane %v2099_v60, 1  ;;  %v2109_v7 = vrot.slane %v2108_v16, 1  ;;  %v4744_v10 = vadd.f32 %v2115_v8, %v2114_v51  ;;  %v2189_v51 = vcvt.s32.f32 %v4742_v2 }
0x1ab1   :  { %v2844_v8 = vcvt.s32.f32 %v4858_v6  ;;  %v5397_v2 = vmov 0 }
0x1ab2   :  { %v4755_v18 = vadd.f32 %v2100_v5, %v2099_v60  ;;  %v4757_v58 = vadd.f32 %v2109_v7, %v2108_v16  ;;  %vm4760_vm3 = vcmp.lt.f32.partialorder %v2831_v24, %v4744_v10  ;;  %vm4765_vm4 = vcmp.lt.f32.partialorder %v2832_v20, %v4744_v10  ;;  %2926 = vst.msk [vmem:[#allocation26] sm:$0x1] %vm2925_vm2, %v4744_v10  ;;  %v2501_v5 = vld [vmem:[%s5322_s21 + $0x58] sm:$0xff]  ;;  %v2491_v7 = vld [vmem:[%s5322_s21 + $0x8] sm:$0xff] }
0x1ab3   :  { %vm4771_vm5 = vcmp.lt.f32.partialorder %v2833_v47, %v4744_v10  ;;  %vm4776_vm6 = vcmp.lt.f32.partialorder %v2834_v54, %v4744_v10  ;;  %vm4781_vm7 = vcmp.lt.f32.partialorder %v2835_v55, %v4744_v10  ;;  %v5355_v24 = vmov 0 }
0x1ab4   :  { %v5356_v24 = vsel %vm4781_vm7, 4294967295, %v5355_v24  ;;  %vm4786_vm8 = vcmp.lt.f32.partialorder %v2836_v57, %v4744_v10  ;;  %vm2196_vm9 = vcmp.ge.f32.partialorder %v3011_v28, %v4757_v58  ;;  %vm2212_vm10 = vcmp.lt.f32.partialorder %v3011_v28, %v4755_v18  ;;  %v2504_v28 = vld [vmem:[%s5322_s21 + $0x70] sm:$0xff]  ;;  %v2502_v57 = vld [vmem:[%s5322_s21 + $0x60] sm:$0xff] }
0x1ab5   :  { %v5358_v26 = vsel %vm4786_vm8, 4294967295, %v5357_v26  ;;  %vm2197_vm11 = vcmp.ge.f32.partialorder %v2181_v23, %v4757_v58  ;;  %vm2213_vm13 = vcmp.lt.f32.partialorder %v2181_v23, %v4755_v18  ;;  %vm2228_vm14 = vmand %vm2196_vm9, %vm2212_vm10  ;;  %vm4799_vm15 = vcmp.ge.f32.partialorder %v2182_v15, %v4757_v58 }
0x1ab6   :  { %vm4804_vm1 = vcmp.lt.f32.partialorder %v2182_v15, %v4755_v18  ;;  %vm4809_vm2 = vcmp.ge.f32.partialorder %v2183_v13, %v4757_v58  ;;  %vm4814_vm0 = vcmp.lt.f32.partialorder %v2183_v13, %v4755_v18  ;;  %v3012_v23 = vsel %vm2228_vm14, 1.0, %v4019_v1  ;;  %vm2229_vm9 = vmand %vm2197_vm11, %vm2213_vm13  ;;  %v2505_v15 = vld [vmem:[%s5322_s21 + $0x78] sm:$0xff] }
0x1ab7   :  { %vm4823_vm10 = vcmp.ge.f32.partialorder %v2184_v46, %v4757_v58  ;;  %vm4828_vm12 = vcmp.lt.f32.partialorder %v2184_v46, %v4755_v18  ;;  %vm5371_vm7 = vcmask 64512   ;;  %v3013_v34 = vsel %vm2229_vm9, 1.0, %v4019_v1  ;;  %vm2230_vm11 = vmand %vm4799_vm15, %vm4804_vm1  ;;  %v2503_v46 = vld [vmem:[%s5322_s21 + $0x68] sm:$0xff] }
0x1ab8   :  { %3407 = vmatprep.mubr.msk.f32.mxu1 %vm5371_vm7, %v3012_v23  ;;  %vm5372_vm13 = vmmov %vm5371_vm7  ;;  %v3014_v42 = vsel %vm2230_vm11, 1.0, %v4019_v1  ;;  %v4854_v13 = vadd.s32 4294967295, %v2126_v56  ;;  %v2840_v20 = vcvt.s32.f32 %v4750_v14  ;;  %vm4866_vm1 = vcmp.ge.f32.partialorder %v2185_v53, %v4757_v58 }
0x1ab9   :  { %3408 = vmatmul.mubr.msk.f32.vlgmr.msra.gmra.mxu1 %vm5372_vm13, %v3013_v34  ;;  %vm2231_vm7 = vmand %vm4809_vm2, %vm4814_vm0  ;;  %vm4871_vm9 = vcmp.lt.f32.partialorder %v2185_v53, %v4755_v18  ;;  %vm4876_vm11 = vcmp.lt.f32.partialorder %v2837_v0, %v4744_v10  ;;  %vm4896_vm15 = vcmp.lt.f32.partialorder %v2838_v12, %v4744_v10  ;;  %v5386_v53 = vmov 0 }
0x1aba   :  { %vm5373_vm14 = vmmov %vm5372_vm13  ;;  %3432 = vmatpush3.msra.mxu1 %v2505_v15  ;;  %v5379_v41 = vsel %vm4876_vm11, 4294967295, %v5378_v41  ;;  %vm4886_vm13 = vcmp.ge.f32.partialorder %v2186_v63, %v4757_v58  ;;  %v5385_v49 = vsel %vm4896_vm15, 4294967295, %v5384_v49  ;;  %v3015_v39 = vsel %vm2231_vm7, 1.0, %v4019_v1  ;;  %v2499_v15 = vld [vmem:[%s5322_s21 + $0x48] sm:$0xff] }
0x1abb   :  { %3410 = vmatprep.mubr.msk.f32.mxu1 %vm5373_vm14, %v3014_v42  ;;  %3433 = vmatprep.subr.mxu1 %v4019_v1  ;;  %vm4891_vm14 = vcmp.lt.f32.partialorder %v2186_v63, %v4755_v18  ;;  %vm4909_vm11 = vcmp.lt.f32.partialorder %v2839_v36, %v4744_v10  ;;  %v2843_v54 = vcvt.s32.f32 %v4843_v37  ;;  %vm5388_vm15 = vcmask 64512   ;;  %vm5389_vm0 = vmand %vm4823_vm10, %vm4828_vm12  ;;  %v2498_v42 = vld [vmem:[%s5322_s21 + $0x40] sm:$0xff] }
0x1abc   :  { %3434 = vmatpush3.msra.mxu1 %v2504_v28  ;;  %v5387_v53 = vsel %vm4909_vm11, 4294967295, %v5386_v53  ;;  %v3016_v55 = vsel %vm5389_vm0, 1.0, %v4019_v1  ;;  %v3005_v60 = vadd.s32 4294967295, %v4750_v14  ;;  %vm4931_vm7 = vcmp.lt.f32.partialorder %v2840_v20, %v4744_v10  ;;  %vm5392_vm12 = vmmov %vm5388_vm15 }
0x1abd   :  { %3411 = vmatmul.mubr.msk.f32.gmra.mxu1 %vm5388_vm15, %v3015_v39  ;;  %3435 = vmatprep.subr.mxu1 %v4019_v1  ;;  %v5390_v16 = vmov 0  ;;  %vm4944_vm15 = vcmp.ge.f32.partialorder %v2187_v11, %v4757_v58  ;;  %vm4951_vm0 = vcmp.lt.f32.partialorder %v2187_v11, %v4755_v18  ;;  %v3006_v0 = vadd.s32 4294967295, %v4753_v59  ;;  %vm5405_vm11 = vmand %vm4866_vm1, %vm4871_vm9 }
0x1abe   :  { %v5391_v16 = vsel %vm4931_vm7, 4294967295, %v5390_v16  ;;  %3413 = vmatprep.mubr.msk.f32.mxu1 %vm5392_vm12, %v3016_v55  ;;  %3436 = vmatpush3.msra.mxu1 %v2503_v46  ;;  %vm4957_vm12 = vcmp.lt.f32.partialorder %v2841_v43, %v4744_v10  ;;  %vm4966_vm10 = vcmp.ge.f32.partialorder %v2188_v35, %v4757_v58  ;;  %vm4971_vm2 = vcmp.lt.f32.partialorder %v2188_v35, %v4755_v18  ;;  %vm2235_vm1 = vmand %vm4944_vm15, %vm4951_vm0 }
0x1abf   :  { %v5398_v2 = vsel %vm4957_vm12, 4294967295, %v5397_v2  ;;  %3437 = vmatprep.subr.mxu1 %v4019_v1  ;;  %v2190_v11 = vcvt.s32.f32 %v4854_v13  ;;  %vm4977_vm12 = vcmp.lt.f32.partialorder %v2842_v50, %v4744_v10  ;;  %v5403_v12 = vmov 0 }
0x1ac0   :  { %v5404_v12 = vsel %vm4977_vm12, 4294967295, %v5403_v12  ;;  %3438 = vmatpush3.msra.mxu1 %v2502_v57  ;;  %v3017_v56 = vsel %vm5405_vm11, 1.0, %v4019_v1  ;;  %vm4988_vm7 = vcmp.lt.f32.partialorder %v2843_v54, %v4744_v10  ;;  %v5406_v14 = vmov 0  ;;  %vm5409_vm12 = vmand %vm4886_vm13, %vm4891_vm14  ;;  %v2495_v54 = vld [vmem:[%s5322_s21 + $0x28] sm:$0xff] }
0x1ac1   :  { %v5407_v14 = vsel %vm4988_vm7, 4294967295, %v5406_v14  ;;  %vm5408_vm8 = vcmask 64512   ;;  %3439 = vmatprep.subr.mxu1 %v4019_v1  ;;  %v3018_v59 = vsel %vm5409_vm12, 1.0, %v4019_v1  ;;  %vm5015_vm9 = vcmp.lt.f32.partialorder %v2830_v22, %v4744_v10  ;;  %vm2236_vm13 = vmand %vm4966_vm10, %vm4971_vm2 }
0x1ac2   :  { %3414 = vmatmul.mubr.msk.f32.gmra.mxu1 %vm5408_vm8, %v3017_v56  ;;  %vm5008_vm8 = vcmp.lt.f32.partialorder %v2844_v8, %v4744_v10  ;;  %vm5414_vm11 = vcmask 64512   ;;  %vm5025_vm14 = vcmp.ge.f32.partialorder %v2189_v51, %v4757_v58  ;;  %vm5030_vm12 = vcmp.lt.f32.partialorder %v2189_v51, %v4755_v18  ;;  %v2490_v56 = vld [vmem:[%s5322_s21] sm:$0xff] }
0x1ac3   :  { %v5411_v29 = vsel %vm5008_vm8, 4294967295, %v5410_v29  ;;  %3416 = vmatprep.mubr.msk.f32.mxu1 %vm5414_vm11, %v3018_v59  ;;  %3440 = vmatpush3.msra.mxu1 %v2501_v5  ;;  %v2191_v22 = vcvt.s32.f32 %v3005_v60  ;;  %v3007_v23 = vadd.s32 4294967295, %v4833_v33  ;;  %vm5040_vm2 = vcmp.ge.f32.partialorder %v2190_v11, %v4757_v58  ;;  %vm2237_vm7 = vmand %vm5025_vm14, %vm5030_vm12  ;;  %v2493_v5 = vld [vmem:[%s5322_s21 + $0x18] sm:$0xff] }
0x1ac4   :  { %3441 = vmatprep.subr.mxu1 %v4019_v1  ;;  %vm5045_vm10 = vcmp.lt.f32.partialorder %v2190_v11, %v4755_v18  ;;  %v2192_v34 = vcvt.s32.f32 %v3006_v0  ;;  %v3008_v35 = vadd.s32 4294967295, %v4843_v37  ;;  %v3019_v33 = vsel %vm2235_vm1, 1.0, %v4019_v1  ;;  %vm5423_vm8 = vmmov %vm5414_vm11  ;;  %v2663_v59 = vld [vmem:[%s5320_s19 + $0x78] sm:$0xff] }
0x1ac5   :  { %3442 = vmatpush3.msra.mxu1 %v2500_v27  ;;  %v3020_v36 = vsel %vm2236_vm13, 1.0, %v4019_v1  ;;  %vm2238_vm15 = vmand %vm5040_vm2, %vm5045_vm10  ;;  %vm5072_vm0 = vcmp.ge.f32.partialorder %v2191_v22, %v4757_v58  ;;  %vm5077_vm1 = vcmp.lt.f32.partialorder %v2191_v22, %v4755_v18  ;;  %v2193_v13 = vcvt.s32.f32 %v3007_v23  ;;  %v2662_v27 = vld [vmem:[%s5320_s19 + $0x70] sm:$0xff]  ;;  %v2657_v22 = vld [vmem:[%s5320_s19 + $0x48] sm:$0xff] }
0x1ac6   :  { %3417 = vmatmul.mubr.msk.f32.gmra.mxu1 %vm5414_vm11, %v3019_v33  ;;  %3443 = vmatprep.subr.mxu1 %v4019_v1  ;;  %v3009_v20 = vadd.s32 4294967295, %v4858_v6  ;;  %vm5092_vm13 = vcmp.lt.f32.partialorder %v2192_v34, %v4755_v18  ;;  %v2194_v46 = vcvt.s32.f32 %v3008_v35  ;;  %v3021_v6 = vsel %vm2237_vm7, 1.0, %v4019_v1  ;;  %vm5432_vm14 = vmmov %vm5414_vm11  ;;  %v2656_v23 = vld [vmem:[%s5320_s19 + $0x40] sm:$0xff]  ;;  %v2651_v35 = vld [vmem:[%s5320_s19 + $0x18] sm:$0xff] }
0x1ac7   :  { %3419 = vmatprep.mubr.msk.f32.mxu1 %vm5423_vm8, %v3020_v36  ;;  %3444 = vmatpush3.msra.mxu1 %v2499_v15  ;;  %vm5087_vm8 = vcmp.ge.f32.partialorder %v2192_v34, %v4757_v58  ;;  %v3022_v47 = vsel %vm2238_vm15, 1.0, %v4019_v1  ;;  %vm2239_vm12 = vmand %vm5072_vm0, %vm5077_vm1  ;;  %vm5113_vm10 = vcmp.ge.f32.partialorder %v2193_v13, %v4757_v58  ;;  %v2655_v15 = vld [vmem:[%s5320_s19 + $0x38] sm:$0xff]  ;;  %v2652_v34 = vld [vmem:[%s5320_s19 + $0x20] sm:$0xff] }
0x1ac8   :  { %3445 = vmatprep.subr.mxu1 %v4019_v1  ;;  %vm5433_vm2 = vmmov %vm5414_vm11  ;;  %vm5118_vm11 = vcmp.lt.f32.partialorder %v2193_v13, %v4755_v18  ;;  %v2195_v51 = vcvt.s32.f32 %v3009_v20  ;;  %vm5127_vm15 = vcmp.ge.f32.partialorder %v2194_v46, %v4757_v58  ;;  %vm5132_vm0 = vcmp.lt.f32.partialorder %v2194_v46, %v4755_v18  ;;  %v2650_v33 = vld [vmem:[%s5320_s19 + $0x10] sm:$0xff]  ;;  %v2649_v36 = vld [vmem:[%s5320_s19 + $0x8] sm:$0xff] }
0x1ac9   :  { %3446 = vmatpush3.msra.mxu1 %v2498_v42  ;;  %vm2240_vm7 = vmand %vm5087_vm8, %vm5092_vm13  ;;  %v3023_v60 = vsel %vm2239_vm12, 1.0, %v4019_v1  ;;  %v2648_v42 = vld [vmem:[%s5320_s19] sm:$0xff] }
0x1aca   :  { %3420 = vmatmul.mubr.msk.f32.gmra.mxu1 %vm5432_vm14, %v3021_v6  ;;  %3447 = vmatprep.subr.mxu1 %v4019_v1  ;;  %vm5442_vm1 = vmmov %vm5433_vm2  ;;  %v3024_v8 = vsel %vm2240_vm7, 1.0, %v4019_v1  ;;  %vm5153_vm12 = vcmp.ge.f32.partialorder %v2195_v51, %v4757_v58 }
0x1acb   :  { %3422 = vmatprep.mubr.msk.f32.mxu1 %vm5433_vm2, %v3022_v47  ;;  %3448 = vmatpush3.msra.mxu1 %v2497_v38  ;;  %vm2241_vm8 = vmand %vm5113_vm10, %vm5118_vm11  ;;  %vm5158_vm2 = vcmp.lt.f32.partialorder %v2195_v51, %v4755_v18  ;;  %v2492_v18 = vld [vmem:[%s5322_s21 + $0x10] sm:$0xff] }
0x1acc   :  { %3449 = vmatprep.subr.mxu1 %v4019_v1  ;;  %vm5443_vm13 = vmmov %vm5442_vm1  ;;  %v3025_v52 = vsel %vm2241_vm8, 1.0, %v4019_v1 }
0x1acd   :  { %3450 = vmatpush3.msra.mxu1 %v2496_v48  ;;  %vm2242_vm14 = vmand %vm5127_vm15, %vm5132_vm0  ;;  %vm5451_vm0 = vmmov 0  }
0x1ace   :  { %3423 = vmatmul.mubr.msk.f32.gmra.mxu1 %vm5442_vm1, %v3023_v60  ;;  %3451 = vmatprep.subr.mxu1 %v4019_v1  ;;  %vm5448_vm7 = vmmov %vm5442_vm1  ;;  %v3026_v58 = vsel %vm2242_vm14, 1.0, %v4019_v1 }
0x1acf   :  { %3425 = vmatprep.mubr.msk.f32.mxu1 %vm5443_vm13, %v3024_v8  ;;  %3452 = vmatpush3.msra.mxu1 %v2495_v54  ;;  %vm2243_vm10 = vmand %vm5153_vm12, %vm5158_vm2 }
0x1ad0   :  { %3453 = vmatprep.subr.mxu1 %v4019_v1  ;;  %vm5449_vm11 = vmmov %vm5442_vm1  ;;  %v3027_v11 = vsel %vm2243_vm10, 1.0, %v4019_v1 }
0x1ad1   :  { %3454 = vmatpush3.msra.mxu1 %v2494_v9  ;;  %vm5450_vm15 = vmmov %vm5442_vm1 }
0x1ad2   :  { %3426 = vmatmul.mubr.msk.f32.gmra.mxu1 %vm5448_vm7, %v3025_v52  ;;  %3455 = vmatprep.subr.mxu1 %v4019_v1 }
0x1ad3   :  { %3428 = vmatprep.mubr.msk.f32.mxu1 %vm5449_vm11, %v3026_v58  ;;  %3456 = vmatpush3.msra.mxu1 %v2493_v5 }
0x1ad4   :  { %3457 = vmatprep.subr.mxu1 %v4019_v1 }
0x1ad5   :  { %3458 = vmatpush3.msra.mxu1 %v2492_v18 }
0x1ad6   :  { %3429 = vmatmul.mubr.msk.f32.gmra.mxu1 %vm5450_vm15, %v3027_v11  ;;  %3459 = vmatprep.subr.mxu1 %v4019_v1 }
0x1ad7   :  { %3460 = vmatpush3.msra.mxu1 %v2491_v7  ;;  %3463 = vmatprep.mubr.msk.f32.mxu1 %vm5451_vm0, %v4019_v1 }
0x1ad8   :  { %3461 = vmatprep.subr.mxu1 %v4019_v1  ;;  %v2659_v1 = vld [vmem:[%s5320_s19 + $0x58] sm:$0xff] }
0x1ad9   :  { %3462 = vmatpush3.msra.mxu1 %v2490_v56 }
0x1ada   :  { %3464 = vmatmul.mubr.f32.vlgmr.msra.gmra.mxu1 %v4362_v44  ;;  %3501 = vmatprep.subr.mxu1 %v2663_v59  ;;  %v2658_v44 = vld [vmem:[%s5320_s19 + $0x50] sm:$0xff]  ;;  %s4023_s19 = smov [#allocation26]  }
0x1adb   :  { %3502 = vmatpush3.msra.mxu1 %v2663_v59  ;;  %s2945_s11 = sshll.u32 %s4023_s19, 4  ;;  %s2946_s11 = int_to_ptr.vmem [resolvable:$true] %s2945_s11 }
0x1adc   :  { %3503 = vmatprep.subr.mxu1 %v2662_v27  ;;  %s3942_s6 = scalar_lea.vmem %s2946_s11, 16  ;;  %s3946_s9 = scalar_lea.vmem %s2946_s11, 32 }
0x1add   :  { %3504 = vmatpush3.msra.mxu1 %v2662_v27  ;;  %p3943_p4 = scmp.ne.s32.totalorder %s2946_s11, %s3942_s6  ;;  %p3947_p5 = scmp.lt.s32.totalorder %s2946_s11, %s2946_s11 }
0x1ade   :  { %3505 = vmatprep.subr.mxu1 %v2661_v17  ;;  %p3948_p6 = scmp.lt.s32.totalorder %s3946_s9, %s3942_s6 }
0x1adf   :  { %3506 = vmatpush3.msra.mxu1 %v2661_v17 }
0x1ae0   :  { %3507 = vmatprep.subr.mxu1 %v2660_v3  ;;  %p3949_p7 = por %p3948_p6, %p3947_p5 }
0x1ae1   :  { %3508 = vmatpush3.msra.mxu1 %v2660_v3 }
0x1ae2   :  { %3509 = vmatprep.subr.mxu1 %v2659_v1  ;;  %p3950_p8 = pnand %p3949_p7, %p3943_p4 }
0x1ae3   :  { %3510 = vmatpush3.msra.mxu1 %v2659_v1 }
0x1ae4   :  { %3511 = vmatprep.subr.mxu1 %v2658_v44 }
0x1ae5   :  { %3512 = vmatpush3.msra.mxu1 %v2658_v44 }
0x1ae6   :  { %3513 = vmatprep.subr.mxu1 %v2657_v22 }
0x1ae7   :  { %3514 = vmatpush3.msra.mxu1 %v2657_v22 }
0x1ae8   :  { %3515 = vmatprep.subr.mxu1 %v2656_v23 }
0x1ae9   :  { %3516 = vmatpush3.msra.mxu1 %v2656_v23 }
0x1aea   :  { %3517 = vmatprep.subr.mxu1 %v2655_v15 }
0x1aeb   :  { %3518 = vmatpush3.msra.mxu1 %v2655_v15 }
0x1aec   :  { %3519 = vmatprep.subr.mxu1 %v2654_v31 }
0x1aed   :  { %3520 = vmatpush3.msra.mxu1 %v2654_v31 }
0x1aee   :  { %3521 = vmatprep.subr.mxu1 %v2653_v32 }
0x1aef   :  { %3522 = vmatpush3.msra.mxu1 %v2653_v32 }
0x1af0   :  { %3523 = vmatprep.subr.mxu1 %v2652_v34 }
0x1af1   :  { %3524 = vmatpush3.msra.mxu1 %v2652_v34 }
0x1af2   :  { %3525 = vmatprep.subr.mxu1 %v2651_v35 }
0x1af3   :  { %3526 = vmatpush3.msra.mxu1 %v2651_v35 }
0x1af4   :  { %3527 = vmatprep.subr.mxu1 %v2650_v33 }
0x1af5   :  { %3528 = vmatpush3.msra.mxu1 %v2650_v33 }
0x1af6   :  { %3529 = vmatprep.subr.mxu1 %v2649_v36 }
0x1af7   :  { %3530 = vmatpush3.msra.mxu1 %v2649_v36 }
0x1af8   :  { %3531 = vmatprep.subr.mxu1 %v2648_v42 }
0x1af9   :  { %3532 = vmatpush3.msra.mxu1 %v2648_v42 }
0x1b79   :  { %v3409_v37 = vpop.f32.mrf.mxu1 }
0x1b7b   :  { %v2395_v28 = vpop.f32.mrf.mxu1 }
0x1b7c   :  { %3533 = vmatprep.mubr.f32.mxu1 %v2395_v28 }
0x1b7d   :  { %v3412_v13 = vpop.f32.mrf.mxu1  ;;  %3534 = vmatmul.mubr.f32.vlgmr.msra.gmra.mxu1 %v3409_v37 }
0x1b7f   :  { %v2405_v20 = vpop.f32.mrf.mxu1 }
0x1b80   :  { %3536 = vmatprep.mubr.f32.mxu1 %v2405_v20 }
0x1b81   :  { %3537 = vmatmul.mubr.f32.gmra.mxu1 %v3412_v13 }
0x1b82   :  { %v3415_v38 = vpop.f32.mrf.mxu1 }
0x1b84   :  { %v2415_v40 = vpop.f32.mrf.mxu1 }
0x1b85   :  { %3539 = vmatprep.mubr.f32.mxu1 %v2415_v40 }
0x1b86   :  { %v3418_v43 = vpop.f32.mrf.mxu1  ;;  %3540 = vmatmul.mubr.f32.gmra.mxu1 %v3415_v38 }
0x1b88   :  { %v2425_v46 = vpop.f32.mrf.mxu1 }
0x1b89   :  { %3542 = vmatprep.mubr.f32.mxu1 %v2425_v46 }
0x1b8a   :  { %v3421_v6 = vpop.f32.mrf.mxu1  ;;  %3543 = vmatmul.mubr.f32.gmra.mxu1 %v3418_v43 }
0x1b8c   :  { %v2435_v47 = vpop.f32.mrf.mxu1 }
0x1b8d   :  { %3545 = vmatprep.mubr.f32.mxu1 %v2435_v47 }
0x1b8e   :  { %v3424_v48 = vpop.f32.mrf.mxu1  ;;  %3546 = vmatmul.mubr.f32.gmra.mxu1 %v3421_v6 }
0x1b90   :  { %v2445_v50 = vpop.f32.mrf.mxu1 }
0x1b91   :  { %3548 = vmatprep.mubr.f32.mxu1 %v2445_v50 }
0x1b92   :  { %v3427_v39 = vpop.f32.mrf.mxu1  ;;  %3549 = vmatmul.mubr.f32.gmra.mxu1 %v3424_v48 }
0x1b94   :  { %v2455_v51 = vpop.f32.mrf.mxu1 }
0x1b95   :  { %3551 = vmatprep.mubr.f32.mxu1 %v2455_v51 }
0x1b96   :  { %v3430_v54 = vpop.f32.mrf.mxu1  ;;  %3552 = vmatmul.mubr.f32.gmra.mxu1 %v3427_v39 }
0x1b98   :  { %v2465_v55 = vpop.f32.mrf.mxu1 }
0x1b99   :  { %3554 = vmatprep.mubr.f32.mxu1 %v2465_v55 }
0x1b9a   :  { %v2572_v57 = vpop.f32.mrf.mxu1  ;;  %3555 = vmatmul.mubr.f32.gmra.mxu1 %v3430_v54 }
0x1b9c   :  { %v3465_v60 = vpop.f32.mrf.mxu1 }
0x1b9d   :  { %3953 = shalt.err (!%p3950_p8)
}
0x1b9e   :  { %2948 = dma.vmem_to_hbm [thread:$0]  %s2946_s11, 16, %s5325_s24, [#allocation27]   ;;  %v2643_v8 = vadd.f32 %v4640_v62, %v2572_v57  ;;  %v2646_v9 = vld [vmem:[#allocation23] sm:$0x1]  ;;  %v2829_v44 = vcvt.s32.f32 %v4237_v4  ;;  %vm5457_vm8 = vnez %v5387_v53  ;;  %vm5458_vm13 = vnez %v5404_v12 }
0x1b9f   :  { %vm5459_vm14 = vnez %v5398_v2  ;;  %s4024_s24 = smov [#allocation25]   ;;  %vm5460_vm12 = vnez %v5411_v29  ;;  %vm5461_vm2 = vnez %v5407_v14 }
0x1ba0   :  { %v2647_v63 = vadd.f32 %v2646_v9, %v2643_v8  ;;  %vm2845_vm1 = vcmp.lt.f32.partialorder %v2829_v44, %v4744_v10  ;;  %s2932_s20 = sshll.u32 %s4024_s24, 4  ;;  %s2933_s20 = int_to_ptr.vmem [resolvable:$true] %s2932_s20 }
0x1ba1   :  { %s3962_s16 = scalar_lea.vmem %s2933_s20, 2048  ;;  %p3967_p10 = scmp.lt.s32.totalorder %s2933_s20, %s2933_s20 }
0x1ba2   :  { %v5245_v0 = vrot.slane %v2647_v63, %v4271_v30  ;;  %p3963_p9 = scmp.ne.s32.totalorder %s2933_s20, %s3962_s16  ;;  %p3968_p11 = scmp.lt.s32.totalorder %s3962_s16, %s3962_s16 }
0x1ba4   :  { %p3969_p12 = por %p3968_p11, %p3967_p10 }
0x1ba6   :  { %p3970_p13 = pnand %p3969_p12, %p3963_p9 }
0x1c3d   :  { %v3535_v5 = vpop.f32.mrf.mxu1 }
0x1c3e   :  { %v2740_v52 = vadd.f32 %v3535_v5, %v5245_v0 }
0x1c3f   :  { %v2734_v58 = vpop.f32.mrf.mxu1 }
0x1c40   :  { %3662 = vtanh.f32 %v2740_v52  ;;  %v2735_v18 = vadd.f32 %v2734_v58, %v5245_v0 }
0x1c41   :  { %v3538_v7 = vpop.f32.mrf.mxu1 }
0x1c42   :  { %3664 = vtanh.f32 %v2735_v18  ;;  %v2750_v11 = vadd.f32 %v3538_v7, %v5245_v0 }
0x1c43   :  { %v2744_v56 = vpop.f32.mrf.mxu1 }
0x1c44   :  { %3666 = vtanh.f32 %v2750_v11  ;;  %v2745_v62 = vadd.f32 %v2744_v56, %v5245_v0 }
0x1c46   :  { %v3541_v59 = vpop.f32.mrf.mxu1  ;;  %3668 = vtanh.f32 %v2745_v62 }
0x1c47   :  { %v2760_v30 = vadd.f32 %v3541_v59, %v5245_v0 }
0x1c48   :  { %v2754_v27 = vpop.f32.mrf.mxu1 }
0x1c49   :  { %3670 = vtanh.f32 %v2760_v30  ;;  %v2755_v17 = vadd.f32 %v2754_v27, %v5245_v0 }
0x1c4a   :  { %v3544_v3 = vpop.f32.mrf.mxu1 }
0x1c4b   :  { %3672 = vtanh.f32 %v2755_v17  ;;  %v2770_v1 = vadd.f32 %v3544_v3, %v5245_v0 }
0x1c4c   :  { %v2764_v22 = vpop.f32.mrf.mxu1 }
0x1c4d   :  { %3674 = vtanh.f32 %v2770_v1  ;;  %v2765_v23 = vadd.f32 %v2764_v22, %v5245_v0  ;;  %v3663_v15 = vpop.eup %3662 }
0x1c4e   :  { %v3547_v31 = vpop.f32.mrf.mxu1  ;;  %v2894_v32 = vsel %vm5015_vm9, %v3663_v15, 0.0  ;;  %vm5456_vm9 = vnez %v5391_v16 }
0x1c4f   :  { %3676 = vtanh.f32 %v2765_v23  ;;  %v2780_v34 = vadd.f32 %v3547_v31, %v5245_v0  ;;  %v3665_v35 = vpop.eup %3664  ;;  %2910 = vst [vmem:[#allocation25 + $0x8] sm:$0xff] %v2894_v32 }
0x1c50   :  { %v2774_v33 = vpop.f32.mrf.mxu1  ;;  %v2893_v36 = vsel %vm2845_vm1, %v3665_v35, 0.0 }
0x1c51   :  { %3678 = vtanh.f32 %v2780_v34  ;;  %v2775_v4 = vadd.f32 %v2774_v33, %v5245_v0  ;;  %v3667_v42 = vpop.eup %3666  ;;  %2909 = vst [vmem:[#allocation25] sm:$0xff] %v2893_v36 }
0x1c52   :  { %v3550_v37 = vpop.f32.mrf.mxu1  ;;  %v2896_v28 = vsel %vm4765_vm4, %v3667_v42, 0.0  ;;  %vm5453_vm4 = vnez %v5356_v24 }
0x1c53   :  { %3680 = vtanh.f32 %v2775_v4  ;;  %v2790_v45 = vadd.f32 %v3550_v37, %v5245_v0  ;;  %v3669_v13 = vpop.eup %3668  ;;  %2912 = vst [vmem:[#allocation25 + $0x18] sm:$0xff] %v2896_v28 }
0x1c54   :  { %v2784_v20 = vpop.f32.mrf.mxu1  ;;  %v2895_v10 = vsel %vm4760_vm3, %v3669_v13, 0.0  ;;  %vm5452_vm3 = vnez %v5358_v26 }
0x1c55   :  { %3682 = vtanh.f32 %v2790_v45  ;;  %v2785_v38 = vadd.f32 %v2784_v20, %v5245_v0  ;;  %2911 = vst [vmem:[#allocation25 + $0x10] sm:$0xff] %v2895_v10 }
0x1c56   :  { %v3671_v40 = vpop.eup %3670  ;;  %v3553_v43 = vpop.f32.mrf.mxu1 }
0x1c57   :  { %v2898_v46 = vsel %vm4776_vm6, %v3671_v40, 0.0  ;;  %3684 = vtanh.f32 %v2785_v38  ;;  %v2800_v61 = vadd.f32 %v3553_v43, %v5245_v0  ;;  %vm5455_vm6 = vnez %v5379_v41 }
0x1c58   :  { %v3673_v6 = vpop.eup %3672  ;;  %2914 = vst [vmem:[#allocation25 + $0x28] sm:$0xff] %v2898_v46  ;;  %v2794_v47 = vpop.f32.mrf.mxu1 }
0x1c59   :  { %v2897_v48 = vsel %vm4771_vm5, %v3673_v6, 0.0  ;;  %3686 = vtanh.f32 %v2800_v61  ;;  %v2795_v19 = vadd.f32 %v2794_v47, %v5245_v0  ;;  %vm5454_vm5 = vnez %v5385_v49 }
0x1c5a   :  { %v3675_v50 = vpop.eup %3674  ;;  %2913 = vst [vmem:[#allocation25 + $0x20] sm:$0xff] %v2897_v48  ;;  %v3556_v39 = vpop.f32.mrf.mxu1 }
0x1c5b   :  { %v2900_v51 = vsel %vm5452_vm3, %v3675_v50, 0.0  ;;  %3688 = vtanh.f32 %v2795_v19  ;;  %v2810_v25 = vadd.f32 %v3556_v39, %v5245_v0 }
0x1c5c   :  { %v3677_v54 = vpop.eup %3676  ;;  %2916 = vst [vmem:[#allocation25 + $0x38] sm:$0xff] %v2900_v51  ;;  %v2804_v55 = vpop.f32.mrf.mxu1 }
0x1c5d   :  { %v2899_v57 = vsel %vm5453_vm4, %v3677_v54, 0.0  ;;  %3690 = vtanh.f32 %v2810_v25  ;;  %v2805_v21 = vadd.f32 %v2804_v55, %v5245_v0 }
0x1c5e   :  { %v3679_v60 = vpop.eup %3678  ;;  %2915 = vst [vmem:[#allocation25 + $0x30] sm:$0xff] %v2899_v57 }
0x1c5f   :  { %v2902_v8 = vsel %vm5454_vm5, %v3679_v60, 0.0  ;;  %3692 = vtanh.f32 %v2805_v21 }
0x1c60   :  { %v3681_v26 = vpop.eup %3680  ;;  %2918 = vst [vmem:[#allocation25 + $0x48] sm:$0xff] %v2902_v8 }
0x1c61   :  { %v2901_v9 = vsel %vm5455_vm6, %v3681_v26, 0.0 }
0x1c62   :  { %v3683_v63 = vpop.eup %3682  ;;  %2917 = vst [vmem:[#allocation25 + $0x40] sm:$0xff] %v2901_v9 }
0x1c63   :  { %v2904_v24 = vsel %vm5456_vm9, %v3683_v63, 0.0 }
0x1c64   :  { %v3685_v5 = vpop.eup %3684  ;;  %2920 = vst [vmem:[#allocation25 + $0x58] sm:$0xff] %v2904_v24 }
0x1c65   :  { %v2903_v0 = vsel %vm5457_vm8, %v3685_v5, 0.0 }
0x1c66   :  { %v3687_v52 = vpop.eup %3686  ;;  %2919 = vst [vmem:[#allocation25 + $0x50] sm:$0xff] %v2903_v0 }
0x1c67   :  { %v2906_v49 = vsel %vm5458_vm13, %v3687_v52, 0.0 }
0x1c68   :  { %v3689_v58 = vpop.eup %3688  ;;  %2922 = vst [vmem:[#allocation25 + $0x68] sm:$0xff] %v2906_v49 }
0x1c69   :  { %v2905_v41 = vsel %vm5459_vm14, %v3689_v58, 0.0 }
0x1c6a   :  { %v3691_v18 = vpop.eup %3690  ;;  %2921 = vst [vmem:[#allocation25 + $0x60] sm:$0xff] %v2905_v41 }
0x1c6b   :  { %v2908_v16 = vsel %vm5460_vm12, %v3691_v18, 0.0 }
0x1c6c   :  { %v3693_v7 = vpop.eup %3692  ;;  %2924 = vst [vmem:[#allocation25 + $0x78] sm:$0xff] %v2908_v16 }
0x1c6d   :  { %v2907_v53 = vsel %vm5461_vm2, %v3693_v7, 0.0 }
0x1c6e   :  { %2923 = vst [vmem:[#allocation25 + $0x70] sm:$0xff] %v2907_v53 }
0x1c6f   :  { %3973 = shalt.err (!%p3970_p13)
}
0x1c70   :  { %2938 = dma.vmem_to_hbm [thread:$0]  %s2933_s20, 2048, %s5324_s23, [#allocation5], %s4009_s0, %s4009_s0, %s4010_s28  }
0x1c71   :  { %3998 = dma.done.wait [#allocation5], 2048  }
0x1c72   :  { %3999 = vsyncadd [#allocation5], 4294965248 }
0x1c73   :  { %4000 = dma.done.wait [#allocation27], 16  }
0x1c74   :  { %4001 = vsyncadd [#allocation27], 4294967280 }
0x1c75   :  { %2955 = vsyncpa [#allocation4], 1 }
0x1c76   :  { %2956 = vsyncpa [#allocation9], 1 }
0x1c77   :  { %2957 = vsyncpa [#allocation12], 1 }
0x1c78   :  { %2958 = vsyncpa [#allocation15], 1 }
0x1c79   :  { %2959 = vsyncpa [#allocation18], 1 }
0x1c7a   :  { %2960 = vsyncpa [#allocation21], 1 }
0x1c7b   :  { %2961 = vsyncpa [#allocation24], 1 }
0x1c7c   :  { %2962 = vsyncpa [#allocation5], 1 }
0x1c7d   :  { %2963 = vsyncpa [#allocation27], 1 }
0x1c7e   :  { %2964 = vsyncpa [#allocation6], 1 }

</bundles_post_ra>
